<compile_context>
chip_gen: v7x
topology: tpu7x:2x2x1
jax: 0.10.0
libtpu: 0.0.40
codegen_flags: <defaults>
</compile_context>

<pallas_src>
import functools

import jax
import jax.numpy as jnp
from jax.experimental import pallas as pl
from jax.experimental.pallas import tpu as pltpu


def _round_up(x, m):
    return ((x + m - 1) // m) * m


def _vmem_bytes(th, sh, Wp, W, W_out, c_in, c_out):
    """Rough per-step VMEM footprint estimate for an output-row tile of size th."""
    rows = th * sh
    in_a = 2 * rows * Wp * c_in * 2          # main input tile, double-buffered, bf16
    in_b = 2 * 2 * Wp * c_in * 2             # 2 halo rows, double-buffered, bf16
    wts = 2 * 9 * c_in * c_out * 2           # weights, bf16
    outb = 2 * th * W_out * c_out * 4        # output tile, double-buffered, f32
    x_all = (rows + 2) * Wp * c_in * 2       # staging scratch, bf16
    accb = rows * W * c_out * 4              # accumulator scratch, f32
    return in_a + in_b + wts + outb + x_all + accb + (1 << 16)


def _pick_tile_h(H_out, sh, Wp, W, W_out, c_in, c_out, budget_bytes):
    # Valid tile heights: divide H_out and (multiple of 8, or H_out itself) so the
    # output block's second-to-last dim satisfies the (8, 128) block-layout rule.
    cands = {H_out}
    for d in range(8, H_out, 8):
        if H_out % d == 0:
            cands.add(d)
    for th in sorted(cands, reverse=True):
        if _vmem_bytes(th, sh, Wp, W, W_out, c_in, c_out) <= budget_bytes:
            return th
    return min(cands)  # best effort if even the smallest tile exceeds the budget


def _conv3x3_bn_lrelu_kernel(xa_ref, xb1_ref, xb2_ref, w_ref, scale_ref, bias_ref,
                             o_ref, x_all, acc,
                             *, rows, Wp, W, th, sh, sw, W_out, lrelu_eps):
    """One (batch, H-tile) grid step.

    xa_ref:    (rows, Wp, c_in)    bf16 -- rows = th*sh padded-input rows of this tile
    xb1_ref:   (1, Wp, c_in)       bf16 -- halo row  (local index rows)
    xb2_ref:   (1, Wp, c_in)       bf16 -- halo row  (local index rows + 1)
    w_ref:     (3, 3, c_in, c_out) bf16
    scale_ref: (1, c_out)          f32  -- folded BN scale
    bias_ref:  (1, c_out)          f32  -- folded BN bias
    o_ref:     (th, W_out, c_out)  f32
    x_all:     (rows+2, Wp, c_in)  bf16 VMEM scratch (halo-assembled input tile)
    acc:       (rows, W, c_out)    f32  VMEM scratch (stride-1 partial sums)
    """
    c_in = xa_ref.shape[-1]
    c_out = o_ref.shape[-1]

    # Stage the haloed input tile once (single VMEM copy; replaces v1's 6 per-tap
    # shifted-reshape relayout copies).
    x_all[0:rows, :, :] = xa_ref[...]
    x_all[rows:rows + 1, :, :] = xb1_ref[...]
    x_all[rows + 1:rows + 2, :, :] = xb2_ref[...]

    # 3x3 conv as 9 full-width MXU matmuls, bf16 inputs, f32 accumulation.
    for ky in range(3):
        # Row-collapse reshape is layout-free because Wp % 8 == 0.
        lhs = x_all[ky:ky + rows, :, :].reshape(rows * Wp, c_in)
        part = None
        for kx in range(3):
            p = jnp.dot(lhs, w_ref[ky, kx], preferred_element_type=jnp.float32)
            p = p.reshape(rows, Wp, c_out)[:, kx:kx + W, :]   # kx shift on partial sums
            part = p if part is None else part + p
        if ky == 0:
            acc[...] = part
        else:
            acc[...] += part

    # Strided output selection (trace-time branch; stride == 1 is the common path).
    if sh == 1 and sw == 1:
        y = acc[...]
    else:
        y = acc[pl.ds(0, th, stride=sh), pl.ds(0, W_out, stride=sw), :]

    # Folded BatchNorm + LeakyReLU epilogue in f32 (v5e has no bf16 VPU).
    y = y * scale_ref[0] + bias_ref[0]
    y = jnp.where(y >= 0, y, lrelu_eps * y)
    o_ref[...] = y.astype(o_ref.dtype)


def conv2d3x3_forward(x_nchw, weight, bn_gamma, bn_beta,
                      bn_running_mean, bn_running_var,
                      *, stride=1, bn_eps=1e-5, lrelu_eps=0.2,
                      tile_h=None, vmem_budget_bytes=24 * 1024 * 1024):
    """Forward pass matching Conv2D3x3 (use_bn=True, use_up=False, eval-mode BN).

    x_nchw: (N, C_in, H, W) f32;  weight: (C_out, C_in, 3, 3) f32 (bias=False).
    Returns (N, C_out, H_out, W_out) f32.
    """
    if isinstance(stride, int):
        stride = (stride, stride)
    sh, sw = stride
    N, c_in, H, W = x_nchw.shape
    c_out = weight.shape[0]

    H_out = (H - 1) // sh + 1
    W_out = (W - 1) // sw + 1

    # ---- glue (plain JAX): layout, padding, BN folding, bf16 cast -------------------
    x_nhwc = jnp.transpose(x_nchw, (0, 2, 3, 1))                      # N,H,W,C
    Wp = _round_up(W + 2, 8)                                          # aligned padded W
    Hp = H_out * sh + 2                                               # halo rows in-bounds
    x_pad = jnp.pad(
        x_nhwc, ((0, 0), (1, Hp - H - 1), (1, Wp - W - 1), (0, 0))
    ).astype(jnp.bfloat16)
    w_hwio = jnp.transpose(weight, (2, 3, 1, 0)).astype(jnp.bfloat16)  # 3,3,Ci,Co

    scale = (bn_gamma / jnp.sqrt(bn_running_var + bn_eps)).astype(jnp.float32)
    bias = bn_beta.astype(jnp.float32) - bn_running_mean.astype(jnp.float32) * scale
    scale = scale.reshape(1, c_out)
    bias = bias.reshape(1, c_out)

    # ---- tiling ----------------------------------------------------------------------
    if tile_h is None:
        th = _pick_tile_h(H_out, sh, Wp, W, W_out, c_in, c_out, vmem_budget_bytes)
    else:
        th = int(tile_h)
        if H_out % th != 0 or (th % 8 != 0 and th != H_out):
            raise ValueError(
                f"tile_h={th} must divide H_out={H_out} and be a multiple of 8 "
                f"(or equal H_out)")
    n_h = H_out // th
    rows = th * sh                     # padded-input rows per tile (before the 2 halo rows)

    kernel = functools.partial(
        _conv3x3_bn_lrelu_kernel,
        rows=rows, Wp=Wp, W=W, th=th, sh=sh, sw=sw, W_out=W_out, lrelu_eps=lrelu_eps)

    flops = 2 * 9 * N * n_h * (rows * Wp) * c_in * c_out
    bytes_accessed = (int(x_pad.size) * 2 + int(w_hwio.size) * 2
                      + (int(scale.size) + int(bias.size)) * 4
                      + N * H_out * W_out * c_out * 4)

    est = _vmem_bytes(th, sh, Wp, W, W_out, c_in, c_out)
    vmem_limit = None if est <= 30 * 1024 * 1024 else int(
        min(est * 5 // 4, 100 * 1024 * 1024))
    compiler_params = pltpu.CompilerParams(
        dimension_semantics=("parallel", "parallel"),
        vmem_limit_bytes=vmem_limit)

    # ---- hot path: Pallas kernel, one grid step per (batch, H-tile) ------------------
    y_nhwc = pl.pallas_call(
        kernel,
        out_shape=jax.ShapeDtypeStruct((N, H_out, W_out, c_out), jnp.float32),
        grid_spec=pltpu.PrefetchScalarGridSpec(
            num_scalar_prefetch=0,
            grid=(N, n_h),
            in_specs=[
                # main rows of the tile
                pl.BlockSpec((None, rows, Wp, c_in), lambda n, i: (n, i, 0, 0)),
                # two 1-row halo blocks from the same padded input array
                pl.BlockSpec((None, 1, Wp, c_in),
                             lambda n, i: (n, (i + 1) * rows, 0, 0)),
                pl.BlockSpec((None, 1, Wp, c_in),
                             lambda n, i: (n, (i + 1) * rows + 1, 0, 0)),
                # weights / folded BN params (resident across the grid)
                pl.BlockSpec((3, 3, c_in, c_out), lambda n, i: (0, 0, 0, 0)),
                pl.BlockSpec((1, c_out), lambda n, i: (0, 0)),
                pl.BlockSpec((1, c_out), lambda n, i: (0, 0)),
            ],
            out_specs=pl.BlockSpec((None, th, W_out, c_out),
                                   lambda n, i: (n, i, 0, 0)),
            scratch_shapes=[
                pltpu.VMEM((rows + 2, Wp, c_in), jnp.bfloat16),   # haloed input staging
                pltpu.VMEM((rows, W, c_out), jnp.float32),        # f32 accumulator
            ],
        ),
        compiler_params=compiler_params,
        cost_estimate=pl.CostEstimate(flops=int(flops), transcendentals=0,
                                      bytes_accessed=int(bytes_accessed)),
    )(x_pad, x_pad, x_pad, w_hwio, scale, bias)

    # back to NCHW (PyTorch convention)
    return jnp.transpose(y_nhwc, (0, 3, 1, 2))


def _reference(x, weight, gamma, beta, mean, var, stride, bn_eps, lrelu_eps):
    if isinstance(stride, int):
        stride = (stride, stride)
    y = jax.lax.conv_general_dilated(
        x, weight, window_strides=stride, padding=((1, 1), (1, 1)),
        dimension_numbers=("NCHW", "OIHW", "NCHW"))
    scale = gamma / jnp.sqrt(var + bn_eps)
    bias = beta - mean * scale
    y = y * scale[None, :, None, None] + bias[None, :, None, None]
    return jnp.where(y >= 0, y, lrelu_eps * y)


if __name__ == "__main__":
    # Small deterministic example consistent with Conv2D3x3(c_in=4, c_out=8, stride=1,
    # use_bn=True, use_up=False, lrelu_eps=0.2), eval-mode BN with default running stats.
    key = jax.random.PRNGKey(0)
    k_x, k_w, k_g, k_b = jax.random.split(key, 4)

    N, c_in, c_out, H, W = 2, 4, 8, 16, 16

    x = jax.random.normal(k_x, (N, c_in, H, W), dtype=jnp.float32)
    weight = jax.random.normal(k_w, (c_out, c_in, 3, 3), dtype=jnp.float32) * 0.1
    bn_gamma = 1.0 + 0.1 * jax.random.normal(k_g, (c_out,), dtype=jnp.float32)
    bn_beta = 0.1 * jax.random.normal(k_b, (c_out,), dtype=jnp.float32)
    bn_running_mean = jnp.zeros((c_out,), dtype=jnp.float32)   # PyTorch defaults (eval)
    bn_running_var = jnp.ones((c_out,), dtype=jnp.float32)

    ref = _reference(x, weight, bn_gamma, bn_beta, bn_running_mean, bn_running_var,
                     1, 1e-5, 0.2)

    # (a) auto tile size (single H-tile per image at these shapes)
    out_a = conv2d3x3_forward(x, weight, bn_gamma, bn_beta,
                              bn_running_mean, bn_running_var,
                              stride=1, bn_eps=1e-5, lrelu_eps=0.2)
    out_a = jax.block_until_ready(out_a)
    assert out_a.shape == (N, c_out, H, W), out_a.shape
    assert bool(jnp.allclose(out_a, ref, atol=5e-2, rtol=5e-2))

    # (b) explicit tile_h=8 -> 2 H-tiles per image, exercises the halo BlockSpecs
    out_b = conv2d3x3_forward(x, weight, bn_gamma, bn_beta,
                              bn_running_mean, bn_running_var,
                              stride=1, bn_eps=1e-5, lrelu_eps=0.2, tile_h=8)
    out_b = jax.block_until_ready(out_b)
    assert bool(jnp.allclose(out_b, ref, atol=5e-2, rtol=5e-2))

    print("KERNEL_OK")
</pallas_src>

<mosaic_0001>
module attributes {stable_mosaic.version = 11 : i64} {
  func.func @_conv3x3_bn_lrelu_kernel(%arg0: i32, %arg1: i32, %arg2: memref<1x16x24x4xbf16, #tpu.memory_space<vmem>>, %arg3: memref<1x1x24x4xbf16, #tpu.memory_space<vmem>>, %arg4: memref<1x1x24x4xbf16, #tpu.memory_space<vmem>>, %arg5: memref<3x3x4x8xbf16, #tpu.memory_space<vmem>>, %arg6: memref<1x8xf32, #tpu.memory_space<vmem>>, %arg7: memref<1x8xf32, #tpu.memory_space<vmem>>, %arg8: memref<1x16x16x8xf32, #tpu.memory_space<vmem>>, %arg9: memref<18x24x4xbf16, #tpu.memory_space<vmem>>, %arg10: memref<16x16x8xf32, #tpu.memory_space<vmem>>) attributes {dimension_semantics = [#tpu.dimension_semantics<parallel>, #tpu.dimension_semantics<parallel>], iteration_bounds = array<i64: 2, 1>, scalar_prefetch = 0 : i64, scratch_operands = 2 : i64, tpu.core_type = #tpu.core_type<tc>, window_params = [{transform_indices = @transform_0, window_bounds = array<i64: 1, 16, 24, 4>}, {transform_indices = @transform_1, window_bounds = array<i64: 1, 1, 24, 4>}, {transform_indices = @transform_2, window_bounds = array<i64: 1, 1, 24, 4>}, {pipeline_mode = #tpu.pipeline_mode<synchronous>, transform_indices = @transform_3, window_bounds = array<i64: 3, 3, 4, 8>}, {pipeline_mode = #tpu.pipeline_mode<synchronous>, transform_indices = @transform_4, window_bounds = array<i64: 1, 8>}, {pipeline_mode = #tpu.pipeline_mode<synchronous>, transform_indices = @transform_5, window_bounds = array<i64: 1, 8>}, {transform_indices = @transform_6, window_bounds = array<i64: 1, 16, 16, 8>}]} {
    %c0 = arith.constant 0 : index
    %c0_0 = arith.constant 0 : index
    %c0_1 = arith.constant 0 : index
    %c0_2 = arith.constant 0 : index
    %0 = vector.load %arg2[%c0, %c0_0, %c0_1, %c0_2] : memref<1x16x24x4xbf16, #tpu.memory_space<vmem>>, vector<1x16x24x4xbf16>
    %1 = vector.shape_cast %0 : vector<1x16x24x4xbf16> to vector<16x24x4xbf16>
    %c0_3 = arith.constant 0 : index
    %c0_4 = arith.constant 0 : index
    %c0_5 = arith.constant 0 : index
    %2 = vector.load %arg9[%c0_3, %c0_4, %c0_5] : memref<18x24x4xbf16, #tpu.memory_space<vmem>>, vector<16x24x4xbf16>
    tpu.vector_store %arg9[%c0_3, %c0_4, %c0_5], %1 {strides = array<i32>} : memref<18x24x4xbf16, #tpu.memory_space<vmem>>, vector<16x24x4xbf16>,
    %c0_6 = arith.constant 0 : index
    %c0_7 = arith.constant 0 : index
    %c0_8 = arith.constant 0 : index
    %c0_9 = arith.constant 0 : index
    %3 = vector.load %arg3[%c0_6, %c0_7, %c0_8, %c0_9] : memref<1x1x24x4xbf16, #tpu.memory_space<vmem>>, vector<1x1x24x4xbf16>
    %4 = vector.shape_cast %3 : vector<1x1x24x4xbf16> to vector<1x24x4xbf16>
    %c16 = arith.constant 16 : index
    %c0_10 = arith.constant 0 : index
    %c0_11 = arith.constant 0 : index
    %5 = vector.load %arg9[%c16, %c0_10, %c0_11] : memref<18x24x4xbf16, #tpu.memory_space<vmem>>, vector<1x24x4xbf16>
    tpu.vector_store %arg9[%c16, %c0_10, %c0_11], %4 {strides = array<i32>} : memref<18x24x4xbf16, #tpu.memory_space<vmem>>, vector<1x24x4xbf16>,
    %c0_12 = arith.constant 0 : index
    %c0_13 = arith.constant 0 : index
    %c0_14 = arith.constant 0 : index
    %c0_15 = arith.constant 0 : index
    %6 = vector.load %arg4[%c0_12, %c0_13, %c0_14, %c0_15] : memref<1x1x24x4xbf16, #tpu.memory_space<vmem>>, vector<1x1x24x4xbf16>
    %7 = vector.shape_cast %6 : vector<1x1x24x4xbf16> to vector<1x24x4xbf16>
    %c17 = arith.constant 17 : index
    %c0_16 = arith.constant 0 : index
    %c0_17 = arith.constant 0 : index
    %8 = vector.load %arg9[%c17, %c0_16, %c0_17] : memref<18x24x4xbf16, #tpu.memory_space<vmem>>, vector<1x24x4xbf16>
    tpu.vector_store %arg9[%c17, %c0_16, %c0_17], %7 {strides = array<i32>} : memref<18x24x4xbf16, #tpu.memory_space<vmem>>, vector<1x24x4xbf16>,
    %c0_18 = arith.constant 0 : index
    %c0_19 = arith.constant 0 : index
    %c0_20 = arith.constant 0 : index
    %9 = vector.load %arg9[%c0_18, %c0_19, %c0_20] : memref<18x24x4xbf16, #tpu.memory_space<vmem>>, vector<16x24x4xbf16>
    %10 = vector.shape_cast %9 : vector<16x24x4xbf16> to vector<384x4xbf16>
    %c0_21 = arith.constant 0 : index
    %c0_22 = arith.constant 0 : index
    %c0_23 = arith.constant 0 : index
    %c0_24 = arith.constant 0 : index
    %11 = vector.load %arg5[%c0_21, %c0_22, %c0_23, %c0_24] : memref<3x3x4x8xbf16, #tpu.memory_space<vmem>>, vector<1x1x4x8xbf16>
    %12 = vector.shape_cast %11 : vector<1x1x4x8xbf16> to vector<4x8xbf16>
    %cst = arith.constant dense<0.000000e+00> : vector<384x8xf32>
    %13 = tpu.matmul %10, %12, %cst {dimension_numbers = #tpu.dot_dimension_numbers<[1], [0], [0], [1], [0, 0, 1, 1], [], []>} : vector<384x4xbf16>, vector<4x8xbf16>, vector<384x8xf32> -> vector<384x8xf32>
    %14 = vector.shape_cast %13 : vector<384x8xf32> to vector<16x24x8xf32>
    %15 = vector.extract_strided_slice %14 {offsets = [0, 0, 0], sizes = [16, 16, 8], strides = [1, 1, 1]} : vector<16x24x8xf32> to vector<16x16x8xf32>
    %c0_25 = arith.constant 0 : index
    %c1 = arith.constant 1 : index
    %c0_26 = arith.constant 0 : index
    %c0_27 = arith.constant 0 : index
    %16 = vector.load %arg5[%c0_25, %c1, %c0_26, %c0_27] : memref<3x3x4x8xbf16, #tpu.memory_space<vmem>>, vector<1x1x4x8xbf16>
    %17 = vector.shape_cast %16 : vector<1x1x4x8xbf16> to vector<4x8xbf16>
    %cst_28 = arith.constant dense<0.000000e+00> : vector<384x8xf32>
    %18 = tpu.matmul %10, %17, %cst_28 {dimension_numbers = #tpu.dot_dimension_numbers<[1], [0], [0], [1], [0, 0, 1, 1], [], []>} : vector<384x4xbf16>, vector<4x8xbf16>, vector<384x8xf32> -> vector<384x8xf32>
    %19 = vector.shape_cast %18 : vector<384x8xf32> to vector<16x24x8xf32>
    %20 = vector.extract_strided_slice %19 {offsets = [0, 1, 0], sizes = [16, 16, 8], strides = [1, 1, 1]} : vector<16x24x8xf32> to vector<16x16x8xf32>
    %21 = arith.addf %15, %20 : vector<16x16x8xf32>
    %c0_29 = arith.constant 0 : index
    %c2 = arith.constant 2 : index
    %c0_30 = arith.constant 0 : index
    %c0_31 = arith.constant 0 : index
    %22 = vector.load %arg5[%c0_29, %c2, %c0_30, %c0_31] : memref<3x3x4x8xbf16, #tpu.memory_space<vmem>>, vector<1x1x4x8xbf16>
    %23 = vector.shape_cast %22 : vector<1x1x4x8xbf16> to vector<4x8xbf16>
    %cst_32 = arith.constant dense<0.000000e+00> : vector<384x8xf32>
    %24 = tpu.matmul %10, %23, %cst_32 {dimension_numbers = #tpu.dot_dimension_numbers<[1], [0], [0], [1], [0, 0, 1, 1], [], []>} : vector<384x4xbf16>, vector<4x8xbf16>, vector<384x8xf32> -> vector<384x8xf32>
    %25 = vector.shape_cast %24 : vector<384x8xf32> to vector<16x24x8xf32>
    %26 = vector.extract_strided_slice %25 {offsets = [0, 2, 0], sizes = [16, 16, 8], strides = [1, 1, 1]} : vector<16x24x8xf32> to vector<16x16x8xf32>
    %27 = arith.addf %21, %26 : vector<16x16x8xf32>
    %c0_33 = arith.constant 0 : index
    %c0_34 = arith.constant 0 : index
    %c0_35 = arith.constant 0 : index
    %28 = vector.load %arg10[%c0_33, %c0_34, %c0_35] : memref<16x16x8xf32, #tpu.memory_space<vmem>>, vector<16x16x8xf32>
    tpu.vector_store %arg10[%c0_33, %c0_34, %c0_35], %27 {strides = array<i32>} : memref<16x16x8xf32, #tpu.memory_space<vmem>>, vector<16x16x8xf32>,
    %c1_36 = arith.constant 1 : index
    %c0_37 = arith.constant 0 : index
    %c0_38 = arith.constant 0 : index
    %29 = vector.load %arg9[%c1_36, %c0_37, %c0_38] : memref<18x24x4xbf16, #tpu.memory_space<vmem>>, vector<16x24x4xbf16>
    %30 = vector.shape_cast %29 : vector<16x24x4xbf16> to vector<384x4xbf16>
    %c1_39 = arith.constant 1 : index
    %c0_40 = arith.constant 0 : index
    %c0_41 = arith.constant 0 : index
    %c0_42 = arith.constant 0 : index
    %31 = vector.load %arg5[%c1_39, %c0_40, %c0_41, %c0_42] : memref<3x3x4x8xbf16, #tpu.memory_space<vmem>>, vector<1x1x4x8xbf16>
    %32 = vector.shape_cast %31 : vector<1x1x4x8xbf16> to vector<4x8xbf16>
    %cst_43 = arith.constant dense<0.000000e+00> : vector<384x8xf32>
    %33 = tpu.matmul %30, %32, %cst_43 {dimension_numbers = #tpu.dot_dimension_numbers<[1], [0], [0], [1], [0, 0, 1, 1], [], []>} : vector<384x4xbf16>, vector<4x8xbf16>, vector<384x8xf32> -> vector<384x8xf32>
    %34 = vector.shape_cast %33 : vector<384x8xf32> to vector<16x24x8xf32>
    %35 = vector.extract_strided_slice %34 {offsets = [0, 0, 0], sizes = [16, 16, 8], strides = [1, 1, 1]} : vector<16x24x8xf32> to vector<16x16x8xf32>
    %c1_44 = arith.constant 1 : index
    %c1_45 = arith.constant 1 : index
    %c0_46 = arith.constant 0 : index
    %c0_47 = arith.constant 0 : index
    %36 = vector.load %arg5[%c1_44, %c1_45, %c0_46, %c0_47] : memref<3x3x4x8xbf16, #tpu.memory_space<vmem>>, vector<1x1x4x8xbf16>
    %37 = vector.shape_cast %36 : vector<1x1x4x8xbf16> to vector<4x8xbf16>
    %cst_48 = arith.constant dense<0.000000e+00> : vector<384x8xf32>
    %38 = tpu.matmul %30, %37, %cst_48 {dimension_numbers = #tpu.dot_dimension_numbers<[1], [0], [0], [1], [0, 0, 1, 1], [], []>} : vector<384x4xbf16>, vector<4x8xbf16>, vector<384x8xf32> -> vector<384x8xf32>
    %39 = vector.shape_cast %38 : vector<384x8xf32> to vector<16x24x8xf32>
    %40 = vector.extract_strided_slice %39 {offsets = [0, 1, 0], sizes = [16, 16, 8], strides = [1, 1, 1]} : vector<16x24x8xf32> to vector<16x16x8xf32>
    %41 = arith.addf %35, %40 : vector<16x16x8xf32>
    %c1_49 = arith.constant 1 : index
    %c2_50 = arith.constant 2 : index
    %c0_51 = arith.constant 0 : index
    %c0_52 = arith.constant 0 : index
    %42 = vector.load %arg5[%c1_49, %c2_50, %c0_51, %c0_52] : memref<3x3x4x8xbf16, #tpu.memory_space<vmem>>, vector<1x1x4x8xbf16>
    %43 = vector.shape_cast %42 : vector<1x1x4x8xbf16> to vector<4x8xbf16>
    %cst_53 = arith.constant dense<0.000000e+00> : vector<384x8xf32>
    %44 = tpu.matmul %30, %43, %cst_53 {dimension_numbers = #tpu.dot_dimension_numbers<[1], [0], [0], [1], [0, 0, 1, 1], [], []>} : vector<384x4xbf16>, vector<4x8xbf16>, vector<384x8xf32> -> vector<384x8xf32>
    %45 = vector.shape_cast %44 : vector<384x8xf32> to vector<16x24x8xf32>
    %46 = vector.extract_strided_slice %45 {offsets = [0, 2, 0], sizes = [16, 16, 8], strides = [1, 1, 1]} : vector<16x24x8xf32> to vector<16x16x8xf32>
    %47 = arith.addf %41, %46 : vector<16x16x8xf32>
    %c0_54 = arith.constant 0 : index
    %c0_55 = arith.constant 0 : index
    %c0_56 = arith.constant 0 : index
    %48 = vector.load %arg10[%c0_54, %c0_55, %c0_56] : memref<16x16x8xf32, #tpu.memory_space<vmem>>, vector<16x16x8xf32>
    %49 = arith.addf %48, %47 : vector<16x16x8xf32>
    %c0_57 = arith.constant 0 : index
    %c0_58 = arith.constant 0 : index
    %c0_59 = arith.constant 0 : index
    %50 = vector.load %arg10[%c0_57, %c0_58, %c0_59] : memref<16x16x8xf32, #tpu.memory_space<vmem>>, vector<16x16x8xf32>
    tpu.vector_store %arg10[%c0_57, %c0_58, %c0_59], %49 {strides = array<i32>} : memref<16x16x8xf32, #tpu.memory_space<vmem>>, vector<16x16x8xf32>,
    %c2_60 = arith.constant 2 : index
    %c0_61 = arith.constant 0 : index
    %c0_62 = arith.constant 0 : index
    %51 = vector.load %arg9[%c2_60, %c0_61, %c0_62] : memref<18x24x4xbf16, #tpu.memory_space<vmem>>, vector<16x24x4xbf16>
    %52 = vector.shape_cast %51 : vector<16x24x4xbf16> to vector<384x4xbf16>
    %c2_63 = arith.constant 2 : index
    %c0_64 = arith.constant 0 : index
    %c0_65 = arith.constant 0 : index
    %c0_66 = arith.constant 0 : index
    %53 = vector.load %arg5[%c2_63, %c0_64, %c0_65, %c0_66] : memref<3x3x4x8xbf16, #tpu.memory_space<vmem>>, vector<1x1x4x8xbf16>
    %54 = vector.shape_cast %53 : vector<1x1x4x8xbf16> to vector<4x8xbf16>
    %cst_67 = arith.constant dense<0.000000e+00> : vector<384x8xf32>
    %55 = tpu.matmul %52, %54, %cst_67 {dimension_numbers = #tpu.dot_dimension_numbers<[1], [0], [0], [1], [0, 0, 1, 1], [], []>} : vector<384x4xbf16>, vector<4x8xbf16>, vector<384x8xf32> -> vector<384x8xf32>
    %56 = vector.shape_cast %55 : vector<384x8xf32> to vector<16x24x8xf32>
    %57 = vector.extract_strided_slice %56 {offsets = [0, 0, 0], sizes = [16, 16, 8], strides = [1, 1, 1]} : vector<16x24x8xf32> to vector<16x16x8xf32>
    %c2_68 = arith.constant 2 : index
    %c1_69 = arith.constant 1 : index
    %c0_70 = arith.constant 0 : index
    %c0_71 = arith.constant 0 : index
    %58 = vector.load %arg5[%c2_68, %c1_69, %c0_70, %c0_71] : memref<3x3x4x8xbf16, #tpu.memory_space<vmem>>, vector<1x1x4x8xbf16>
    %59 = vector.shape_cast %58 : vector<1x1x4x8xbf16> to vector<4x8xbf16>
    %cst_72 = arith.constant dense<0.000000e+00> : vector<384x8xf32>
    %60 = tpu.matmul %52, %59, %cst_72 {dimension_numbers = #tpu.dot_dimension_numbers<[1], [0], [0], [1], [0, 0, 1, 1], [], []>} : vector<384x4xbf16>, vector<4x8xbf16>, vector<384x8xf32> -> vector<384x8xf32>
    %61 = vector.shape_cast %60 : vector<384x8xf32> to vector<16x24x8xf32>
    %62 = vector.extract_strided_slice %61 {offsets = [0, 1, 0], sizes = [16, 16, 8], strides = [1, 1, 1]} : vector<16x24x8xf32> to vector<16x16x8xf32>
    %63 = arith.addf %57, %62 : vector<16x16x8xf32>
    %c2_73 = arith.constant 2 : index
    %c2_74 = arith.constant 2 : index
    %c0_75 = arith.constant 0 : index
    %c0_76 = arith.constant 0 : index
    %64 = vector.load %arg5[%c2_73, %c2_74, %c0_75, %c0_76] : memref<3x3x4x8xbf16, #tpu.memory_space<vmem>>, vector<1x1x4x8xbf16>
    %65 = vector.shape_cast %64 : vector<1x1x4x8xbf16> to vector<4x8xbf16>
    %cst_77 = arith.constant dense<0.000000e+00> : vector<384x8xf32>
    %66 = tpu.matmul %52, %65, %cst_77 {dimension_numbers = #tpu.dot_dimension_numbers<[1], [0], [0], [1], [0, 0, 1, 1], [], []>} : vector<384x4xbf16>, vector<4x8xbf16>, vector<384x8xf32> -> vector<384x8xf32>
    %67 = vector.shape_cast %66 : vector<384x8xf32> to vector<16x24x8xf32>
    %68 = vector.extract_strided_slice %67 {offsets = [0, 2, 0], sizes = [16, 16, 8], strides = [1, 1, 1]} : vector<16x24x8xf32> to vector<16x16x8xf32>
    %69 = arith.addf %63, %68 : vector<16x16x8xf32>
    %c0_78 = arith.constant 0 : index
    %c0_79 = arith.constant 0 : index
    %c0_80 = arith.constant 0 : index
    %70 = vector.load %arg10[%c0_78, %c0_79, %c0_80] : memref<16x16x8xf32, #tpu.memory_space<vmem>>, vector<16x16x8xf32>
    %71 = arith.addf %70, %69 : vector<16x16x8xf32>
    %c0_81 = arith.constant 0 : index
    %c0_82 = arith.constant 0 : index
    %c0_83 = arith.constant 0 : index
    %72 = vector.load %arg10[%c0_81, %c0_82, %c0_83] : memref<16x16x8xf32, #tpu.memory_space<vmem>>, vector<16x16x8xf32>
    tpu.vector_store %arg10[%c0_81, %c0_82, %c0_83], %71 {strides = array<i32>} : memref<16x16x8xf32, #tpu.memory_space<vmem>>, vector<16x16x8xf32>,
    %c0_84 = arith.constant 0 : index
    %c0_85 = arith.constant 0 : index
    %c0_86 = arith.constant 0 : index
    %73 = vector.load %arg10[%c0_84, %c0_85, %c0_86] : memref<16x16x8xf32, #tpu.memory_space<vmem>>, vector<16x16x8xf32>
    %c0_87 = arith.constant 0 : index
    %c0_88 = arith.constant 0 : index
    %74 = vector.load %arg6[%c0_87, %c0_88] : memref<1x8xf32, #tpu.memory_space<vmem>>, vector<1x8xf32>
    %75 = vector.shape_cast %74 : vector<1x8xf32> to vector<8xf32>
    %76 = vector.shape_cast %75 : vector<8xf32> to vector<1x1x8xf32>
    %77 = vector.broadcast %76 : vector<1x1x8xf32> to vector<16x16x8xf32>
    %78 = arith.mulf %73, %77 : vector<16x16x8xf32>
    %c0_89 = arith.constant 0 : index
    %c0_90 = arith.constant 0 : index
    %79 = vector.load %arg7[%c0_89, %c0_90] : memref<1x8xf32, #tpu.memory_space<vmem>>, vector<1x8xf32>
    %80 = vector.shape_cast %79 : vector<1x8xf32> to vector<8xf32>
    %81 = vector.shape_cast %80 : vector<8xf32> to vector<1x1x8xf32>
    %82 = vector.broadcast %81 : vector<1x1x8xf32> to vector<16x16x8xf32>
    %83 = arith.addf %78, %82 : vector<16x16x8xf32>
    %cst_91 = arith.constant 0.000000e+00 : f32
    %84 = vector.broadcast %cst_91 : f32 to vector<16x16x8xf32>
    %85 = arith.cmpf oge, %83, %84 : vector<16x16x8xf32>
    %cst_92 = arith.constant 2.000000e-01 : f32
    %86 = vector.broadcast %cst_92 : f32 to vector<16x16x8xf32>
    %87 = arith.mulf %86, %83 : vector<16x16x8xf32>
    %88 = arith.select %85, %83, %87 : vector<16x16x8xi1>, vector<16x16x8xf32>
    %c0_93 = arith.constant 0 : index
    %c0_94 = arith.constant 0 : index
    %c0_95 = arith.constant 0 : index
    %c0_96 = arith.constant 0 : index
    %89 = vector.load %arg8[%c0_93, %c0_94, %c0_95, %c0_96] : memref<1x16x16x8xf32, #tpu.memory_space<vmem>>, vector<1x16x16x8xf32>
    %90 = vector.shape_cast %89 : vector<1x16x16x8xf32> to vector<16x16x8xf32>
    %91 = vector.shape_cast %88 : vector<16x16x8xf32> to vector<1x16x16x8xf32>
    tpu.vector_store %arg8[%c0_93, %c0_94, %c0_95, %c0_96], %91 {strides = array<i32>} : memref<1x16x16x8xf32, #tpu.memory_space<vmem>>, vector<1x16x16x8xf32>,
    return
  }
  func.func @transform_0(%arg0: i32, %arg1: i32) -> (i32, i32, i32, i32) {
    %c0_i32 = arith.constant 0 : i32
    %c0_i32_0 = arith.constant 0 : i32
    %c0_i32_1 = arith.constant 0 : i32
    return %arg0, %arg1, %c0_i32, %c0_i32_0 : i32, i32, i32, i32
  }
  func.func @transform_1(%arg0: i32, %arg1: i32) -> (i32, i32, i32, i32) {
    %c1_i32 = arith.constant 1 : i32
    %0 = arith.addi %arg1, %c1_i32 : i32
    %c16_i32 = arith.constant 16 : i32
    %1 = arith.muli %0, %c16_i32 : i32
    %c0_i32 = arith.constant 0 : i32
    %c0_i32_0 = arith.constant 0 : i32
    %c0_i32_1 = arith.constant 0 : i32
    return %arg0, %1, %c0_i32, %c0_i32_0 : i32, i32, i32, i32
  }
  func.func @transform_2(%arg0: i32, %arg1: i32) -> (i32, i32, i32, i32) {
    %c1_i32 = arith.constant 1 : i32
    %0 = arith.addi %arg1, %c1_i32 : i32
    %c16_i32 = arith.constant 16 : i32
    %1 = arith.muli %0, %c16_i32 : i32
    %c1_i32_0 = arith.constant 1 : i32
    %2 = arith.addi %1, %c1_i32_0 : i32
    %c0_i32 = arith.constant 0 : i32
    %c0_i32_1 = arith.constant 0 : i32
    %c0_i32_2 = arith.constant 0 : i32
    return %arg0, %2, %c0_i32, %c0_i32_1 : i32, i32, i32, i32
  }
  func.func @transform_3(%arg0: i32, %arg1: i32) -> (i32, i32, i32, i32) {
    %c0_i32 = arith.constant 0 : i32
    %c0_i32_0 = arith.constant 0 : i32
    %c0_i32_1 = arith.constant 0 : i32
    %c0_i32_2 = arith.constant 0 : i32
    %c0_i32_3 = arith.constant 0 : i32
    return %c0_i32, %c0_i32_0, %c0_i32_1, %c0_i32_2 : i32, i32, i32, i32
  }
  func.func @transform_4(%arg0: i32, %arg1: i32) -> (i32, i32) {
    %c0_i32 = arith.constant 0 : i32
    %c0_i32_0 = arith.constant 0 : i32
    %c0_i32_1 = arith.constant 0 : i32
    return %c0_i32, %c0_i32_0 : i32, i32
  }
  func.func @transform_5(%arg0: i32, %arg1: i32) -> (i32, i32) {
    %c0_i32 = arith.constant 0 : i32
    %c0_i32_0 = arith.constant 0 : i32
    %c0_i32_1 = arith.constant 0 : i32
    return %c0_i32, %c0_i32_0 : i32, i32
  }
  func.func @transform_6(%arg0: i32, %arg1: i32) -> (i32, i32, i32, i32) {
    %c0_i32 = arith.constant 0 : i32
    %c0_i32_0 = arith.constant 0 : i32
    %c0_i32_1 = arith.constant 0 : i32
    return %arg0, %arg1, %c0_i32, %c0_i32_0 : i32, i32, i32, i32
  }
}

</mosaic_0001>

<bundles_post_ra>
// kernel: tpu_custom_call.1
= control target key start
LH: loop header
LB: loop body
LE: loop exit
PB: predicated region body
PF: predicated region fallthrough
CT: control target
= control target key end

     0   :  { %s6198_s21 = smov 0   ;;  %s6200_s22 = smov 0   ;;  %s7827_s0 = inlined_call_operand.vmem [shape: bf16[2,18,24,4], index: 0, kind: input, shape index: {}]   ;;  %s7828_s1 = inlined_call_operand.vmem [shape: bf16[2,18,24,4], index: 1, kind: input, shape index: {}]   ;;  %s7829_s2 = inlined_call_operand.vmem [shape: bf16[2,18,24,4], index: 2, kind: input, shape index: {}]   ;;  %s7830_s3 = inlined_call_operand.vmem [shape: bf16[3,3,4,8], index: 3, kind: input, shape index: {}]   ;;  %s7831_s4 = inlined_call_operand.vmem [shape: f32[1,8], index: 4, kind: input, shape index: {}]   ;;  %s7832_s5 = inlined_call_operand.vmem [shape: f32[1,8], index: 5, kind: input, shape index: {}]   ;;  %s7833_s6 = inlined_call_operand.vmem [shape: f32[2,16,16,8], index: 6, kind: output, shape index: {}]  }
   0x1   :  { %s6202_s23 = smov 0  }
   0x2 LB: > { %s28_s24 = sadd.s32 1, %s6157_s22  ;;  %p5040_p0 = scmp.ge.s32.totalorder %s6161_s23, 1  ;;  %s6161_s23 = sphi %s6202_s23, %s16_s23   ;;  %s6157_s22 = sphi %s6200_s22, %s7875_s22   ;;  %s6153_s21 = sphi %s6198_s21, %s7874_s21  }
   0x3   : > { %p30_p1 = scmp.ge.s32.totalorder %s28_s24, 2  ;;  %p296_p2 = scmp.lt.s32.totalorder %s6161_s23, 3 }
   0x5   : > { %s7877_s24 = smov (%p30_p1, %s28_s24), 0  ;;  %p297_p3 = pnand %p5040_p0, %p296_p2 }
   0x7   : > { %300 = sbr.rel (%p297_p3) target bundleno = 712 (0x2c8), region = 44 }
   0xe   : > { %v584_v0 = vld [vmem:[%s7830_s3] sm:$0x3]  ;;  %vm778_vm0 = vcmask 1041408   ;;  %p370_p4 = scmp.lt.s32.totalorder %s6153_s21, 1  ;;  %v6225_v2 = vld [vmem:[%s7830_s3 + $0x2] sm:$0x3] }
   0xf   : > { %6029 = vmatprep.subr.msk.bf16.mxu1 %vm778_vm0, %v584_v0  ;;  %6028 = vmatprep.subr.msk.bf16.mxu0 %vm778_vm0, %v584_v0  ;;  %v780_v1 = vsel %vm778_vm0, %v584_v0, 0  ;;  %v5119_v3 = vld [vmem:[%s7830_s3 + $0x4] sm:$0x3]  ;;  %vm473_vm1 = vcmask 27648   ;;  %vm705_vm2 = vcmask 31744   ;;  %v994_v34 = vsel %vm778_vm0, %v6225_v2, 0 }
  0x10   : > { %6027 = vmatpush3.bf16.msra.mxu1 %v780_v1  ;;  %5577 = vmatpush3.bf16.msra.mxu0 %v780_v1  ;;  %s7879_s21 = smov (!%p370_p4, %s6153_s21), 1  ;;  %v1417_v31 = vsel %vm778_vm0, %v5119_v3, 0  ;;  %v6304_v32 = vld [vmem:[%s7830_s3 + $0x6] sm:$0x3]  ;;  %v6315_v35 = vld [vmem:[%s7830_s3 + $0x8] sm:$0x3] }
  0x11   : > { %6030 = vmatprep.subr.msk.bf16.mxu1 %vm778_vm0, %v6225_v2  ;;  %6031 = vmatprep.subr.msk.bf16.mxu0 %vm778_vm0, %v5119_v3  ;;  %s6236_s7 = smul.u32 216, %s7879_s21  ;;  %vm1692_vm3 = vcmask 1045504   ;;  %vm1269_vm4 = vcmask 1046528   ;;  %vm1837_vm5 = vcmask 64512   ;;  %s5350_s15 = sshll.u32 %s7879_s21, 8 }
  0x12   : > { %s7450_s17 = scalar_lea.vmem %s7833_s6, %s5350_s15 }
  0x13   : > { %s6242_s10 = scalar_lea.vmem %s7827_s0, %s6236_s7  ;;  %s5347_s19 = sadd.s32 192, %s6236_s7 }
  0x14   : > { %v425_v4 = vld [vmem:[%s6242_s10] sm:$0xf]  ;;  %v426_v5 = vld [vmem:[%s6242_s10 + $0x4] sm:$0xf]  ;;  %v427_v8 = vld [vmem:[%s6242_s10 + $0x8] sm:$0xf]  ;;  %s395_s26 = scalar_lea.vmem %s7828_s1, %s5347_s19 }
  0x15   : > { %v449_v6 = vld [vmem:[%s6242_s10 + $0x60] sm:$0xf]  ;;  %474 = vst.msk [vmem:[#allocation2] sm:$0xf] %vm473_vm1, %v425_v4  ;;  %475 = vst.msk [vmem:[#allocation2 + $0x4] sm:$0xf] %vm473_vm1, %v426_v5 }
  0x16   : > { %v450_v7 = vld [vmem:[%s6242_s10 + $0x64] sm:$0xf]  ;;  %498 = vst.msk [vmem:[#allocation2 + $0x60] sm:$0xf] %vm473_vm1, %v449_v6  ;;  %v428_v9 = vld [vmem:[%s6242_s10 + $0xc] sm:$0xf] }
  0x17   : > { %499 = vst.msk [vmem:[#allocation2 + $0x64] sm:$0xf] %vm473_vm1, %v450_v7  ;;  %476 = vst.msk [vmem:[#allocation2 + $0x8] sm:$0xf] %vm473_vm1, %v427_v8  ;;  %v451_v10 = vld [vmem:[%s6242_s10 + $0x68] sm:$0xf] }
  0x18   : > { %477 = vst.msk [vmem:[#allocation2 + $0xc] sm:$0xf] %vm473_vm1, %v428_v9  ;;  %v452_v11 = vld [vmem:[%s6242_s10 + $0x6c] sm:$0xf]  ;;  %v429_v12 = vld [vmem:[%s6242_s10 + $0x10] sm:$0xf] }
  0x19   : > { %500 = vst.msk [vmem:[#allocation2 + $0x68] sm:$0xf] %vm473_vm1, %v451_v10  ;;  %501 = vst.msk [vmem:[#allocation2 + $0x6c] sm:$0xf] %vm473_vm1, %v452_v11  ;;  %v430_v13 = vld [vmem:[%s6242_s10 + $0x14] sm:$0xf] }
  0x1a   : > { %478 = vst.msk [vmem:[#allocation2 + $0x10] sm:$0xf] %vm473_vm1, %v429_v12  ;;  %v453_v14 = vld [vmem:[%s6242_s10 + $0x70] sm:$0xf]  ;;  %v454_v15 = vld [vmem:[%s6242_s10 + $0x74] sm:$0xf] }
  0x1b   : > { %479 = vst.msk [vmem:[#allocation2 + $0x14] sm:$0xf] %vm473_vm1, %v430_v13  ;;  %502 = vst.msk [vmem:[#allocation2 + $0x70] sm:$0xf] %vm473_vm1, %v453_v14  ;;  %v431_v16 = vld [vmem:[%s6242_s10 + $0x18] sm:$0xf] }
  0x1c   : > { %503 = vst.msk [vmem:[#allocation2 + $0x74] sm:$0xf] %vm473_vm1, %v454_v15  ;;  %v432_v17 = vld [vmem:[%s6242_s10 + $0x1c] sm:$0xf]  ;;  %v455_v18 = vld [vmem:[%s6242_s10 + $0x78] sm:$0xf] }
  0x1d   : > { %480 = vst.msk [vmem:[#allocation2 + $0x18] sm:$0xf] %vm473_vm1, %v431_v16  ;;  %481 = vst.msk [vmem:[#allocation2 + $0x1c] sm:$0xf] %vm473_vm1, %v432_v17  ;;  %v456_v19 = vld [vmem:[%s6242_s10 + $0x7c] sm:$0xf] }
  0x1e   : > { %504 = vst.msk [vmem:[#allocation2 + $0x78] sm:$0xf] %vm473_vm1, %v455_v18  ;;  %v433_v20 = vld [vmem:[%s6242_s10 + $0x20] sm:$0xf]  ;;  %v434_v21 = vld [vmem:[%s6242_s10 + $0x24] sm:$0xf] }
  0x1f   : > { %505 = vst.msk [vmem:[#allocation2 + $0x7c] sm:$0xf] %vm473_vm1, %v456_v19  ;;  %482 = vst.msk [vmem:[#allocation2 + $0x20] sm:$0xf] %vm473_vm1, %v433_v20  ;;  %v457_v22 = vld [vmem:[%s6242_s10 + $0x80] sm:$0xf] }
  0x20   : > { %483 = vst.msk [vmem:[#allocation2 + $0x24] sm:$0xf] %vm473_vm1, %v434_v21  ;;  %v458_v23 = vld [vmem:[%s6242_s10 + $0x84] sm:$0xf]  ;;  %v435_v24 = vld [vmem:[%s6242_s10 + $0x28] sm:$0xf] }
  0x21   : > { %506 = vst.msk [vmem:[#allocation2 + $0x80] sm:$0xf] %vm473_vm1, %v457_v22  ;;  %507 = vst.msk [vmem:[#allocation2 + $0x84] sm:$0xf] %vm473_vm1, %v458_v23  ;;  %v436_v25 = vld [vmem:[%s6242_s10 + $0x2c] sm:$0xf] }
  0x22   : > { %484 = vst.msk [vmem:[#allocation2 + $0x28] sm:$0xf] %vm473_vm1, %v435_v24  ;;  %v459_v26 = vld [vmem:[%s6242_s10 + $0x88] sm:$0xf]  ;;  %v460_v27 = vld [vmem:[%s6242_s10 + $0x8c] sm:$0xf] }
  0x23   : > { %v6289_v28 = vld [vmem:[#allocation2] sm:$0xff]   ;;  %485 = vst.msk [vmem:[#allocation2 + $0x2c] sm:$0xf] %vm473_vm1, %v436_v25  ;;  %508 = vst.msk [vmem:[#allocation2 + $0x88] sm:$0xf] %vm473_vm1, %v459_v26  ;;  %v6298_v30 = vld [vmem:[#allocation2 + $0x8] sm:$0xff]  }
  0x24   : > { %509 = vst.msk [vmem:[#allocation2 + $0x8c] sm:$0xf] %vm473_vm1, %v460_v27  ;;  %v6294_v29 = vld [vmem:[#allocation2 + $0x60] sm:$0xff]   ;;  %5578 = vmatprep.mubr.msk.bf16.mxu0 %vm705_vm2, %v6289_v28  ;;  %v6308_v33 = vld [vmem:[#allocation2 + $0x68] sm:$0xff]   ;;  %v6319_v36 = vld [vmem:[#allocation2 + $0x10] sm:$0xff]   ;;  %v2114_v16 = vsel %vm778_vm0, %v6304_v32, 0 }
  0x25   : > { %5602 = vmatprep.mubr.msk.bf16.mxu1 %vm705_vm2, %v6294_v29  ;;  %5579 = vmatmul.mubr.msk.bf16.vlgmr.msra.gmra.mrb[0].mxu0 %vm705_vm2, %v6298_v30  ;;  %v6323_v37 = vld [vmem:[#allocation2 + $0x70] sm:$0xff]   ;;  %v6329_v38 = vld [vmem:[#allocation2 + $0x18] sm:$0xff]   ;;  %v437_v42 = vld [vmem:[%s6242_s10 + $0x30] sm:$0xf]  ;;  %v2328_v17 = vsel %vm778_vm0, %v6315_v35, 0  ;;  %s5349_s8 = sadd.s32 204, %s6236_s7 }
  0x26   : > { %5603 = vmatmul.mubr.msk.bf16.vlgmr.msra.gmra.mrb[0].mxu1 %vm705_vm2, %v6308_v33  ;;  %5677 = vmatpush3.bf16.msra.mxu0 %v1417_v31  ;;  %v6333_v39 = vld [vmem:[#allocation2 + $0x78] sm:$0xff]   ;;  %v438_v43 = vld [vmem:[%s6242_s10 + $0x34] sm:$0xf]  ;;  %v461_v44 = vld [vmem:[%s6242_s10 + $0x90] sm:$0xf]  ;;  %s409_s11 = scalar_lea.vmem %s7829_s2, %s5349_s8 }
  0x27   : > { %5627 = vmatpush3.bf16.msra.mxu1 %v994_v34  ;;  %5582 = vmatprep.mubr.msk.bf16.mxu0 %vm705_vm2, %v6319_v36  ;;  %v6337_v40 = vld [vmem:[#allocation2 + $0x20] sm:$0xff]   ;;  %486 = vst.msk [vmem:[#allocation2 + $0x30] sm:$0xf] %vm473_vm1, %v437_v42  ;;  %487 = vst.msk [vmem:[#allocation2 + $0x34] sm:$0xf] %vm473_vm1, %v438_v43  ;;  %v6537_v23 = vld [vmem:[#allocation2 + $0xc] sm:$0xff]  }
  0x28   : > { %5606 = vmatprep.mubr.msk.bf16.mxu1 %vm705_vm2, %v6323_v37  ;;  %6032 = vmatprep.subr.msk.bf16.mxu1 %vm778_vm0, %v6304_v32  ;;  %v6339_v41 = vld [vmem:[#allocation2 + $0x80] sm:$0xff]   ;;  %510 = vst.msk [vmem:[#allocation2 + $0x90] sm:$0xf] %vm473_vm1, %v461_v44  ;;  %v439_v46 = vld [vmem:[%s6242_s10 + $0x38] sm:$0xf]  ;;  %v6547_v24 = vld [vmem:[#allocation2 + $0x14] sm:$0xff]  }
  0x29   : > { %6033 = vmatprep.subr.msk.bf16.mxu0 %vm778_vm0, %v6315_v35  ;;  %v462_v45 = vld [vmem:[%s6242_s10 + $0x94] sm:$0xf]  ;;  %v440_v47 = vld [vmem:[%s6242_s10 + $0x3c] sm:$0xf]  ;;  %488 = vst.msk [vmem:[#allocation2 + $0x38] sm:$0xf] %vm473_vm1, %v439_v46 }
  0x2a   : > { %v6358_v48 = vld [vmem:[#allocation2 + $0x28] sm:$0xff]   ;;  %511 = vst.msk [vmem:[#allocation2 + $0x94] sm:$0xf] %vm473_vm1, %v462_v45  ;;  %489 = vst.msk [vmem:[#allocation2 + $0x3c] sm:$0xf] %vm473_vm1, %v440_v47  ;;  %v6550_v26 = vld [vmem:[#allocation2 + $0x1c] sm:$0xff]  }
  0x2b   : > { %v463_v49 = vld [vmem:[%s6242_s10 + $0x98] sm:$0xf]  ;;  %v464_v50 = vld [vmem:[%s6242_s10 + $0x9c] sm:$0xf]  ;;  %v441_v51 = vld [vmem:[%s6242_s10 + $0x40] sm:$0xf] }
  0x2c   : > { %v6366_v52 = vld [vmem:[#allocation2 + $0x88] sm:$0xff]   ;;  %512 = vst.msk [vmem:[#allocation2 + $0x98] sm:$0xf] %vm473_vm1, %v463_v49  ;;  %513 = vst.msk [vmem:[#allocation2 + $0x9c] sm:$0xf] %vm473_vm1, %v464_v50 }
  0x2d   : > { %5583 = vmatmul.mubr.msk.bf16.gmra.mrb[4].mxu0 %vm705_vm2, %v6329_v38  ;;  %v442_v53 = vld [vmem:[%s6242_s10 + $0x44] sm:$0xf]  ;;  %490 = vst.msk [vmem:[#allocation2 + $0x40] sm:$0xf] %vm473_vm1, %v441_v51  ;;  %v465_v54 = vld [vmem:[%s6242_s10 + $0xa0] sm:$0xf] }
  0x2e   : > { %5607 = vmatmul.mubr.msk.bf16.gmra.mrb[4].mxu1 %vm705_vm2, %v6333_v39  ;;  %5586 = vmatprep.mubr.msk.bf16.mxu0 %vm705_vm2, %v6337_v40  ;;  %v466_v55 = vld [vmem:[%s6242_s10 + $0xa4] sm:$0xf]  ;;  %491 = vst.msk [vmem:[#allocation2 + $0x44] sm:$0xf] %vm473_vm1, %v442_v53  ;;  %514 = vst.msk [vmem:[#allocation2 + $0xa0] sm:$0xf] %vm473_vm1, %v465_v54 }
  0x2f   : > { %5610 = vmatprep.mubr.msk.bf16.mxu1 %vm705_vm2, %v6339_v41  ;;  %515 = vst.msk [vmem:[#allocation2 + $0xa4] sm:$0xf] %vm473_vm1, %v466_v55  ;;  %v443_v56 = vld [vmem:[%s6242_s10 + $0x48] sm:$0xf]  ;;  %v444_v57 = vld [vmem:[%s6242_s10 + $0x4c] sm:$0xf] }
  0x30   : > { %v467_v58 = vld [vmem:[%s6242_s10 + $0xa8] sm:$0xf]  ;;  %492 = vst.msk [vmem:[#allocation2 + $0x48] sm:$0xf] %vm473_vm1, %v443_v56  ;;  %493 = vst.msk [vmem:[#allocation2 + $0x4c] sm:$0xf] %vm473_vm1, %v444_v57 }
  0x31   : > { %v468_v59 = vld [vmem:[%s6242_s10 + $0xac] sm:$0xf]  ;;  %516 = vst.msk [vmem:[#allocation2 + $0xa8] sm:$0xf] %vm473_vm1, %v467_v58  ;;  %v445_v60 = vld [vmem:[%s6242_s10 + $0x50] sm:$0xf] }
  0x32   : > { %v446_v61 = vld [vmem:[%s6242_s10 + $0x54] sm:$0xf]  ;;  %517 = vst.msk [vmem:[#allocation2 + $0xac] sm:$0xf] %vm473_vm1, %v468_v59  ;;  %494 = vst.msk [vmem:[#allocation2 + $0x50] sm:$0xf] %vm473_vm1, %v445_v60 }
  0x33   : > { %495 = vst.msk [vmem:[#allocation2 + $0x54] sm:$0xf] %vm473_vm1, %v446_v61  ;;  %v469_v62 = vld [vmem:[%s6242_s10 + $0xb0] sm:$0xf]  ;;  %v470_v63 = vld [vmem:[%s6242_s10 + $0xb4] sm:$0xf] }
  0x34   : > { %v447_v0 = vld [vmem:[%s6242_s10 + $0x58] sm:$0xf]  ;;  %518 = vst.msk [vmem:[#allocation2 + $0xb0] sm:$0xf] %vm473_vm1, %v469_v62  ;;  %519 = vst.msk [vmem:[#allocation2 + $0xb4] sm:$0xf] %vm473_vm1, %v470_v63 }
  0x35   : > { %v448_v1 = vld [vmem:[%s6242_s10 + $0x5c] sm:$0xf]  ;;  %496 = vst.msk [vmem:[#allocation2 + $0x58] sm:$0xf] %vm473_vm1, %v447_v0  ;;  %v471_v2 = vld [vmem:[%s6242_s10 + $0xb8] sm:$0xf]  ;;  %5587 = vmatmul.mubr.msk.bf16.gmra.mrb[8].mxu0 %vm705_vm2, %v6358_v48 }
  0x36   : > { %v472_v3 = vld [vmem:[%s6242_s10 + $0xbc] sm:$0xf]  ;;  %v6077_v4 = vld [vmem:[#allocation2 + $0x30] sm:$0xff]   ;;  %497 = vst.msk [vmem:[#allocation2 + $0x5c] sm:$0xf] %vm473_vm1, %v448_v1  ;;  %5611 = vmatmul.mubr.msk.bf16.gmra.mrb[8].mxu1 %vm705_vm2, %v6366_v52  ;;  %v6079_v6 = vld [vmem:[#allocation2 + $0x38] sm:$0xff]  }
  0x37   : > { %520 = vst.msk [vmem:[#allocation2 + $0xb8] sm:$0xf] %vm473_vm1, %v471_v2  ;;  %521 = vst.msk [vmem:[#allocation2 + $0xbc] sm:$0xf] %vm473_vm1, %v472_v3  ;;  %v6405_v5 = vld [vmem:[#allocation2 + $0x90] sm:$0xff]   ;;  %5590 = vmatprep.mubr.msk.bf16.mxu0 %vm705_vm2, %v6077_v4  ;;  %v6410_v7 = vld [vmem:[#allocation2 + $0x98] sm:$0xff]  }
  0x38   : > { %5614 = vmatprep.mubr.msk.bf16.mxu1 %vm705_vm2, %v6405_v5  ;;  %v6081_v8 = vld [vmem:[#allocation2 + $0x40] sm:$0xff]   ;;  %v6083_v10 = vld [vmem:[#allocation2 + $0x48] sm:$0xff]   ;;  %v6446_v18 = vld [vmem:[%s7830_s3 + $0xa] sm:$0x3] }
  0x39   : > { %v6412_v9 = vld [vmem:[#allocation2 + $0xa0] sm:$0xff]   ;;  %v6420_v11 = vld [vmem:[#allocation2 + $0xa8] sm:$0xff]   ;;  %v5243_v19 = vld [vmem:[%s7830_s3 + $0xc] sm:$0x3]  ;;  %v2750_v27 = vsel %vm778_vm0, %v6446_v18, 0 }
  0x3a   : > { %v6085_v12 = vld [vmem:[#allocation2 + $0x50] sm:$0xff]   ;;  %v524_v22 = vld [vmem:[%s395_s26 + $0x8] sm:$0xf]  ;;  %v3509_v25 = vsel %vm778_vm0, %v5243_v19, 0  ;;  %v6600_v34 = vld [vmem:[#allocation2 + $0x44] sm:$0xff]  }
  0x3b   : > { %v6422_v13 = vld [vmem:[#allocation2 + $0xb0] sm:$0xff]   ;;  %528 = vst.msk [vmem:[#allocation2 + $0xc8] sm:$0xf] %vm473_vm1, %v524_v22  ;;  %v531_v44 = vld [vmem:[%s409_s11 + $0x8] sm:$0xf]  ;;  %v6655_v45 = vld [vmem:[#allocation2 + $0x84] sm:$0xff]  }
  0x3c   : > { %v522_v20 = vld [vmem:[%s395_s26] sm:$0xf]  ;;  %v523_v21 = vld [vmem:[%s395_s26 + $0x4] sm:$0xf]  ;;  %535 = vst.msk [vmem:[#allocation2 + $0xd4] sm:$0xf] %vm473_vm1, %v531_v44 }
  0x3d   : > { %5591 = vmatmul.mubr.msk.bf16.gmra.mrb[12].mxu0 %vm705_vm2, %v6079_v6  ;;  %v6087_v14 = vld [vmem:[#allocation2 + $0x58] sm:$0xff]   ;;  %526 = vst.msk [vmem:[#allocation2 + $0xc0] sm:$0xf] %vm473_vm1, %v522_v20  ;;  %527 = vst.msk [vmem:[#allocation2 + $0xc4] sm:$0xf] %vm473_vm1, %v523_v21  ;;  %v6578_v31 = vld [vmem:[#allocation2 + $0x2c] sm:$0xff]  }
  0x3e   : > { %5615 = vmatmul.mubr.msk.bf16.gmra.mrb[12].mxu1 %vm705_vm2, %v6410_v7  ;;  %5594 = vmatprep.mubr.msk.bf16.mxu0 %vm705_vm2, %v6081_v8  ;;  %v6430_v15 = vld [vmem:[#allocation2 + $0xb8] sm:$0xff]   ;;  %v6602_v35 = vld [vmem:[#allocation2 + $0x4c] sm:$0xff]   ;;  %v530_v43 = vld [vmem:[%s409_s11 + $0x4] sm:$0xf] }
  0x3f   : > { %5618 = vmatprep.mubr.msk.bf16.mxu1 %vm705_vm2, %v6412_v9  ;;  %v6588_v32 = vld [vmem:[#allocation2 + $0x34] sm:$0xff]   ;;  %v529_v42 = vld [vmem:[%s409_s11] sm:$0xf]  ;;  %534 = vst.msk [vmem:[#allocation2 + $0xd0] sm:$0xf] %vm473_vm1, %v530_v43 }
  0x40   : > { %533 = vst.msk [vmem:[#allocation2 + $0xcc] sm:$0xf] %vm473_vm1, %v529_v42  ;;  %v6657_v46 = vld [vmem:[#allocation2 + $0x8c] sm:$0xff]   ;;  %v6667_v47 = vld [vmem:[#allocation2 + $0x94] sm:$0xff]  }
  0x41   : > { %v6687_v55 = vld [vmem:[#allocation2 + $0xac] sm:$0xff]   ;;  %v6709_v62 = vld [vmem:[#allocation2 + $0xb4] sm:$0xff]  }
  0x42   : > { %v6765_v42 = vld [vmem:[#allocation2 + $0x28] sm:$0xff]   ;;  %v6781_v44 = vld [vmem:[#allocation2 + $0x30] sm:$0xff]  }
  0x43   : > { %7850 = vst [vmem:[#allocation8_spill] sm:$0xff] %v6781_v44 }
  0x44   : > { %v6715_v1 = vld [vmem:[#allocation2 + $0xbc] sm:$0xff]  }
  0x45   : > { %5595 = vmatmul.mubr.msk.bf16.gmra.mrb[16].mxu0 %vm705_vm2, %v6083_v10 }
  0x46   : > { %5619 = vmatmul.mubr.msk.bf16.gmra.mrb[16].mxu1 %vm705_vm2, %v6420_v11  ;;  %5598 = vmatprep.mubr.msk.bf16.mxu0 %vm705_vm2, %v6085_v12 }
  0x47   : > { %5622 = vmatprep.mubr.msk.bf16.mxu1 %vm705_vm2, %v6422_v13 }
  0x4d   : > { %5599 = vmatmul.mubr.msk.bf16.gmra.mrb[20].mxu0 %vm705_vm2, %v6087_v14 }
  0x4e   : > { %5623 = vmatmul.mubr.msk.bf16.gmra.mrb[20].mxu1 %vm705_vm2, %v6430_v15  ;;  %5678 = vmatprep.mubr.msk.bf16.mxu0 %vm705_vm2, %v6289_v28 }
  0x4f   : > { %5628 = vmatprep.mubr.msk.bf16.mxu1 %vm705_vm2, %v6289_v28  ;;  %v6559_v28 = vld [vmem:[%s7830_s3 + $0xe] sm:$0x3] }
  0x55   : > { %5679 = vmatmul.mubr.msk.bf16.vlgmr.msra.gmra.mrb[24].mxu0 %vm705_vm2, %v6298_v30 }
  0x56   : > { %5629 = vmatmul.mubr.msk.bf16.vlgmr.msra.gmra.mrb[24].mxu1 %vm705_vm2, %v6298_v30  ;;  %5777 = vmatpush3.bf16.msra.mxu0 %v2328_v17  ;;  %v6574_v30 = vld [vmem:[#allocation2 + $0x24] sm:$0xff]  }
  0x57   : > { %5727 = vmatpush3.bf16.msra.mxu1 %v2114_v16  ;;  %5632 = vmatprep.mubr.msk.bf16.mxu1 %vm705_vm2, %v6319_v36 }
  0x58   : > { %5682 = vmatprep.mubr.msk.bf16.mxu0 %vm705_vm2, %v6319_v36  ;;  %6034 = vmatprep.subr.msk.bf16.mxu1 %vm778_vm0, %v6446_v18  ;;  %v6612_v36 = vld [vmem:[#allocation2 + $0x54] sm:$0xff]   ;;  %v6749_v18 = vld [vmem:[#allocation2 + $0x20] sm:$0xff]  }
  0x59   : > { %6035 = vmatprep.subr.msk.bf16.mxu0 %vm778_vm0, %v5243_v19 }
  0x5d   : > { %5683 = vmatmul.mubr.msk.bf16.gmra.mrb[28].mxu0 %vm705_vm2, %v6329_v38 }
  0x5e   : > { %5633 = vmatmul.mubr.msk.bf16.gmra.mrb[28].mxu1 %vm705_vm2, %v6329_v38  ;;  %5686 = vmatprep.mubr.msk.bf16.mxu0 %vm705_vm2, %v6337_v40  ;;  %v6624_v38 = vld [vmem:[#allocation2 + $0x64] sm:$0xff]  }
  0x5f   : > { %5636 = vmatprep.mubr.msk.bf16.mxu1 %vm705_vm2, %v6337_v40  ;;  %v6636_v40 = vld [vmem:[#allocation2 + $0x74] sm:$0xff]  }
  0x65   : > { %5687 = vmatmul.mubr.msk.bf16.gmra.mrb[32].mxu0 %vm705_vm2, %v6358_v48 }
  0x66   : > { %5637 = vmatmul.mubr.msk.bf16.gmra.mrb[32].mxu1 %vm705_vm2, %v6358_v48  ;;  %5690 = vmatprep.mubr.msk.bf16.mxu0 %vm705_vm2, %v6077_v4  ;;  %v6669_v48 = vld [vmem:[#allocation2 + $0x9c] sm:$0xff]  }
  0x67   : > { %5640 = vmatprep.mubr.msk.bf16.mxu1 %vm705_vm2, %v6077_v4 }
  0x6d   : > { %5691 = vmatmul.mubr.msk.bf16.gmra.mrb[36].mxu0 %vm705_vm2, %v6079_v6 }
  0x6e   : > { %5641 = vmatmul.mubr.msk.bf16.gmra.mrb[36].mxu1 %vm705_vm2, %v6079_v6  ;;  %5694 = vmatprep.mubr.msk.bf16.mxu0 %vm705_vm2, %v6081_v8 }
  0x6f   : > { %5644 = vmatprep.mubr.msk.bf16.mxu1 %vm705_vm2, %v6081_v8  ;;  %v6731_v8 = vld [vmem:[#allocation2 + $0xc4] sm:$0xff]  }
  0x75   : > { %5695 = vmatmul.mubr.msk.bf16.gmra.mrb[40].mxu0 %vm705_vm2, %v6083_v10 }
  0x76   : > { %5645 = vmatmul.mubr.msk.bf16.gmra.mrb[40].mxu1 %vm705_vm2, %v6083_v10  ;;  %5698 = vmatprep.mubr.msk.bf16.mxu0 %vm705_vm2, %v6085_v12 }
  0x77   : > { %5648 = vmatprep.mubr.msk.bf16.mxu1 %vm705_vm2, %v6085_v12 }
  0x7d   : > { %5699 = vmatmul.mubr.msk.bf16.gmra.mrb[44].mxu0 %vm705_vm2, %v6087_v14 }
  0x7e   : > { %5649 = vmatmul.mubr.msk.bf16.gmra.mrb[44].mxu1 %vm705_vm2, %v6087_v14  ;;  %5702 = vmatprep.mubr.msk.bf16.mxu0 %vm705_vm2, %v6294_v29 }
  0x7f   : > { %5652 = vmatprep.mubr.msk.bf16.mxu1 %vm705_vm2, %v6294_v29  ;;  %v6566_v29 = vld [vmem:[%s7830_s3 + $0x10] sm:$0x3] }
  0x85   : > { %5703 = vmatmul.mubr.msk.bf16.gmra.mrb[48].mxu0 %vm705_vm2, %v6308_v33 }
  0x86   : > { %5653 = vmatmul.mubr.msk.bf16.gmra.mrb[48].mxu1 %vm705_vm2, %v6308_v33  ;;  %5706 = vmatprep.mubr.msk.bf16.mxu0 %vm705_vm2, %v6323_v37  ;;  %v6590_v33 = vld [vmem:[#allocation2 + $0x3c] sm:$0xff]  }
  0x87   : > { %5656 = vmatprep.mubr.msk.bf16.mxu1 %vm705_vm2, %v6323_v37  ;;  %v6614_v37 = vld [vmem:[#allocation2 + $0x5c] sm:$0xff]  }
  0x8d   : > { %5707 = vmatmul.mubr.msk.bf16.gmra.mrb[52].mxu0 %vm705_vm2, %v6333_v39 }
  0x8e   : > { %5657 = vmatmul.mubr.msk.bf16.gmra.mrb[52].mxu1 %vm705_vm2, %v6333_v39  ;;  %5710 = vmatprep.mubr.msk.bf16.mxu0 %vm705_vm2, %v6339_v41  ;;  %v6626_v39 = vld [vmem:[#allocation2 + $0x6c] sm:$0xff]  }
  0x8f   : > { %5660 = vmatprep.mubr.msk.bf16.mxu1 %vm705_vm2, %v6339_v41  ;;  %v6639_v41 = vld [vmem:[#allocation2 + $0x7c] sm:$0xff]  }
  0x95   : > { %5711 = vmatmul.mubr.msk.bf16.gmra.mrb[56].mxu0 %vm705_vm2, %v6366_v52 }
  0x96   : > { %5661 = vmatmul.mubr.msk.bf16.gmra.mrb[56].mxu1 %vm705_vm2, %v6366_v52  ;;  %5714 = vmatprep.mubr.msk.bf16.mxu0 %vm705_vm2, %v6405_v5  ;;  %v6681_v52 = vld [vmem:[#allocation2 + $0xa4] sm:$0xff]  }
  0x97   : > { %5664 = vmatprep.mubr.msk.bf16.mxu1 %vm705_vm2, %v6405_v5 }
  0x9d   : > { %5715 = vmatmul.mubr.msk.bf16.gmra.mrb[60].mxu0 %vm705_vm2, %v6410_v7 }
  0x9e   : > { %5665 = vmatmul.mubr.msk.bf16.gmra.mrb[60].mxu1 %vm705_vm2, %v6410_v7  ;;  %5718 = vmatprep.mubr.msk.bf16.mxu0 %vm705_vm2, %v6412_v9 }
  0x9f   : > { %5668 = vmatprep.mubr.msk.bf16.mxu1 %vm705_vm2, %v6412_v9 }
  0xa5   : > { %5719 = vmatmul.mubr.msk.bf16.gmra.mrb[64].mxu0 %vm705_vm2, %v6420_v11 }
  0xa6   : > { %5669 = vmatmul.mubr.msk.bf16.gmra.mrb[64].mxu1 %vm705_vm2, %v6420_v11  ;;  %5722 = vmatprep.mubr.msk.bf16.mxu0 %vm705_vm2, %v6422_v13  ;;  %v6733_v11 = vld [vmem:[#allocation2 + $0x18] sm:$0xff]  }
  0xa7   : > { %5672 = vmatprep.mubr.msk.bf16.mxu1 %vm705_vm2, %v6422_v13 }
  0xad   : > { %5723 = vmatmul.mubr.msk.bf16.gmra.mrb[68].mxu0 %vm705_vm2, %v6430_v15 }
  0xae   : > { %5673 = vmatmul.mubr.msk.bf16.gmra.mrb[68].mxu1 %vm705_vm2, %v6430_v15  ;;  %5778 = vmatprep.mubr.msk.bf16.mxu0 %vm705_vm2, %v6537_v23 }
  0xaf   : > { %5728 = vmatprep.mubr.msk.bf16.mxu1 %vm705_vm2, %v6537_v23 }
  0xb5   : > { %5779 = vmatmul.mubr.msk.bf16.vlgmr.msra.gmra.mrb[72].mxu0 %vm705_vm2, %v6547_v24 }
  0xb6   : > { %5729 = vmatmul.mubr.msk.bf16.vlgmr.msra.gmra.mrb[72].mxu1 %vm705_vm2, %v6547_v24  ;;  %5877 = vmatpush3.bf16.msra.mxu0 %v3509_v25  ;;  %v4145_v25 = vsel %vm778_vm0, %v6566_v29, 0 }
  0xb7   : > { %5827 = vmatpush3.bf16.msra.mxu1 %v2750_v27  ;;  %5732 = vmatprep.mubr.msk.bf16.mxu1 %vm705_vm2, %v6550_v26 }
  0xb8   : > { %5782 = vmatprep.mubr.msk.bf16.mxu0 %vm705_vm2, %v6550_v26  ;;  %6036 = vmatprep.subr.msk.bf16.mxu1 %vm778_vm0, %v6559_v28 }
  0xb9   : > { %6037 = vmatprep.subr.msk.bf16.mxu0 %vm778_vm0, %v6566_v29 }
  0xbd   : > { %5783 = vmatmul.mubr.msk.bf16.gmra.mrb[76].mxu0 %vm705_vm2, %v6574_v30 }
  0xbe   : > { %5733 = vmatmul.mubr.msk.bf16.gmra.mrb[76].mxu1 %vm705_vm2, %v6574_v30  ;;  %5786 = vmatprep.mubr.msk.bf16.mxu0 %vm705_vm2, %v6578_v31 }
  0xbf   : > { %5736 = vmatprep.mubr.msk.bf16.mxu1 %vm705_vm2, %v6578_v31 }
  0xc5   : > { %5787 = vmatmul.mubr.msk.bf16.gmra.mrb[80].mxu0 %vm705_vm2, %v6588_v32 }
  0xc6   : > { %5737 = vmatmul.mubr.msk.bf16.gmra.mrb[80].mxu1 %vm705_vm2, %v6588_v32  ;;  %5790 = vmatprep.mubr.msk.bf16.mxu0 %vm705_vm2, %v6590_v33 }
  0xc7   : > { %5740 = vmatprep.mubr.msk.bf16.mxu1 %vm705_vm2, %v6590_v33 }
  0xcd   : > { %5791 = vmatmul.mubr.msk.bf16.gmra.mrb[84].mxu0 %vm705_vm2, %v6600_v34 }
  0xce   : > { %5741 = vmatmul.mubr.msk.bf16.gmra.mrb[84].mxu1 %vm705_vm2, %v6600_v34  ;;  %5794 = vmatprep.mubr.msk.bf16.mxu0 %vm705_vm2, %v6602_v35 }
  0xcf   : > { %5744 = vmatprep.mubr.msk.bf16.mxu1 %vm705_vm2, %v6602_v35 }
  0xd5   : > { %5795 = vmatmul.mubr.msk.bf16.gmra.mrb[88].mxu0 %vm705_vm2, %v6612_v36 }
  0xd6   : > { %5745 = vmatmul.mubr.msk.bf16.gmra.mrb[88].mxu1 %vm705_vm2, %v6612_v36  ;;  %5798 = vmatprep.mubr.msk.bf16.mxu0 %vm705_vm2, %v6614_v37 }
  0xd7   : > { %5748 = vmatprep.mubr.msk.bf16.mxu1 %vm705_vm2, %v6614_v37 }
  0xdd   : > { %5799 = vmatmul.mubr.msk.bf16.gmra.mrb[92].mxu0 %vm705_vm2, %v6624_v38 }
  0xde   : > { %5749 = vmatmul.mubr.msk.bf16.gmra.mrb[92].mxu1 %vm705_vm2, %v6624_v38  ;;  %5802 = vmatprep.mubr.msk.bf16.mxu0 %vm705_vm2, %v6626_v39 }
  0xdf   : > { %5752 = vmatprep.mubr.msk.bf16.mxu1 %vm705_vm2, %v6626_v39 }
  0xe5   : > { %5803 = vmatmul.mubr.msk.bf16.gmra.mrb[96].mxu0 %vm705_vm2, %v6636_v40 }
  0xe6   : > { %5753 = vmatmul.mubr.msk.bf16.gmra.mrb[96].mxu1 %vm705_vm2, %v6636_v40  ;;  %5806 = vmatprep.mubr.msk.bf16.mxu0 %vm705_vm2, %v6639_v41 }
  0xe7   : > { %5756 = vmatprep.mubr.msk.bf16.mxu1 %vm705_vm2, %v6639_v41 }
  0xed   : > { %5807 = vmatmul.mubr.msk.bf16.gmra.mrb[100].mxu0 %vm705_vm2, %v6655_v45 }
  0xee   : > { %5757 = vmatmul.mubr.msk.bf16.gmra.mrb[100].mxu1 %vm705_vm2, %v6655_v45  ;;  %5810 = vmatprep.mubr.msk.bf16.mxu0 %vm705_vm2, %v6657_v46 }
  0xef   : > { %5760 = vmatprep.mubr.msk.bf16.mxu1 %vm705_vm2, %v6657_v46 }
  0xf5   : > { %5811 = vmatmul.mubr.msk.bf16.gmra.mrb[104].mxu0 %vm705_vm2, %v6667_v47 }
  0xf6   : > { %5761 = vmatmul.mubr.msk.bf16.gmra.mrb[104].mxu1 %vm705_vm2, %v6667_v47  ;;  %5814 = vmatprep.mubr.msk.bf16.mxu0 %vm705_vm2, %v6669_v48 }
  0xf7   : > { %5764 = vmatprep.mubr.msk.bf16.mxu1 %vm705_vm2, %v6669_v48 }
  0xf8   : > { %v5580_v49 = vpop.f32.mrb[0].mxu0 }
  0xf9   : > { %v5604_v50 = vpop.f32.mrb[0].mxu1  ;;  %v6679_v51 = vpop.f32.mrb[1].mxu0 }
  0xfa   : > { %v6683_v53 = vpop.f32.mrb[1].mxu1  ;;  %v6685_v54 = vpop.f32.mrb[2].mxu0 }
  0xfb   : > { %v6689_v56 = vpop.f32.mrb[2].mxu1  ;;  %v6691_v57 = vpop.f32.mrb[3].mxu0 }
  0xfc   : > { %v6693_v58 = vpop.f32.mrb[3].mxu1 }
  0xfd   : > { %5815 = vmatmul.mubr.msk.bf16.gmra.mrb[108].mxu0 %vm705_vm2, %v6681_v52 }
  0xfe   : > { %5765 = vmatmul.mubr.msk.bf16.gmra.mrb[108].mxu1 %vm705_vm2, %v6681_v52  ;;  %5818 = vmatprep.mubr.msk.bf16.mxu0 %vm705_vm2, %v6687_v55 }
  0xff   : > { %5768 = vmatprep.mubr.msk.bf16.mxu1 %vm705_vm2, %v6687_v55 }
 0x100   : > { %v6703_v59 = vpop.f32.mrb[4].mxu0 }
 0x101   : > { %v6705_v60 = vpop.f32.mrb[4].mxu1  ;;  %v6707_v61 = vpop.f32.mrb[5].mxu0 }
 0x102   : > { %v6711_v63 = vpop.f32.mrb[5].mxu1  ;;  %v6713_v0 = vpop.f32.mrb[6].mxu0 }
 0x103   : > { %v6717_v2 = vpop.f32.mrb[6].mxu1  ;;  %v834_v3 = vpop.f32.mrb[7].mxu0 }
 0x104   : > { %v922_v4 = vpop.f32.mrb[7].mxu1 }
 0x105   : > { %5819 = vmatmul.mubr.msk.bf16.gmra.mrb[112].mxu0 %vm705_vm2, %v6709_v62 }
 0x106   : > { %5769 = vmatmul.mubr.msk.bf16.gmra.mrb[112].mxu1 %vm705_vm2, %v6709_v62  ;;  %5822 = vmatprep.mubr.msk.bf16.mxu0 %vm705_vm2, %v6715_v1 }
 0x107   : > { %5772 = vmatprep.mubr.msk.bf16.mxu1 %vm705_vm2, %v6715_v1 }
 0x108   : > { %v6727_v5 = vpop.f32.mrb[8].mxu0 }
 0x109   : > { %v6729_v6 = vpop.f32.mrb[8].mxu1  ;;  %v846_v7 = vpop.f32.mrb[9].mxu0 }
 0x10a   : > { %v934_v9 = vpop.f32.mrb[9].mxu1  ;;  %v5589_v10 = vpop.f32.mrb[10].mxu0 }
 0x10b   : > { %v5613_v12 = vpop.f32.mrb[10].mxu1  ;;  %v6735_v13 = vpop.f32.mrb[11].mxu0 }
 0x10c   : > { %v6737_v14 = vpop.f32.mrb[11].mxu1  ;;  %v6803_v12 = vld [vmem:[#allocation2 + $0x40] sm:$0xff]  }
 0x10d   : > { %5823 = vmatmul.mubr.msk.bf16.gmra.mrb[116].mxu0 %vm705_vm2, %v6731_v8  ;;  %7855 = vst [vmem:[#allocation13_spill] sm:$0xff] %v6803_v12 }
 0x10e   : > { %5773 = vmatmul.mubr.msk.bf16.gmra.mrb[116].mxu1 %vm705_vm2, %v6731_v8  ;;  %5878 = vmatprep.mubr.msk.bf16.mxu0 %vm705_vm2, %v6733_v11 }
 0x10f   : > { %5828 = vmatprep.mubr.msk.bf16.mxu1 %vm705_vm2, %v6537_v23  ;;  %v3723_v23 = vsel %vm778_vm0, %v6559_v28, 0 }
 0x110   : > { %v5592_v15 = vpop.f32.mrb[12].mxu0 }
 0x111   : > { %v5616_v16 = vpop.f32.mrb[12].mxu1  ;;  %v6747_v17 = vpop.f32.mrb[13].mxu0 }
 0x112   : > { %v6751_v19 = vpop.f32.mrb[13].mxu1  ;;  %v6753_v20 = vpop.f32.mrb[14].mxu0 }
 0x113   : > { %7846 = vst [vmem:[#allocation4_spill] sm:$0xff] %v6751_v19  ;;  %v6755_v21 = vpop.f32.mrb[14].mxu1  ;;  %v6757_v22 = vpop.f32.mrb[15].mxu0 }
 0x114   : > { %7847 = vst [vmem:[#allocation5_spill] sm:$0xff] %v6755_v21  ;;  %v6761_v27 = vpop.f32.mrb[15].mxu1 }
 0x115   : > { %7848 = vst [vmem:[#allocation6_spill] sm:$0xff] %v6761_v27  ;;  %5879 = vmatmul.mubr.msk.bf16.vlgmr.msra.gmra.mrb[120].mxu0 %vm705_vm2, %v6749_v18 }
 0x116   : > { %5829 = vmatmul.mubr.msk.bf16.vlgmr.msra.gmra.mrb[120].mxu1 %vm705_vm2, %v6547_v24  ;;  %5977 = vmatpush3.bf16.msra.mxu0 %v4145_v25  ;;  %v6787_v24 = vld [vmem:[#allocation2 + $0x38] sm:$0xff]   ;;  %v6805_v25 = vld [vmem:[#allocation2 + $0x48] sm:$0xff]  }
 0x117   : > { %5927 = vmatpush3.bf16.msra.mxu1 %v3723_v23  ;;  %5832 = vmatprep.mubr.msk.bf16.mxu1 %vm705_vm2, %v6550_v26  ;;  %7852 = vst [vmem:[#allocation10_spill] sm:$0xff] %v6787_v24  ;;  %7856 = vst [vmem:[#allocation14_spill] sm:$0xff] %v6805_v25 }
 0x118   : > { %v6773_v43 = vpop.f32.mrb[16].mxu0  ;;  %5882 = vmatprep.mubr.msk.bf16.mxu0 %vm705_vm2, %v6765_v42 }
 0x119   : > { %v6777_v29 = vpop.f32.mrb[16].mxu1  ;;  %v6779_v28 = vpop.f32.mrb[17].mxu0 }
 0x11a   : > { %7849 = vst [vmem:[#allocation7_spill] sm:$0xff] %v6777_v29  ;;  %v6783_v49 = vpop.f32.mrb[17].mxu1  ;;  %v6785_v50 = vpop.f32.mrb[18].mxu0 }
 0x11b   : > { %7851 = vst [vmem:[#allocation9_spill] sm:$0xff] %v6783_v49  ;;  %v6789_v3 = vpop.f32.mrb[18].mxu1  ;;  %v878_v26 = vpop.f32.mrb[19].mxu0 }
 0x11c   : > { %7853 = vst [vmem:[#allocation11_spill] sm:$0xff] %v6789_v3  ;;  %v966_v4 = vpop.f32.mrb[19].mxu1  ;;  %v6821_v3 = vld [vmem:[#allocation2 + $0x58] sm:$0xff]  }
 0x11d   : > { %5883 = vmatmul.mubr.msk.bf16.gmra.mrb[124].mxu0 %vm705_vm2, %v6781_v44  ;;  %7859 = vst [vmem:[#allocation17_spill] sm:$0xff] %v6821_v3 }
 0x11e   : > { %5833 = vmatmul.mubr.msk.bf16.gmra.mrb[124].mxu1 %vm705_vm2, %v6574_v30  ;;  %5886 = vmatprep.mubr.msk.bf16.mxu0 %vm705_vm2, %v6787_v24 }
 0x11f   : > { %5836 = vmatprep.mubr.msk.bf16.mxu1 %vm705_vm2, %v6578_v31 }
 0x120   : > { %v6799_v7 = vpop.f32.mrb[20].mxu0 }
 0x121   : > { %v6801_v9 = vpop.f32.mrb[20].mxu1  ;;  %v890_v10 = vpop.f32.mrb[21].mxu0 }
 0x122   : > { %7854 = vst [vmem:[#allocation12_spill] sm:$0xff] %v6801_v9  ;;  %v978_v15 = vpop.f32.mrb[21].mxu1  ;;  %v5601_v16 = vpop.f32.mrb[22].mxu0 }
 0x123   : > { %v5625_v23 = vpop.f32.mrb[22].mxu1  ;;  %v6807_v26 = vpop.f32.mrb[23].mxu0  ;;  %v6819_v15 = vld [vmem:[#allocation2 + $0x50] sm:$0xff]  }
 0x124   : > { %v6809_v30 = vpop.f32.mrb[23].mxu1  ;;  %7858 = vst [vmem:[#allocation16_spill] sm:$0xff] %v6819_v15 }
 0x125   : > { %7857 = vst [vmem:[#allocation15_spill] sm:$0xff] %v6809_v30  ;;  %5887 = vmatmul.mubr.msk.bf16.gmra.mrb[128].mxu0 %vm705_vm2, %v6803_v12 }
 0x126   : > { %5837 = vmatmul.mubr.msk.bf16.gmra.mrb[128].mxu1 %vm705_vm2, %v6588_v32  ;;  %5890 = vmatprep.mubr.msk.bf16.mxu0 %vm705_vm2, %v6805_v25 }
 0x127   : > { %5840 = vmatprep.mubr.msk.bf16.mxu1 %vm705_vm2, %v6590_v33 }
 0x128   : > { %v5680_v31 = vpop.f32.mrb[24].mxu0 }
 0x129   : > { %v5630_v4 = vpop.f32.mrb[24].mxu1  ;;  %v1453_v10 = vpop.f32.mrb[25].mxu0  ;;  %v1696_v16 = vrot.slane %v5680_v31, 2 }
 0x12a   : > { %v1030_v23 = vpop.f32.mrb[25].mxu1  ;;  %v1693_v30 = vrot.slane %v1453_v10, 2  ;;  %v5681_v9 = vpop.f32.mrb[26].mxu0  ;;  %v1273_v29 = vrot.slane %v5630_v4, 1 }
 0x12b   : > { %v5631_v12 = vpop.f32.mrb[26].mxu1  ;;  %v1456_v49 = vpop.f32.mrb[27].mxu0  ;;  %v1270_v24 = vrot.slane %v1030_v23, 1 }
 0x12c   : > { %v1033_v32 = vpop.f32.mrb[27].mxu1  ;;  %v1694_v25 = vrot.slane %v1456_v49, 2 }
 0x12d   : > { %v1271_v33 = vrot.slane %v1033_v32, 1  ;;  %5891 = vmatmul.mubr.msk.bf16.gmra.mrb[132].mxu0 %vm705_vm2, %v6819_v15  ;;  %v1698_v15 = vrot.slane %v5681_v9, 2 }
 0x12e   : > { %v1695_v21 = vsel %vm1692_vm3, %v1693_v30, %v1694_v25  ;;  %v1697_v31 = vsel %vm1692_vm3, %v1694_v25, %v1696_v16  ;;  %5841 = vmatmul.mubr.msk.bf16.gmra.mrb[132].mxu1 %vm705_vm2, %v6600_v34  ;;  %5894 = vmatprep.mubr.msk.bf16.mxu0 %vm705_vm2, %v6821_v3  ;;  %v6837_v34 = vld [vmem:[#allocation2 + $0x60] sm:$0xff]  }
 0x12f   : > { %v1272_v10 = vsel %vm1269_vm4, %v1270_v24, %v1271_v33  ;;  %v1274_v49 = vsel %vm1269_vm4, %v1271_v33, %v1273_v29  ;;  %5844 = vmatprep.mubr.msk.bf16.mxu1 %vm705_vm2, %v6602_v35  ;;  %v6839_v33 = vld [vmem:[#allocation2 + $0x68] sm:$0xff]   ;;  %v1275_v35 = vrot.slane %v5631_v12, 1 }
 0x130   : > { %v1382_v4 = vadd.f32 %v1272_v10, %v6679_v51  ;;  %v1383_v23 = vadd.f32 %v1274_v49, %v6691_v57  ;;  %v5684_v30 = vpop.f32.mrb[28].mxu0 }
 0x131   : > { %v5634_v25 = vpop.f32.mrb[28].mxu1  ;;  %v1703_v16 = vrot.slane %v5684_v30, 2  ;;  %v1469_v32 = vpop.f32.mrb[29].mxu0 }
 0x132   : > { %v1805_v3 = vadd.f32 %v1695_v21, %v1382_v4  ;;  %v1806_v44 = vadd.f32 %v1697_v31, %v1383_v23  ;;  %v1046_v24 = vpop.f32.mrb[29].mxu1  ;;  %v1699_v27 = vrot.slane %v1469_v32, 2  ;;  %v5685_v29 = vpop.f32.mrb[30].mxu0  ;;  %v1280_v49 = vrot.slane %v5634_v25, 1 }
 0x133   : > { %v1276_v19 = vrot.slane %v1046_v24, 1  ;;  %v5635_v51 = vpop.f32.mrb[30].mxu1  ;;  %v1704_v10 = vrot.slane %v5685_v29, 2  ;;  %v1472_v57 = vpop.f32.mrb[31].mxu0 }
 0x134   : > { %1838 = vst.msk [vmem:[#allocation3] sm:$0xff] %vm1837_vm5, %v1805_v3  ;;  %1839 = vst.msk [vmem:[#allocation3 + $0x8] sm:$0xff] %vm1837_vm5, %v1806_v44  ;;  %v1700_v30 = vsel %vm1692_vm3, %v1698_v15, %v1699_v27  ;;  %v1281_v9 = vrot.slane %v5635_v51, 1  ;;  %v1049_v21 = vpop.f32.mrb[31].mxu1  ;;  %v1701_v31 = vrot.slane %v1472_v57, 2  ;;  %v6860_v57 = vld [vmem:[#allocation2 + $0x70] sm:$0xff]  }
 0x135   : > { %v1277_v4 = vsel %vm1269_vm4, %v1275_v35, %v1276_v19  ;;  %v1705_v23 = vsel %vm1692_vm3, %v1703_v16, %v1704_v10  ;;  %v1278_v32 = vrot.slane %v1049_v21, 1  ;;  %5895 = vmatmul.mubr.msk.bf16.gmra.mrb[136].mxu0 %vm705_vm2, %v6837_v34 }
 0x136   : > { %v1384_v12 = vadd.f32 %v6685_v54, %v1277_v4  ;;  %v1282_v3 = vsel %vm1269_vm4, %v1280_v49, %v1281_v9  ;;  %v1702_v44 = vsel %vm1692_vm3, %v1699_v27, %v1701_v31  ;;  %5845 = vmatmul.mubr.msk.bf16.gmra.mrb[136].mxu1 %vm705_vm2, %v6612_v36  ;;  %5898 = vmatprep.mubr.msk.bf16.mxu0 %vm705_vm2, %v6839_v33 }
 0x137   : > { %v1386_v15 = vadd.f32 %v6703_v59, %v1282_v3  ;;  %v1279_v25 = vsel %vm1269_vm4, %v1276_v19, %v1278_v32  ;;  %5848 = vmatprep.mubr.msk.bf16.mxu1 %vm705_vm2, %v6614_v37  ;;  %v6863_v19 = vld [vmem:[#allocation2 + $0x78] sm:$0xff]  }
 0x138   : > { %v1807_v16 = vadd.f32 %v1700_v30, %v1384_v12  ;;  %v1385_v54 = vadd.f32 %v1279_v25, %v6707_v61  ;;  %v5688_v24 = vpop.f32.mrb[32].mxu0 }
 0x139   : > { %v1809_v29 = vadd.f32 %v1705_v23, %v1386_v15  ;;  %v5638_v35 = vpop.f32.mrb[32].mxu1  ;;  %v1709_v27 = vrot.slane %v5688_v24, 2  ;;  %v1485_v51 = vpop.f32.mrb[33].mxu0 }
 0x13a   : > { %1840 = vst.msk [vmem:[#allocation3 + $0x10] sm:$0xff] %vm1837_vm5, %v1807_v16  ;;  %v1808_v36 = vadd.f32 %v1702_v44, %v1385_v54  ;;  %v1062_v49 = vpop.f32.mrb[33].mxu1  ;;  %v1706_v59 = vrot.slane %v1485_v51, 2  ;;  %v5689_v21 = vpop.f32.mrb[34].mxu0  ;;  %v1286_v4 = vrot.slane %v5638_v35, 1 }
 0x13b   : > { %1842 = vst.msk [vmem:[#allocation3 + $0x20] sm:$0xff] %vm1837_vm5, %v1809_v29  ;;  %v1283_v37 = vrot.slane %v1062_v49, 1  ;;  %v5639_v30 = vpop.f32.mrb[34].mxu1  ;;  %v1711_v61 = vrot.slane %v5689_v21, 2  ;;  %v1488_v31 = vpop.f32.mrb[35].mxu0  ;;  %v6884_v49 = vld [vmem:[#allocation2 + $0x80] sm:$0xff]  }
 0x13c   : > { %1841 = vst.msk [vmem:[#allocation3 + $0x18] sm:$0xff] %vm1837_vm5, %v1808_v36  ;;  %v1707_v23 = vsel %vm1692_vm3, %v1704_v10, %v1706_v59  ;;  %v1288_v32 = vrot.slane %v5639_v30, 1  ;;  %v1065_v12 = vpop.f32.mrb[35].mxu1  ;;  %v1708_v3 = vrot.slane %v1488_v31, 2  ;;  %v6887_v30 = vld [vmem:[#allocation2 + $0x88] sm:$0xff]  }
 0x13d   : > { %v1284_v44 = vsel %vm1269_vm4, %v1281_v9, %v1283_v37  ;;  %v1712_v15 = vsel %vm1692_vm3, %v1709_v27, %v1711_v61  ;;  %v1285_v25 = vrot.slane %v1065_v12, 1  ;;  %5899 = vmatmul.mubr.msk.bf16.gmra.mrb[140].mxu0 %vm705_vm2, %v6860_v57 }
 0x13e   : > { %v1387_v16 = vadd.f32 %v6713_v0, %v1284_v44  ;;  %v1289_v54 = vsel %vm1269_vm4, %v1286_v4, %v1288_v32  ;;  %v1710_v24 = vsel %vm1692_vm3, %v1708_v3, %v1709_v27  ;;  %5849 = vmatmul.mubr.msk.bf16.gmra.mrb[140].mxu1 %vm705_vm2, %v6624_v38  ;;  %5902 = vmatprep.mubr.msk.bf16.mxu0 %vm705_vm2, %v6863_v19 }
 0x13f   : > { %v1389_v10 = vadd.f32 %v6727_v5, %v1289_v54  ;;  %v1287_v9 = vsel %vm1269_vm4, %v1285_v25, %v1286_v4  ;;  %5852 = vmatprep.mubr.msk.bf16.mxu1 %vm705_vm2, %v6626_v39 }
 0x140   : > { %v1810_v29 = vadd.f32 %v1707_v23, %v1387_v16  ;;  %v1388_v0 = vadd.f32 %v1287_v9, %v6735_v13  ;;  %v5692_v35 = vpop.f32.mrb[36].mxu0 }
 0x141   : > { %v1812_v51 = vadd.f32 %v1712_v15, %v1389_v10  ;;  %v5642_v36 = vpop.f32.mrb[36].mxu1  ;;  %v1501_v27 = vpop.f32.mrb[37].mxu0  ;;  %v1716_v59 = vrot.slane %v5692_v35, 2 }
 0x142   : > { %1843 = vst.msk [vmem:[#allocation3 + $0x28] sm:$0xff] %vm1837_vm5, %v1810_v29  ;;  %v1811_v38 = vadd.f32 %v1710_v24, %v1388_v0  ;;  %v1078_v21 = vpop.f32.mrb[37].mxu1  ;;  %v1713_v5 = vrot.slane %v1501_v27, 2  ;;  %v5693_v37 = vpop.f32.mrb[38].mxu0  ;;  %v1293_v4 = vrot.slane %v5642_v36, 1  ;;  %v6905_v29 = vld [vmem:[#allocation2 + $0x90] sm:$0xff]  }
 0x143   : > { %1845 = vst.msk [vmem:[#allocation3 + $0x38] sm:$0xff] %vm1837_vm5, %v1812_v51  ;;  %v5643_v39 = vpop.f32.mrb[38].mxu1  ;;  %v1504_v61 = vpop.f32.mrb[39].mxu0  ;;  %v1290_v23 = vrot.slane %v1078_v21, 1 }
 0x144   : > { %1844 = vst.msk [vmem:[#allocation3 + $0x30] sm:$0xff] %vm1837_vm5, %v1811_v38  ;;  %v1081_v13 = vpop.f32.mrb[39].mxu1  ;;  %v1714_v31 = vrot.slane %v1504_v61, 2  ;;  %v6907_v38 = vld [vmem:[#allocation2 + $0x98] sm:$0xff]  }
 0x145   : > { %v1291_v32 = vrot.slane %v1081_v13, 1  ;;  %5903 = vmatmul.mubr.msk.bf16.gmra.mrb[144].mxu0 %vm705_vm2, %v6884_v49 }
 0x146   : > { %v1715_v12 = vsel %vm1692_vm3, %v1713_v5, %v1714_v31  ;;  %v1717_v3 = vsel %vm1692_vm3, %v1714_v31, %v1716_v59  ;;  %5853 = vmatmul.mubr.msk.bf16.gmra.mrb[144].mxu1 %vm705_vm2, %v6636_v40  ;;  %5906 = vmatprep.mubr.msk.bf16.mxu0 %vm705_vm2, %v6887_v30  ;;  %v1718_v40 = vrot.slane %v5693_v37, 2  ;;  %v1295_v59 = vrot.slane %v5643_v39, 1 }
 0x147   : > { %v1292_v44 = vsel %vm1269_vm4, %v1290_v23, %v1291_v32  ;;  %v1294_v15 = vsel %vm1269_vm4, %v1291_v32, %v1293_v4  ;;  %5856 = vmatprep.mubr.msk.bf16.mxu1 %vm705_vm2, %v6639_v41 }
 0x148   : > { %v1390_v25 = vadd.f32 %v1292_v44, %v6747_v17  ;;  %v1391_v16 = vadd.f32 %v1294_v15, %v6757_v22  ;;  %v5696_v54 = vpop.f32.mrb[40].mxu0 }
 0x149   : > { %v5646_v24 = vpop.f32.mrb[40].mxu1  ;;  %v1723_v10 = vrot.slane %v5696_v54, 2  ;;  %v1517_v9 = vpop.f32.mrb[41].mxu0 }
 0x14a   : > { %v1813_v0 = vadd.f32 %v1715_v12, %v1390_v25  ;;  %v1814_v35 = vadd.f32 %v1717_v3, %v1391_v16  ;;  %v1094_v51 = vpop.f32.mrb[41].mxu1  ;;  %v1719_v36 = vrot.slane %v1517_v9, 2  ;;  %v5697_v27 = vpop.f32.mrb[42].mxu0  ;;  %v1300_v22 = vrot.slane %v5646_v24, 1 }
 0x14b   : > { %v1296_v41 = vrot.slane %v1094_v51, 1  ;;  %v5647_v21 = vpop.f32.mrb[42].mxu1  ;;  %v1724_v17 = vrot.slane %v5697_v27, 2  ;;  %v1520_v5 = vpop.f32.mrb[43].mxu0  ;;  %v6931_v51 = vld [vmem:[#allocation2 + $0xa8] sm:$0xff]  }
 0x14c   : > { %1846 = vst.msk [vmem:[#allocation3 + $0x40] sm:$0xff] %vm1837_vm5, %v1813_v0  ;;  %1847 = vst.msk [vmem:[#allocation3 + $0x48] sm:$0xff] %vm1837_vm5, %v1814_v35  ;;  %v1720_v61 = vsel %vm1692_vm3, %v1718_v40, %v1719_v36  ;;  %v1301_v37 = vrot.slane %v5647_v21, 1  ;;  %v1097_v13 = vpop.f32.mrb[43].mxu1  ;;  %v1721_v31 = vrot.slane %v1520_v5, 2  ;;  %v6928_v40 = vld [vmem:[#allocation2 + $0xa0] sm:$0xff]  }
 0x14d   : > { %v1297_v4 = vsel %vm1269_vm4, %v1295_v59, %v1296_v41  ;;  %v1725_v23 = vsel %vm1692_vm3, %v1723_v10, %v1724_v17  ;;  %v1298_v32 = vrot.slane %v1097_v13, 1  ;;  %5907 = vmatmul.mubr.msk.bf16.gmra.mrb[148].mxu0 %vm705_vm2, %v6905_v29 }
 0x14e   : > { %v1392_v39 = vadd.f32 %v6753_v20, %v1297_v4  ;;  %v1302_v12 = vsel %vm1269_vm4, %v1300_v22, %v1301_v37  ;;  %v1722_v3 = vsel %vm1692_vm3, %v1719_v36, %v1721_v31  ;;  %5857 = vmatmul.mubr.msk.bf16.gmra.mrb[148].mxu1 %vm705_vm2, %v6655_v45  ;;  %5910 = vmatprep.mubr.msk.bf16.mxu0 %vm705_vm2, %v6907_v38 }
 0x14f   : > { %v1394_v44 = vadd.f32 %v6773_v43, %v1302_v12  ;;  %v1299_v15 = vsel %vm1269_vm4, %v1296_v41, %v1298_v32  ;;  %5860 = vmatprep.mubr.msk.bf16.mxu1 %vm705_vm2, %v6657_v46 }
 0x150   : > { %v1815_v25 = vadd.f32 %v1720_v61, %v1392_v39  ;;  %v1393_v20 = vadd.f32 %v1299_v15, %v6779_v28  ;;  %v5700_v16 = vpop.f32.mrb[44].mxu0 }
 0x151   : > { %v1817_v54 = vadd.f32 %v1725_v23, %v1394_v44  ;;  %v5650_v24 = vpop.f32.mrb[44].mxu1  ;;  %v1729_v10 = vrot.slane %v5700_v16, 2  ;;  %v1533_v9 = vpop.f32.mrb[45].mxu0 }
 0x152   : > { %1848 = vst.msk [vmem:[#allocation3 + $0x50] sm:$0xff] %vm1837_vm5, %v1815_v25  ;;  %v1816_v45 = vadd.f32 %v1722_v3, %v1393_v20  ;;  %v1110_v0 = vpop.f32.mrb[45].mxu1  ;;  %v1726_v43 = vrot.slane %v1533_v9, 2  ;;  %v5701_v35 = vpop.f32.mrb[46].mxu0  ;;  %v1306_v59 = vrot.slane %v5650_v24, 1  ;;  %v6952_v25 = vld [vmem:[#allocation2 + $0xb0] sm:$0xff]  }
 0x153   : > { %1850 = vst.msk [vmem:[#allocation3 + $0x60] sm:$0xff] %vm1837_vm5, %v1817_v54  ;;  %v1303_v46 = vrot.slane %v1110_v0, 1  ;;  %v5651_v36 = vpop.f32.mrb[46].mxu1  ;;  %v1731_v28 = vrot.slane %v5701_v35, 2  ;;  %v1536_v27 = vpop.f32.mrb[47].mxu0  ;;  %v6955_v24 = vld [vmem:[#allocation2 + $0xb8] sm:$0xff]  }
 0x154   : > { %1849 = vst.msk [vmem:[#allocation3 + $0x58] sm:$0xff] %vm1837_vm5, %v1816_v45  ;;  %v1727_v41 = vsel %vm1692_vm3, %v1724_v17, %v1726_v43  ;;  %v1308_v21 = vrot.slane %v5651_v36, 1  ;;  %v1113_v5 = vpop.f32.mrb[47].mxu1  ;;  %v1728_v22 = vrot.slane %v1536_v27, 2 }
 0x155   : > { %v1304_v61 = vsel %vm1269_vm4, %v1301_v37, %v1303_v46  ;;  %v1732_v13 = vsel %vm1692_vm3, %v1729_v10, %v1731_v28  ;;  %v1305_v31 = vrot.slane %v1113_v5, 1  ;;  %5911 = vmatmul.mubr.msk.bf16.gmra.mrb[152].mxu0 %vm705_vm2, %v6928_v40 }
 0x156   : > { %v1395_v4 = vadd.f32 %v6785_v50, %v1304_v61  ;;  %v1309_v23 = vsel %vm1269_vm4, %v1306_v59, %v1308_v21  ;;  %v1730_v32 = vsel %vm1692_vm3, %v1728_v22, %v1729_v10  ;;  %5861 = vmatmul.mubr.msk.bf16.gmra.mrb[152].mxu1 %vm705_vm2, %v6667_v47  ;;  %5914 = vmatprep.mubr.msk.bf16.mxu0 %vm705_vm2, %v6931_v51  ;;  %v6973_v61 = vld [vmem:[#allocation2 + $0xc0] sm:$0xff]  }
 0x157   : > { %v1397_v17 = vadd.f32 %v6799_v7, %v1309_v23  ;;  %v1307_v37 = vsel %vm1269_vm4, %v1305_v31, %v1306_v59  ;;  %5864 = vmatprep.mubr.msk.bf16.mxu1 %vm705_vm2, %v6669_v48 }
 0x158   : > { %v1818_v39 = vadd.f32 %v1727_v41, %v1395_v4  ;;  %v1396_v50 = vadd.f32 %v1307_v37, %v6807_v26  ;;  %v5704_v12 = vpop.f32.mrb[48].mxu0 }
 0x159   : > { %v1820_v3 = vadd.f32 %v1732_v13, %v1397_v17  ;;  %v5654_v44 = vpop.f32.mrb[48].mxu1  ;;  %v1549_v15 = vpop.f32.mrb[49].mxu0  ;;  %v1736_v20 = vrot.slane %v5704_v12, 2  ;;  %v6975_v17 = vld [vmem:[#allocation2 + $0xc8] sm:$0xff]  }
 0x15a   : > { %1851 = vst.msk [vmem:[#allocation3 + $0x68] sm:$0xff] %vm1837_vm5, %v1818_v39  ;;  %v1819_v47 = vadd.f32 %v1730_v32, %v1396_v50  ;;  %v1126_v16 = vpop.f32.mrb[49].mxu1  ;;  %v1733_v7 = vrot.slane %v1549_v15, 2  ;;  %v5705_v54 = vpop.f32.mrb[50].mxu0  ;;  %v1313_v45 = vrot.slane %v5654_v44, 1 }
 0x15b   : > { %1853 = vst.msk [vmem:[#allocation3 + $0x78] sm:$0xff] %vm1837_vm5, %v1820_v3  ;;  %v5655_v48 = vpop.f32.mrb[50].mxu1  ;;  %v1552_v10 = vpop.f32.mrb[51].mxu0  ;;  %v1310_v0 = vrot.slane %v1126_v16, 1 }
 0x15c   : > { %1852 = vst.msk [vmem:[#allocation3 + $0x70] sm:$0xff] %vm1837_vm5, %v1819_v47  ;;  %v1129_v26 = vpop.f32.mrb[51].mxu1  ;;  %v1734_v9 = vrot.slane %v1552_v10, 2  ;;  %v1315_v37 = vrot.slane %v5655_v48, 1 }
 0x15d   : > { %v1311_v43 = vrot.slane %v1129_v26, 1  ;;  %5915 = vmatmul.mubr.msk.bf16.gmra.mrb[156].mxu0 %vm705_vm2, %v6952_v25 }
 0x15e   : > { %v1735_v35 = vsel %vm1692_vm3, %v1733_v7, %v1734_v9  ;;  %v1737_v46 = vsel %vm1692_vm3, %v1734_v9, %v1736_v20  ;;  %5865 = vmatmul.mubr.msk.bf16.gmra.mrb[156].mxu1 %vm705_vm2, %v6681_v52  ;;  %5918 = vmatprep.mubr.msk.bf16.mxu0 %vm705_vm2, %v6955_v24  ;;  %v1738_v52 = vrot.slane %v5705_v54, 2 }
 0x15f   : > { %v1312_v36 = vsel %vm1269_vm4, %v1310_v0, %v1311_v43  ;;  %v1314_v28 = vsel %vm1269_vm4, %v1311_v43, %v1313_v45  ;;  %5868 = vmatprep.mubr.msk.bf16.mxu1 %vm705_vm2, %v6687_v55 }
 0x160   : > { %v1398_v27 = vadd.f32 %v1312_v36, %v6683_v53  ;;  %v1399_v59 = vadd.f32 %v1314_v28, %v6693_v58  ;;  %v5708_v41 = vpop.f32.mrb[52].mxu0  ;;  %v6996_v36 = vld [vmem:[#allocation2 + $0xd0] sm:$0xff]  }
 0x161   : > { %v5658_v21 = vpop.f32.mrb[52].mxu1  ;;  %v1743_v5 = vrot.slane %v5708_v41, 2  ;;  %v1565_v22 = vpop.f32.mrb[53].mxu0 }
 0x162   : > { %v1821_v13 = vadd.f32 %v1735_v35, %v1398_v27  ;;  %v1822_v31 = vadd.f32 %v1737_v46, %v1399_v59  ;;  %v1142_v4 = vpop.f32.mrb[53].mxu1  ;;  %v1739_v23 = vrot.slane %v1565_v22, 2  ;;  %v5709_v32 = vpop.f32.mrb[54].mxu0  ;;  %v1320_v58 = vrot.slane %v5658_v21, 1 }
 0x163   : > { %v1316_v55 = vrot.slane %v1142_v4, 1  ;;  %v5659_v39 = vpop.f32.mrb[54].mxu1  ;;  %v1744_v53 = vrot.slane %v5709_v32, 2  ;;  %v1568_v50 = vpop.f32.mrb[55].mxu0 }
 0x164   : > { %1854 = vst.msk [vmem:[#allocation3 + $0x80] sm:$0xff] %vm1837_vm5, %v1821_v13  ;;  %1855 = vst.msk [vmem:[#allocation3 + $0x88] sm:$0xff] %vm1837_vm5, %v1822_v31  ;;  %v1740_v12 = vsel %vm1692_vm3, %v1738_v52, %v1739_v23  ;;  %v1321_v3 = vrot.slane %v5659_v39, 1  ;;  %v1145_v44 = vpop.f32.mrb[55].mxu1  ;;  %v1741_v15 = vrot.slane %v1568_v50, 2 }
 0x165   : > { %v1317_v47 = vsel %vm1269_vm4, %v1315_v37, %v1316_v55  ;;  %v1745_v20 = vsel %vm1692_vm3, %v1743_v5, %v1744_v53  ;;  %v1318_v16 = vrot.slane %v1145_v44, 1  ;;  %5919 = vmatmul.mubr.msk.bf16.gmra.mrb[160].mxu0 %vm705_vm2, %v6973_v61 }
 0x166   : > { %v1400_v7 = vadd.f32 %v6689_v56, %v1317_v47  ;;  %v1322_v54 = vsel %vm1269_vm4, %v1320_v58, %v1321_v3  ;;  %v1742_v48 = vsel %vm1692_vm3, %v1739_v23, %v1741_v15  ;;  %5869 = vmatmul.mubr.msk.bf16.gmra.mrb[160].mxu1 %vm705_vm2, %v6709_v62  ;;  %5922 = vmatprep.mubr.msk.bf16.mxu0 %vm705_vm2, %v6975_v17 }
 0x167   : > { %v1402_v10 = vadd.f32 %v6705_v60, %v1322_v54  ;;  %v1319_v26 = vsel %vm1269_vm4, %v1316_v55, %v1318_v16  ;;  %5872 = vmatprep.mubr.msk.bf16.mxu1 %vm705_vm2, %v6715_v1 }
 0x168   : > { %v1823_v9 = vadd.f32 %v1740_v12, %v1400_v7  ;;  %v1401_v56 = vadd.f32 %v1319_v26, %v6711_v63  ;;  %v5712_v45 = vpop.f32.mrb[56].mxu0 }
 0x169   : > { %v1825_v0 = vadd.f32 %v1745_v20, %v1402_v10  ;;  %v5662_v43 = vpop.f32.mrb[56].mxu1  ;;  %v1749_v35 = vrot.slane %v5712_v45, 2  ;;  %v1581_v46 = vpop.f32.mrb[57].mxu0 }
 0x16a   : > { %1856 = vst.msk [vmem:[#allocation3 + $0x90] sm:$0xff] %vm1837_vm5, %v1823_v9  ;;  %v1824_v62 = vadd.f32 %v1742_v48, %v1401_v56  ;;  %v1158_v28 = vpop.f32.mrb[57].mxu1  ;;  %v1746_v60 = vrot.slane %v1581_v46, 2  ;;  %v5713_v27 = vpop.f32.mrb[58].mxu0  ;;  %v1326_v63 = vrot.slane %v5662_v43, 1 }
 0x16b   : > { %1858 = vst.msk [vmem:[#allocation3 + $0xa0] sm:$0xff] %vm1837_vm5, %v1825_v0  ;;  %v1323_v59 = vrot.slane %v1158_v28, 1  ;;  %v5663_v1 = vpop.f32.mrb[58].mxu1  ;;  %v1751_v41 = vrot.slane %v5713_v27, 2  ;;  %v1584_v21 = vpop.f32.mrb[59].mxu0  ;;  %v7860_v0 = vld [vmem:[#allocation4_spill] sm:$0xff] }
 0x16c   : > { %1857 = vst.msk [vmem:[#allocation3 + $0x98] sm:$0xff] %vm1837_vm5, %v1824_v62  ;;  %v1747_v5 = vsel %vm1692_vm3, %v1744_v53, %v1746_v60  ;;  %v1328_v22 = vrot.slane %v5663_v1, 1  ;;  %v1161_v52 = vpop.f32.mrb[59].mxu1  ;;  %v1748_v13 = vrot.slane %v1584_v21, 2 }
 0x16d   : > { %v1324_v31 = vsel %vm1269_vm4, %v1321_v3, %v1323_v59  ;;  %v1752_v4 = vsel %vm1692_vm3, %v1749_v35, %v1751_v41  ;;  %v1325_v23 = vrot.slane %v1161_v52, 1  ;;  %5923 = vmatmul.mubr.msk.bf16.gmra.mrb[164].mxu0 %vm705_vm2, %v6996_v36 }
 0x16e   : > { %v1403_v32 = vadd.f32 %v6717_v2, %v1324_v31  ;;  %v1329_v37 = vsel %vm1269_vm4, %v1326_v63, %v1328_v22  ;;  %v1750_v55 = vsel %vm1692_vm3, %v1748_v13, %v1749_v35  ;;  %5873 = vmatmul.mubr.msk.bf16.gmra.mrb[164].mxu1 %vm705_vm2, %v6731_v8  ;;  %5978 = vmatprep.mubr.msk.bf16.mxu0 %vm705_vm2, %v6733_v11  ;;  %v7861_v35 = vld [vmem:[#allocation6_spill] sm:$0xff] }
 0x16f   : > { %v1405_v39 = vadd.f32 %v6729_v6, %v1329_v37  ;;  %v1327_v53 = vsel %vm1269_vm4, %v1325_v23, %v1326_v63  ;;  %5928 = vmatprep.mubr.msk.bf16.mxu1 %vm705_vm2, %v6733_v11 }
 0x170   : > { %v1826_v50 = vadd.f32 %v1747_v5, %v1403_v32  ;;  %v1404_v2 = vadd.f32 %v1327_v53, %v6737_v14  ;;  %v5716_v58 = vpop.f32.mrb[60].mxu0 }
 0x171   : > { %v1828_v12 = vadd.f32 %v1752_v4, %v1405_v39  ;;  %v5666_v3 = vpop.f32.mrb[60].mxu1  ;;  %v1597_v44 = vpop.f32.mrb[61].mxu0  ;;  %v1756_v15 = vrot.slane %v5716_v58, 2 }
 0x172   : > { %1859 = vst.msk [vmem:[#allocation3 + $0xa8] sm:$0xff] %vm1837_vm5, %v1826_v50  ;;  %v1827_v8 = vadd.f32 %v1750_v55, %v1404_v2  ;;  %v1174_v47 = vpop.f32.mrb[61].mxu1  ;;  %v1753_v20 = vrot.slane %v1597_v44, 2  ;;  %v5717_v16 = vpop.f32.mrb[62].mxu0  ;;  %v1333_v14 = vrot.slane %v5666_v3, 1  ;;  %v7862_v50 = vld [vmem:[#allocation8_spill] sm:$0xff] }
 0x173   : > { %1861 = vst.msk [vmem:[#allocation3 + $0xb8] sm:$0xff] %vm1837_vm5, %v1828_v12  ;;  %v5667_v6 = vpop.f32.mrb[62].mxu1  ;;  %v1600_v7 = vpop.f32.mrb[63].mxu0  ;;  %v1330_v48 = vrot.slane %v1174_v47, 1  ;;  %v1758_v59 = vrot.slane %v5717_v16, 2  ;;  %v7863_v2 = vld [vmem:[#allocation5_spill] sm:$0xff] }
 0x174   : > { %1860 = vst.msk [vmem:[#allocation3 + $0xb0] sm:$0xff] %vm1837_vm5, %v1827_v8  ;;  %v1177_v11 = vpop.f32.mrb[63].mxu1  ;;  %v1754_v54 = vrot.slane %v1600_v7, 2  ;;  %v1335_v5 = vrot.slane %v5667_v6, 1  ;;  %v7864_v44 = vld [vmem:[#allocation10_spill] sm:$0xff]  ;;  %v7865_v8 = vld [vmem:[#allocation7_spill] sm:$0xff] }
 0x175   : > { %v1331_v10 = vrot.slane %v1177_v11, 1  ;;  %5979 = vmatmul.mubr.msk.bf16.vlgmr.msra.gmra.mrb[168].mxu0 %vm705_vm2, %v6749_v18  ;;  %v7866_v16 = vld [vmem:[#allocation9_spill] sm:$0xff] }
 0x176   : > { %v1755_v26 = vsel %vm1692_vm3, %v1753_v20, %v1754_v54  ;;  %v1757_v9 = vsel %vm1692_vm3, %v1754_v54, %v1756_v15  ;;  %5929 = vmatmul.mubr.msk.bf16.vlgmr.msra.gmra.mrb[168].mxu1 %vm705_vm2, %v6749_v18  ;;  %5982 = vmatprep.mubr.msk.bf16.mxu0 %vm705_vm2, %v6765_v42 }
 0x177   : > { %v1332_v56 = vsel %vm1269_vm4, %v1330_v48, %v1331_v10  ;;  %v1334_v45 = vsel %vm1269_vm4, %v1331_v10, %v1333_v14  ;;  %5932 = vmatprep.mubr.msk.bf16.mxu1 %vm705_vm2, %v6765_v42 }
 0x178   : > { %v1406_v43 = vadd.f32 %v1332_v56, %v7860_v0  ;;  %v1407_v46 = vadd.f32 %v1334_v45, %v7861_v35  ;;  %v5720_v62 = vpop.f32.mrb[64].mxu0 }
 0x179   : > { %v5670_v28 = vpop.f32.mrb[64].mxu1  ;;  %v1763_v60 = vrot.slane %v5720_v62, 2  ;;  %v1613_v27 = vpop.f32.mrb[65].mxu0 }
 0x17a   : > { %v1829_v18 = vadd.f32 %v1755_v26, %v1406_v43  ;;  %v1830_v1 = vadd.f32 %v1757_v9, %v1407_v46  ;;  %v1190_v41 = vpop.f32.mrb[65].mxu1  ;;  %v1759_v21 = vrot.slane %v1613_v27, 2  ;;  %v5721_v63 = vpop.f32.mrb[66].mxu0  ;;  %v1340_v42 = vrot.slane %v5670_v28, 1 }
 0x17b   : > { %v1336_v22 = vrot.slane %v1190_v41, 1  ;;  %v5671_v52 = vpop.f32.mrb[66].mxu1  ;;  %v1764_v13 = vrot.slane %v5721_v63, 2  ;;  %v1616_v31 = vpop.f32.mrb[67].mxu0  ;;  %v7867_v41 = vld [vmem:[#allocation13_spill] sm:$0xff] }
 0x17c   : > { %1862 = vst.msk [vmem:[#allocation3 + $0xc0] sm:$0xff] %vm1837_vm5, %v1829_v18  ;;  %1863 = vst.msk [vmem:[#allocation3 + $0xc8] sm:$0xff] %vm1837_vm5, %v1830_v1  ;;  %v1760_v4 = vsel %vm1692_vm3, %v1758_v59, %v1759_v21  ;;  %v1341_v23 = vrot.slane %v5671_v52, 1  ;;  %v1193_v32 = vpop.f32.mrb[67].mxu1  ;;  %v1761_v37 = vrot.slane %v1616_v31, 2  ;;  %v7869_v52 = vld [vmem:[#allocation14_spill] sm:$0xff] }
 0x17d   : > { %v1337_v55 = vsel %vm1269_vm4, %v1335_v5, %v1336_v22  ;;  %v1765_v39 = vsel %vm1692_vm3, %v1763_v60, %v1764_v13  ;;  %v1338_v53 = vrot.slane %v1193_v32, 1  ;;  %5983 = vmatmul.mubr.msk.bf16.gmra.mrb[172].mxu0 %vm705_vm2, %v7862_v50 }
 0x17e   : > { %v1408_v58 = vadd.f32 %v7863_v2, %v1337_v55  ;;  %v1342_v12 = vsel %vm1269_vm4, %v1340_v42, %v1341_v23  ;;  %v1762_v3 = vsel %vm1692_vm3, %v1759_v21, %v1761_v37  ;;  %5933 = vmatmul.mubr.msk.bf16.gmra.mrb[172].mxu1 %vm705_vm2, %v7862_v50  ;;  %5986 = vmatprep.mubr.msk.bf16.mxu0 %vm705_vm2, %v7864_v44  ;;  %v7868_v21 = vld [vmem:[#allocation11_spill] sm:$0xff] }
 0x17f   : > { %v1410_v15 = vadd.f32 %v7865_v8, %v1342_v12  ;;  %v1339_v47 = vsel %vm1269_vm4, %v1336_v22, %v1338_v53  ;;  %5936 = vmatprep.mubr.msk.bf16.mxu1 %vm705_vm2, %v7864_v44 }
 0x180   : > { %v1831_v20 = vadd.f32 %v1760_v4, %v1408_v58  ;;  %v1409_v6 = vadd.f32 %v1339_v47, %v7866_v16  ;;  %v5724_v7 = vpop.f32.mrb[68].mxu0 }
 0x181   : > { %v1833_v11 = vadd.f32 %v1765_v39, %v1410_v15  ;;  %v5674_v54 = vpop.f32.mrb[68].mxu1  ;;  %v1769_v14 = vrot.slane %v5724_v7, 2  ;;  %v1629_v48 = vpop.f32.mrb[69].mxu0  ;;  %v7873_v7 = vld [vmem:[#allocation17_spill] sm:$0xff] }
 0x182   : > { %1864 = vst.msk [vmem:[#allocation3 + $0xd0] sm:$0xff] %vm1837_vm5, %v1831_v20  ;;  %v1832_v10 = vadd.f32 %v1762_v3, %v1409_v6  ;;  %v1206_v26 = vpop.f32.mrb[69].mxu1  ;;  %v1766_v9 = vrot.slane %v1629_v48, 2  ;;  %v5725_v56 = vpop.f32.mrb[70].mxu0  ;;  %v1346_v46 = vrot.slane %v5674_v54, 1  ;;  %v7872_v20 = vld [vmem:[#allocation16_spill] sm:$0xff] }
 0x183   : > { %1866 = vst.msk [vmem:[#allocation3 + $0xe0] sm:$0xff] %vm1837_vm5, %v1833_v11  ;;  %v1343_v45 = vrot.slane %v1206_v26, 1  ;;  %v5675_v0 = vpop.f32.mrb[70].mxu1  ;;  %v1771_v43 = vrot.slane %v5725_v56, 2  ;;  %v1632_v35 = vpop.f32.mrb[71].mxu0 }
 0x184   : > { %1865 = vst.msk [vmem:[#allocation3 + $0xd8] sm:$0xff] %vm1837_vm5, %v1832_v10  ;;  %v1767_v62 = vsel %vm1692_vm3, %v1764_v13, %v1766_v9  ;;  %v1348_v28 = vrot.slane %v5675_v0, 1  ;;  %v1209_v60 = vpop.f32.mrb[71].mxu1  ;;  %v1768_v27 = vrot.slane %v1632_v35, 2  ;;  %v7870_v13 = vld [vmem:[#allocation12_spill] sm:$0xff] }
 0x185   : > { %v1344_v59 = vsel %vm1269_vm4, %v1341_v23, %v1343_v45  ;;  %v1772_v18 = vsel %vm1692_vm3, %v1769_v14, %v1771_v43  ;;  %v1345_v1 = vrot.slane %v1209_v60, 1  ;;  %5987 = vmatmul.mubr.msk.bf16.gmra.mrb[176].mxu0 %vm705_vm2, %v7867_v41  ;;  %v7871_v23 = vld [vmem:[#allocation15_spill] sm:$0xff] }
 0x186   : > { %v1411_v63 = vadd.f32 %v7868_v21, %v1344_v59  ;;  %v1349_v5 = vsel %vm1269_vm4, %v1346_v46, %v1348_v28  ;;  %v1770_v22 = vsel %vm1692_vm3, %v1768_v27, %v1769_v14  ;;  %5937 = vmatmul.mubr.msk.bf16.gmra.mrb[176].mxu1 %vm705_vm2, %v7867_v41  ;;  %5990 = vmatprep.mubr.msk.bf16.mxu0 %vm705_vm2, %v7869_v52 }
 0x187   : > { %v1413_v31 = vadd.f32 %v7870_v13, %v1349_v5  ;;  %v1347_v42 = vsel %vm1269_vm4, %v1345_v1, %v1346_v46  ;;  %5940 = vmatprep.mubr.msk.bf16.mxu1 %vm705_vm2, %v7869_v52 }
 0x188   : > { %v1834_v4 = vadd.f32 %v1767_v62, %v1411_v63  ;;  %v1412_v32 = vadd.f32 %v1347_v42, %v7871_v23  ;;  %v5780_v37 = vpop.f32.mrb[72].mxu0 }
 0x189   : > { %v1836_v55 = vadd.f32 %v1772_v18, %v1413_v31  ;;  %v5730_v39 = vpop.f32.mrb[72].mxu1  ;;  %v2364_v53 = vpop.f32.mrb[73].mxu0  ;;  %v2606_v2 = vrot.slane %v5780_v37, 1 }
 0x18a   : > { %1867 = vst.msk [vmem:[#allocation3 + $0xe8] sm:$0xff] %vm1837_vm5, %v1834_v4  ;;  %v1835_v50 = vadd.f32 %v1770_v22, %v1412_v32  ;;  %v2150_v58 = vpop.f32.mrb[73].mxu1  ;;  %v2603_v12 = vrot.slane %v2364_v53, 1  ;;  %v5781_v3 = vpop.f32.mrb[74].mxu0 }
 0x18b   : > { %1869 = vst.msk [vmem:[#allocation3 + $0xf8] sm:$0xff] %vm1837_vm5, %v1836_v55  ;;  %v5731_v44 = vpop.f32.mrb[74].mxu1  ;;  %v2367_v8 = vpop.f32.mrb[75].mxu0  ;;  %v2608_v9 = vrot.slane %v5781_v3, 1 }
 0x18c   : > { %1868 = vst.msk [vmem:[#allocation3 + $0xf0] sm:$0xff] %vm1837_vm5, %v1835_v50  ;;  %v2153_v15 = vpop.f32.mrb[75].mxu1  ;;  %v2604_v47 = vrot.slane %v2367_v8, 1 }
 0x18d   : > { %5991 = vmatmul.mubr.msk.bf16.gmra.mrb[180].mxu0 %vm705_vm2, %v7872_v20 }
 0x18e   : > { %v2605_v16 = vsel %vm1269_vm4, %v2603_v12, %v2604_v47  ;;  %v2607_v6 = vsel %vm1269_vm4, %v2604_v47, %v2606_v2  ;;  %5941 = vmatmul.mubr.msk.bf16.gmra.mrb[180].mxu1 %vm705_vm2, %v7872_v20  ;;  %5994 = vmatprep.mubr.msk.bf16.mxu0 %vm705_vm2, %v7873_v7 }
 0x18f   : > { %v7085_v11 = vadd.f32 %v2605_v16, %v2150_v58  ;;  %v7087_v54 = vadd.f32 %v2607_v6, %v2153_v15  ;;  %5944 = vmatprep.mubr.msk.bf16.mxu1 %vm705_vm2, %v7873_v7 }
 0x190   : > { %v5784_v14 = vpop.f32.mrb[76].mxu0 }
 0x191   : > { %v5734_v48 = vpop.f32.mrb[76].mxu1  ;;  %v2613_v10 = vrot.slane %v5784_v14, 1  ;;  %v2380_v26 = vpop.f32.mrb[77].mxu0 }
 0x192   : > { %v2165_v56 = vpop.f32.mrb[77].mxu1  ;;  %v2609_v45 = vrot.slane %v2380_v26, 1  ;;  %v5785_v0 = vpop.f32.mrb[78].mxu0 }
 0x193   : > { %v5735_v43 = vpop.f32.mrb[78].mxu1  ;;  %v2614_v35 = vrot.slane %v5785_v0, 1  ;;  %v2383_v46 = vpop.f32.mrb[79].mxu0 }
 0x194   : > { %v2610_v62 = vsel %vm1269_vm4, %v2608_v9, %v2609_v45  ;;  %v2168_v28 = vpop.f32.mrb[79].mxu1  ;;  %v2611_v60 = vrot.slane %v2383_v46, 1 }
 0x195   : > { %v7092_v27 = vadd.f32 %v5731_v44, %v2610_v62  ;;  %v2615_v59 = vsel %vm1269_vm4, %v2613_v10, %v2614_v35  ;;  %5995 = vmatmul.mubr.msk.bf16.gmra.mrb[184].mxu0 %vm705_vm2, %v6837_v34 }
 0x196   : > { %v7097_v18 = vadd.f32 %v5734_v48, %v2615_v59  ;;  %v2612_v1 = vsel %vm1269_vm4, %v2609_v45, %v2611_v60  ;;  %5945 = vmatmul.mubr.msk.bf16.gmra.mrb[184].mxu1 %vm705_vm2, %v6837_v34  ;;  %5998 = vmatprep.mubr.msk.bf16.mxu0 %vm705_vm2, %v6839_v33 }
 0x197   : > { %v7104_v41 = vadd.f32 %v2612_v1, %v2165_v56  ;;  %5948 = vmatprep.mubr.msk.bf16.mxu1 %vm705_vm2, %v6839_v33 }
 0x198   : > { %v5788_v21 = vpop.f32.mrb[80].mxu0 }
 0x199   : > { %v5738_v63 = vpop.f32.mrb[80].mxu1  ;;  %v2619_v5 = vrot.slane %v5788_v21, 1  ;;  %v2396_v22 = vpop.f32.mrb[81].mxu0 }
 0x19a   : > { %v2180_v52 = vpop.f32.mrb[81].mxu1  ;;  %v2616_v13 = vrot.slane %v2396_v22, 1  ;;  %v5789_v31 = vpop.f32.mrb[82].mxu0 }
 0x19b   : > { %v5739_v42 = vpop.f32.mrb[82].mxu1  ;;  %v2621_v4 = vrot.slane %v5789_v31, 1  ;;  %v2399_v23 = vpop.f32.mrb[83].mxu0 }
 0x19c   : > { %v2617_v34 = vsel %vm1269_vm4, %v2614_v35, %v2616_v13  ;;  %v2182_v32 = vpop.f32.mrb[83].mxu1  ;;  %v2618_v37 = vrot.slane %v2399_v23, 1 }
 0x19d   : > { %v7109_v55 = vadd.f32 %v5735_v43, %v2617_v34  ;;  %v2622_v39 = vsel %vm1269_vm4, %v2619_v5, %v2621_v4  ;;  %5999 = vmatmul.mubr.msk.bf16.gmra.mrb[188].mxu0 %vm705_vm2, %v6860_v57 }
 0x19e   : > { %v7114_v33 = vadd.f32 %v5738_v63, %v2622_v39  ;;  %v2620_v53 = vsel %vm1269_vm4, %v2618_v37, %v2619_v5  ;;  %5949 = vmatmul.mubr.msk.bf16.gmra.mrb[188].mxu1 %vm705_vm2, %v6860_v57  ;;  %6002 = vmatprep.mubr.msk.bf16.mxu0 %vm705_vm2, %v6863_v19 }
 0x19f   : > { %v7121_v50 = vadd.f32 %v2620_v53, %v2182_v32  ;;  %5952 = vmatprep.mubr.msk.bf16.mxu1 %vm705_vm2, %v6863_v19 }
 0x1a0   : > { %v5792_v2 = vpop.f32.mrb[84].mxu0 }
 0x1a1   : > { %v5742_v58 = vpop.f32.mrb[84].mxu1  ;;  %v2412_v12 = vpop.f32.mrb[85].mxu0  ;;  %v2626_v3 = vrot.slane %v5792_v2, 1 }
 0x1a2   : > { %v2194_v44 = vpop.f32.mrb[85].mxu1  ;;  %v2623_v8 = vrot.slane %v2412_v12, 1  ;;  %v5793_v15 = vpop.f32.mrb[86].mxu0 }
 0x1a3   : > { %v5743_v47 = vpop.f32.mrb[86].mxu1  ;;  %v2415_v20 = vpop.f32.mrb[87].mxu0  ;;  %v2628_v56 = vrot.slane %v5793_v15, 1 }
 0x1a4   : > { %v2197_v16 = vpop.f32.mrb[87].mxu1  ;;  %v2624_v6 = vrot.slane %v2415_v20, 1 }
 0x1a5   : > { %6003 = vmatmul.mubr.msk.bf16.gmra.mrb[192].mxu0 %vm705_vm2, %v6884_v49 }
 0x1a6   : > { %v2625_v57 = vsel %vm1269_vm4, %v2623_v8, %v2624_v6  ;;  %v2627_v7 = vsel %vm1269_vm4, %v2624_v6, %v2626_v3  ;;  %5953 = vmatmul.mubr.msk.bf16.gmra.mrb[192].mxu1 %vm705_vm2, %v6884_v49  ;;  %6006 = vmatprep.mubr.msk.bf16.mxu0 %vm705_vm2, %v6887_v30 }
 0x1a7   : > { %v7133_v19 = vadd.f32 %v2625_v57, %v2194_v44  ;;  %v7135_v14 = vadd.f32 %v2627_v7, %v2197_v16  ;;  %5956 = vmatprep.mubr.msk.bf16.mxu1 %vm705_vm2, %v6887_v30 }
 0x1a8   : > { %v5796_v48 = vpop.f32.mrb[88].mxu0 }
 0x1a9   : > { %v5746_v10 = vpop.f32.mrb[88].mxu1  ;;  %v2633_v26 = vrot.slane %v5796_v48, 1  ;;  %v2428_v9 = vpop.f32.mrb[89].mxu0 }
 0x1aa   : > { %v2209_v45 = vpop.f32.mrb[89].mxu1  ;;  %v2629_v0 = vrot.slane %v2428_v9, 1  ;;  %v5797_v43 = vpop.f32.mrb[90].mxu0 }
 0x1ab   : > { %v5747_v35 = vpop.f32.mrb[90].mxu1  ;;  %v2634_v49 = vrot.slane %v5797_v43, 1  ;;  %v2431_v46 = vpop.f32.mrb[91].mxu0 }
 0x1ac   : > { %v2630_v62 = vsel %vm1269_vm4, %v2628_v56, %v2629_v0  ;;  %v2212_v28 = vpop.f32.mrb[91].mxu1  ;;  %v2631_v60 = vrot.slane %v2431_v46, 1 }
 0x1ad   : > { %v7140_v59 = vadd.f32 %v5743_v47, %v2630_v62  ;;  %v2635_v1 = vsel %vm1269_vm4, %v2633_v26, %v2634_v49  ;;  %6007 = vmatmul.mubr.msk.bf16.gmra.mrb[196].mxu0 %vm705_vm2, %v6905_v29 }
 0x1ae   : > { %v7145_v30 = vadd.f32 %v5746_v10, %v2635_v1  ;;  %v2632_v21 = vsel %vm1269_vm4, %v2629_v0, %v2631_v60  ;;  %5957 = vmatmul.mubr.msk.bf16.gmra.mrb[196].mxu1 %vm705_vm2, %v6905_v29  ;;  %6010 = vmatprep.mubr.msk.bf16.mxu0 %vm705_vm2, %v6907_v38 }
 0x1af   : > { %v7152_v63 = vadd.f32 %v2632_v21, %v2209_v45  ;;  %5960 = vmatprep.mubr.msk.bf16.mxu1 %vm705_vm2, %v6907_v38 }
 0x1b0   : > { %v5800_v5 = vpop.f32.mrb[92].mxu0 }
 0x1b1   : > { %v5750_v22 = vpop.f32.mrb[92].mxu1  ;;  %v2639_v52 = vrot.slane %v5800_v5, 1  ;;  %v2444_v13 = vpop.f32.mrb[93].mxu0 }
 0x1b2   : > { %v2224_v31 = vpop.f32.mrb[93].mxu1  ;;  %v2636_v42 = vrot.slane %v2444_v13, 1  ;;  %v5801_v4 = vpop.f32.mrb[94].mxu0 }
 0x1b3   : > { %v5751_v23 = vpop.f32.mrb[94].mxu1  ;;  %v2641_v34 = vrot.slane %v5801_v4, 1  ;;  %v2447_v32 = vpop.f32.mrb[95].mxu0 }
 0x1b4   : > { %v2637_v29 = vsel %vm1269_vm4, %v2634_v49, %v2636_v42  ;;  %v2226_v37 = vpop.f32.mrb[95].mxu1  ;;  %v2638_v39 = vrot.slane %v2447_v32, 1 }
 0x1b5   : > { %v7157_v53 = vadd.f32 %v5747_v35, %v2637_v29  ;;  %v2642_v2 = vsel %vm1269_vm4, %v2639_v52, %v2641_v34  ;;  %6011 = vmatmul.mubr.msk.bf16.gmra.mrb[200].mxu0 %vm705_vm2, %v6928_v40 }
 0x1b6   : > { %v7162_v38 = vadd.f32 %v5750_v22, %v2642_v2  ;;  %v2640_v58 = vsel %vm1269_vm4, %v2638_v39, %v2639_v52  ;;  %5961 = vmatmul.mubr.msk.bf16.gmra.mrb[200].mxu1 %vm705_vm2, %v6928_v40  ;;  %6014 = vmatprep.mubr.msk.bf16.mxu0 %vm705_vm2, %v6931_v51 }
 0x1b7   : > { %v7169_v12 = vadd.f32 %v2640_v58, %v2226_v37  ;;  %5964 = vmatprep.mubr.msk.bf16.mxu1 %vm705_vm2, %v6931_v51 }
 0x1b8   : > { %v5804_v3 = vpop.f32.mrb[96].mxu0 }
 0x1b9   : > { %v5754_v44 = vpop.f32.mrb[96].mxu1  ;;  %v2460_v8 = vpop.f32.mrb[97].mxu0  ;;  %v2646_v15 = vrot.slane %v5804_v3, 1 }
 0x1ba   : > { %v2238_v47 = vpop.f32.mrb[97].mxu1  ;;  %v2643_v20 = vrot.slane %v2460_v8, 1  ;;  %v5805_v16 = vpop.f32.mrb[98].mxu0 }
 0x1bb   : > { %v5755_v6 = vpop.f32.mrb[98].mxu1  ;;  %v2463_v57 = vpop.f32.mrb[99].mxu0  ;;  %v2648_v43 = vrot.slane %v5805_v16, 1 }
 0x1bc   : > { %v2241_v7 = vpop.f32.mrb[99].mxu1  ;;  %v2644_v48 = vrot.slane %v2463_v57, 1 }
 0x1bd   : > { %6015 = vmatmul.mubr.msk.bf16.gmra.mrb[204].mxu0 %vm705_vm2, %v6952_v25 }
 0x1be   : > { %v2645_v40 = vsel %vm1269_vm4, %v2643_v20, %v2644_v48  ;;  %v2647_v10 = vsel %vm1269_vm4, %v2644_v48, %v2646_v15  ;;  %5965 = vmatmul.mubr.msk.bf16.gmra.mrb[204].mxu1 %vm705_vm2, %v6952_v25  ;;  %6018 = vmatprep.mubr.msk.bf16.mxu0 %vm705_vm2, %v6955_v24 }
 0x1bf   : > { %v7181_v51 = vadd.f32 %v2645_v40, %v2238_v47  ;;  %v7183_v26 = vadd.f32 %v2647_v10, %v2241_v7  ;;  %5968 = vmatprep.mubr.msk.bf16.mxu1 %vm705_vm2, %v6955_v24 }
 0x1c0   : > { %v5808_v9 = vpop.f32.mrb[100].mxu0 }
 0x1c1   : > { %v5758_v56 = vpop.f32.mrb[100].mxu1  ;;  %v2653_v45 = vrot.slane %v5808_v9, 1  ;;  %v2476_v0 = vpop.f32.mrb[101].mxu0 }
 0x1c2   : > { %v2253_v35 = vpop.f32.mrb[101].mxu1  ;;  %v2649_v49 = vrot.slane %v2476_v0, 1  ;;  %v5809_v46 = vpop.f32.mrb[102].mxu0 }
 0x1c3   : > { %v5759_v62 = vpop.f32.mrb[102].mxu1  ;;  %v2654_v25 = vrot.slane %v5809_v46, 1  ;;  %v2479_v28 = vpop.f32.mrb[103].mxu0 }
 0x1c4   : > { %v2650_v60 = vsel %vm1269_vm4, %v2648_v43, %v2649_v49  ;;  %v2256_v1 = vpop.f32.mrb[103].mxu1  ;;  %v2651_v21 = vrot.slane %v2479_v28, 1 }
 0x1c5   : > { %v7188_v5 = vadd.f32 %v5755_v6, %v2650_v60  ;;  %v2655_v22 = vsel %vm1269_vm4, %v2653_v45, %v2654_v25  ;;  %6019 = vmatmul.mubr.msk.bf16.gmra.mrb[208].mxu0 %vm705_vm2, %v6973_v61 }
 0x1c6   : > { %v7193_v24 = vadd.f32 %v5758_v56, %v2655_v22  ;;  %v2652_v52 = vsel %vm1269_vm4, %v2649_v49, %v2651_v21  ;;  %5969 = vmatmul.mubr.msk.bf16.gmra.mrb[208].mxu1 %vm705_vm2, %v6973_v61  ;;  %6022 = vmatprep.mubr.msk.bf16.mxu0 %vm705_vm2, %v6975_v17 }
 0x1c7   : > { %v7200_v13 = vadd.f32 %v2652_v52, %v2253_v35  ;;  %5972 = vmatprep.mubr.msk.bf16.mxu1 %vm705_vm2, %v6975_v17 }
 0x1c8   : > { %v5812_v31 = vpop.f32.mrb[104].mxu0 }
 0x1c9   : > { %v5762_v42 = vpop.f32.mrb[104].mxu1  ;;  %v2659_v4 = vrot.slane %v5812_v31, 1  ;;  %v2492_v23 = vpop.f32.mrb[105].mxu0 }
 0x1ca   : > { %v2268_v34 = vpop.f32.mrb[105].mxu1  ;;  %v2656_v32 = vrot.slane %v2492_v23, 1  ;;  %v5813_v29 = vpop.f32.mrb[106].mxu0 }
 0x1cb   : > { %v5763_v37 = vpop.f32.mrb[106].mxu1  ;;  %v2661_v39 = vrot.slane %v5813_v29, 1  ;;  %v2495_v2 = vpop.f32.mrb[107].mxu0 }
 0x1cc   : > { %v2657_v61 = vsel %vm1269_vm4, %v2654_v25, %v2656_v32  ;;  %v2270_v58 = vpop.f32.mrb[107].mxu1  ;;  %v2658_v3 = vrot.slane %v2495_v2, 1 }
 0x1cd   : > { %v7205_v44 = vadd.f32 %v5759_v62, %v2657_v61  ;;  %v2662_v8 = vsel %vm1269_vm4, %v2659_v4, %v2661_v39  ;;  %6023 = vmatmul.mubr.msk.bf16.gmra.mrb[212].mxu0 %vm705_vm2, %v6996_v36 }
 0x1ce   : > { %v7210_v17 = vadd.f32 %v5762_v42, %v2662_v8  ;;  %v2660_v15 = vsel %vm1269_vm4, %v2658_v3, %v2659_v4  ;;  %5973 = vmatmul.mubr.msk.bf16.gmra.mrb[212].mxu1 %vm705_vm2, %v6996_v36 }
 0x1cf   : > { %v7215_v47 = vadd.f32 %v2660_v15, %v2270_v58 }
 0x1d0   : > { %v5816_v20 = vpop.f32.mrb[108].mxu0 }
 0x1d1   : > { %v5766_v16 = vpop.f32.mrb[108].mxu1  ;;  %v2508_v6 = vpop.f32.mrb[109].mxu0  ;;  %v2666_v57 = vrot.slane %v5816_v20, 1 }
 0x1d2   : > { %v2282_v7 = vpop.f32.mrb[109].mxu1  ;;  %v2663_v48 = vrot.slane %v2508_v6, 1  ;;  %v5817_v40 = vpop.f32.mrb[110].mxu0 }
 0x1d3   : > { %v5767_v10 = vpop.f32.mrb[110].mxu1  ;;  %v2511_v9 = vpop.f32.mrb[111].mxu0  ;;  %v2668_v28 = vrot.slane %v5817_v40, 1 }
 0x1d4   : > { %v2285_v56 = vpop.f32.mrb[111].mxu1  ;;  %v2664_v45 = vrot.slane %v2511_v9, 1 }
 0x1d6   : > { %v2665_v0 = vsel %vm1269_vm4, %v2663_v48, %v2664_v45  ;;  %v2667_v43 = vsel %vm1269_vm4, %v2664_v45, %v2666_v57 }
 0x1d7   : > { %v7219_v35 = vadd.f32 %v2665_v0, %v2282_v7  ;;  %v7221_v36 = vadd.f32 %v2667_v43, %v2285_v56 }
 0x1d8   : > { %v5820_v49 = vpop.f32.mrb[112].mxu0 }
 0x1d9   : > { %v5770_v46 = vpop.f32.mrb[112].mxu1  ;;  %v2673_v62 = vrot.slane %v5820_v49, 1  ;;  %v2524_v25 = vpop.f32.mrb[113].mxu0 }
 0x1da   : > { %v2297_v60 = vpop.f32.mrb[113].mxu1  ;;  %v2669_v1 = vrot.slane %v2524_v25, 1  ;;  %v5821_v21 = vpop.f32.mrb[114].mxu0 }
 0x1db   : > { %v5771_v22 = vpop.f32.mrb[114].mxu1  ;;  %v2674_v52 = vrot.slane %v5821_v21, 1  ;;  %v2527_v31 = vpop.f32.mrb[115].mxu0 }
 0x1dc   : > { %v2670_v42 = vsel %vm1269_vm4, %v2668_v28, %v2669_v1  ;;  %v2300_v4 = vpop.f32.mrb[115].mxu1  ;;  %v2671_v23 = vrot.slane %v2527_v31, 1 }
 0x1dd   : > { %v7224_v34 = vadd.f32 %v5767_v10, %v2670_v42  ;;  %v2675_v32 = vsel %vm1269_vm4, %v2673_v62, %v2674_v52 }
 0x1de   : > { %v7227_v29 = vadd.f32 %v5770_v46, %v2675_v32  ;;  %v2672_v37 = vsel %vm1269_vm4, %v2669_v1, %v2671_v23 }
 0x1df   : > { %v7230_v39 = vadd.f32 %v2672_v37, %v2297_v60  ;;  %v3169_v37 = vld [vmem:[#allocation3] sm:$0xff] }
 0x1e0   : > { %v5824_v2 = vpop.f32.mrb[116].mxu0 }
 0x1e1   : > { %v5774_v61 = vpop.f32.mrb[116].mxu1  ;;  %v2679_v58 = vrot.slane %v5824_v2, 1  ;;  %v2540_v3 = vpop.f32.mrb[117].mxu0  ;;  %v3170_v2 = vld [vmem:[#allocation3 + $0x8] sm:$0xff] }
 0x1e2   : > { %v2312_v8 = vpop.f32.mrb[117].mxu1  ;;  %v2676_v15 = vrot.slane %v2540_v3, 1  ;;  %v5825_v20 = vpop.f32.mrb[118].mxu0 }
 0x1e3   : > { %v5775_v16 = vpop.f32.mrb[118].mxu1  ;;  %v2681_v6 = vrot.slane %v5825_v20, 1  ;;  %v2543_v57 = vpop.f32.mrb[119].mxu0 }
 0x1e4   : > { %v2677_v7 = vsel %vm1269_vm4, %v2674_v52, %v2676_v15  ;;  %v2314_v48 = vpop.f32.mrb[119].mxu1  ;;  %v2678_v40 = vrot.slane %v2543_v57, 1 }
 0x1e5   : > { %v7233_v10 = vadd.f32 %v5771_v22, %v2677_v7  ;;  %v2682_v9 = vsel %vm1269_vm4, %v2679_v58, %v2681_v6 }
 0x1e6   : > { %v7236_v56 = vadd.f32 %v5774_v61, %v2682_v9  ;;  %v2680_v45 = vsel %vm1269_vm4, %v2678_v40, %v2679_v58 }
 0x1e7   : > { %v7239_v0 = vadd.f32 %v2680_v45, %v2314_v48 }
 0x1e8   : > { %v5880_v43 = vpop.f32.mrb[120].mxu0 }
 0x1e9   : > { %v5830_v49 = vpop.f32.mrb[120].mxu1  ;;  %v7241_v46 = vpop.f32.mrb[121].mxu0 }
 0x1ea   : > { %v2786_v62 = vpop.f32.mrb[121].mxu1  ;;  %v7243_v25 = vpop.f32.mrb[122].mxu0  ;;  %v3028_v21 = vrot.slane %v5830_v49, 2  ;;  %v3171_v49 = vld [vmem:[#allocation3 + $0x10] sm:$0xff] }
 0x1eb   : > { %v5831_v28 = vpop.f32.mrb[122].mxu1  ;;  %v7245_v60 = vpop.f32.mrb[123].mxu0  ;;  %v3025_v22 = vrot.slane %v2786_v62, 2 }
 0x1ec   : > { %v2789_v1 = vpop.f32.mrb[123].mxu1  ;;  %v3030_v16 = vrot.slane %v5831_v28, 2 }
 0x1ed   : > { %v3026_v52 = vrot.slane %v2789_v1, 2 }
 0x1ef   : > { %v3027_v31 = vsel %vm1692_vm3, %v3025_v22, %v3026_v52  ;;  %v3029_v42 = vsel %vm1692_vm3, %v3026_v52, %v3028_v21  ;;  %v3173_v21 = vld [vmem:[#allocation3 + $0x20] sm:$0xff] }
 0x1f0   : > { %v3137_v4 = vadd.f32 %v3027_v31, %v7085_v11  ;;  %v3138_v23 = vadd.f32 %v3029_v42, %v7087_v54  ;;  %v7251_v32 = vpop.f32.mrb[124].mxu0  ;;  %v3172_v42 = vld [vmem:[#allocation3 + $0x18] sm:$0xff] }
 0x1f1   : > { %v5834_v61 = vpop.f32.mrb[124].mxu1  ;;  %v7253_v58 = vpop.f32.mrb[125].mxu0 }
 0x1f2   : > { %v3201_v3 = vadd.f32 %v3169_v37, %v3137_v4  ;;  %v3202_v8 = vadd.f32 %v3170_v2, %v3138_v23  ;;  %v2802_v15 = vpop.f32.mrb[125].mxu1  ;;  %v7255_v20 = vpop.f32.mrb[126].mxu0  ;;  %v3035_v11 = vrot.slane %v5834_v61, 2 }
 0x1f3   : > { %v3031_v6 = vrot.slane %v2802_v15, 2  ;;  %v5835_v57 = vpop.f32.mrb[126].mxu1  ;;  %v3563_v7 = vpop.f32.mrb[127].mxu0 }
 0x1f4   : > { %3233 = vst.msk [vmem:[#allocation3] sm:$0xff] %vm1837_vm5, %v3201_v3  ;;  %3234 = vst.msk [vmem:[#allocation3 + $0x8] sm:$0xff] %vm1837_vm5, %v3202_v8  ;;  %v3036_v54 = vrot.slane %v5835_v57, 2  ;;  %v2805_v48 = vpop.f32.mrb[127].mxu1 }
 0x1f5   : > { %v3032_v40 = vsel %vm1692_vm3, %v3030_v16, %v3031_v6  ;;  %v3033_v9 = vrot.slane %v2805_v48, 2 }
 0x1f6   : > { %v3139_v45 = vadd.f32 %v3032_v40, %v7092_v27  ;;  %v3037_v43 = vsel %vm1692_vm3, %v3035_v11, %v3036_v54  ;;  %v3174_v11 = vld [vmem:[#allocation3 + $0x28] sm:$0xff] }
 0x1f7   : > { %v3141_v62 = vadd.f32 %v3037_v43, %v7097_v18  ;;  %v3034_v28 = vsel %vm1692_vm3, %v3031_v6, %v3033_v9 }
 0x1f8   : > { %v3203_v1 = vadd.f32 %v3171_v49, %v3139_v45  ;;  %v3140_v22 = vadd.f32 %v3034_v28, %v7104_v41  ;;  %v7265_v52 = vpop.f32.mrb[128].mxu0  ;;  %v3176_v45 = vld [vmem:[#allocation3 + $0x38] sm:$0xff]  ;;  %v3175_v28 = vld [vmem:[#allocation3 + $0x30] sm:$0xff] }
 0x1f9   : > { %v3205_v31 = vadd.f32 %v3173_v21, %v3141_v62  ;;  %v5838_v4 = vpop.f32.mrb[128].mxu1  ;;  %v3575_v23 = vpop.f32.mrb[129].mxu0 }
 0x1fa   : > { %3235 = vst.msk [vmem:[#allocation3 + $0x10] sm:$0xff] %vm1837_vm5, %v3203_v1  ;;  %v3204_v27 = vadd.f32 %v3172_v42, %v3140_v22  ;;  %v2818_v37 = vpop.f32.mrb[129].mxu1  ;;  %v5889_v2 = vpop.f32.mrb[130].mxu0  ;;  %v3041_v41 = vrot.slane %v5838_v4, 2 }
 0x1fb   : > { %3237 = vst.msk [vmem:[#allocation3 + $0x20] sm:$0xff] %vm1837_vm5, %v3205_v31  ;;  %v3038_v18 = vrot.slane %v2818_v37, 2  ;;  %v5839_v61 = vpop.f32.mrb[130].mxu1  ;;  %v7269_v3 = vpop.f32.mrb[131].mxu0 }
 0x1fc   : > { %3236 = vst.msk [vmem:[#allocation3 + $0x18] sm:$0xff] %vm1837_vm5, %v3204_v27  ;;  %v3043_v8 = vrot.slane %v5839_v61, 2  ;;  %v2821_v15 = vpop.f32.mrb[131].mxu1 }
 0x1fd   : > { %v3039_v16 = vsel %vm1692_vm3, %v3036_v54, %v3038_v18  ;;  %v3040_v6 = vrot.slane %v2821_v15, 2 }
 0x1fe   : > { %v3142_v57 = vadd.f32 %v3039_v16, %v7109_v55  ;;  %v3044_v7 = vsel %vm1692_vm3, %v3041_v41, %v3043_v8  ;;  %v3178_v8 = vld [vmem:[#allocation3 + $0x48] sm:$0xff] }
 0x1ff   : > { %v3144_v48 = vadd.f32 %v3044_v7, %v7114_v33  ;;  %v3042_v40 = vsel %vm1692_vm3, %v3040_v6, %v3041_v41  ;;  %v3177_v41 = vld [vmem:[#allocation3 + $0x40] sm:$0xff] }
 0x200   : > { %v3206_v9 = vadd.f32 %v3174_v11, %v3142_v57  ;;  %v3143_v43 = vadd.f32 %v3042_v40, %v7121_v50  ;;  %v5892_v49 = vpop.f32.mrb[132].mxu0 }
 0x201   : > { %v3208_v62 = vadd.f32 %v3176_v45, %v3144_v48  ;;  %v5842_v1 = vpop.f32.mrb[132].mxu1  ;;  %v7278_v21 = vpop.f32.mrb[133].mxu0 }
 0x202   : > { %3238 = vst.msk [vmem:[#allocation3 + $0x28] sm:$0xff] %vm1837_vm5, %v3206_v9  ;;  %v3207_v55 = vadd.f32 %v3175_v28, %v3143_v43  ;;  %v2834_v54 = vpop.f32.mrb[133].mxu1  ;;  %v7281_v22 = vpop.f32.mrb[134].mxu0  ;;  %v3048_v42 = vrot.slane %v5842_v1, 2 }
 0x203   : > { %3240 = vst.msk [vmem:[#allocation3 + $0x38] sm:$0xff] %vm1837_vm5, %v3208_v62  ;;  %v5843_v33 = vpop.f32.mrb[134].mxu1  ;;  %v7284_v31 = vpop.f32.mrb[135].mxu0  ;;  %v3045_v4 = vrot.slane %v2834_v54, 2 }
 0x204   : > { %3239 = vst.msk [vmem:[#allocation3 + $0x30] sm:$0xff] %vm1837_vm5, %v3207_v55  ;;  %v2837_v50 = vpop.f32.mrb[135].mxu1  ;;  %v3050_v48 = vrot.slane %v5843_v33, 2  ;;  %v3179_v55 = vld [vmem:[#allocation3 + $0x50] sm:$0xff] }
 0x205   : > { %v3046_v23 = vrot.slane %v2837_v50, 2 }
 0x207   : > { %v3047_v27 = vsel %vm1692_vm3, %v3045_v4, %v3046_v23  ;;  %v3049_v37 = vsel %vm1692_vm3, %v3046_v23, %v3048_v42  ;;  %v3181_v42 = vld [vmem:[#allocation3 + $0x60] sm:$0xff] }
 0x208   : > { %v3145_v2 = vadd.f32 %v3047_v27, %v7133_v19  ;;  %v3146_v18 = vadd.f32 %v3049_v37, %v7135_v14  ;;  %v7291_v61 = vpop.f32.mrb[136].mxu0  ;;  %v3180_v37 = vld [vmem:[#allocation3 + $0x58] sm:$0xff] }
 0x209   : > { %v5846_v15 = vpop.f32.mrb[136].mxu1  ;;  %v7293_v16 = vpop.f32.mrb[137].mxu0 }
 0x20a   : > { %v3209_v6 = vadd.f32 %v3177_v41, %v3145_v2  ;;  %v3210_v57 = vadd.f32 %v3178_v8, %v3146_v18  ;;  %v2850_v7 = vpop.f32.mrb[137].mxu1  ;;  %v7295_v11 = vpop.f32.mrb[138].mxu0  ;;  %v3055_v19 = vrot.slane %v5846_v15, 2 }
 0x20b   : > { %v3051_v40 = vrot.slane %v2850_v7, 2  ;;  %v5847_v9 = vpop.f32.mrb[138].mxu1  ;;  %v3607_v45 = vpop.f32.mrb[139].mxu0 }
 0x20c   : > { %3241 = vst.msk [vmem:[#allocation3 + $0x40] sm:$0xff] %vm1837_vm5, %v3209_v6  ;;  %3242 = vst.msk [vmem:[#allocation3 + $0x48] sm:$0xff] %vm1837_vm5, %v3210_v57  ;;  %v3056_v14 = vrot.slane %v5847_v9, 2  ;;  %v2853_v43 = vpop.f32.mrb[139].mxu1 }
 0x20d   : > { %v3052_v49 = vsel %vm1692_vm3, %v3050_v48, %v3051_v40  ;;  %v3053_v62 = vrot.slane %v2853_v43, 2 }
 0x20e   : > { %v3147_v28 = vadd.f32 %v3052_v49, %v7140_v59  ;;  %v3057_v1 = vsel %vm1692_vm3, %v3055_v19, %v3056_v14  ;;  %v3182_v19 = vld [vmem:[#allocation3 + $0x68] sm:$0xff] }
 0x20f   : > { %v3149_v54 = vadd.f32 %v3057_v1, %v7145_v30  ;;  %v3054_v33 = vsel %vm1692_vm3, %v3051_v40, %v3053_v62 }
 0x210   : > { %v3211_v50 = vadd.f32 %v3179_v55, %v3147_v28  ;;  %v3148_v4 = vadd.f32 %v3054_v33, %v7152_v63  ;;  %v7305_v23 = vpop.f32.mrb[140].mxu0  ;;  %v3184_v28 = vld [vmem:[#allocation3 + $0x78] sm:$0xff]  ;;  %v3183_v33 = vld [vmem:[#allocation3 + $0x70] sm:$0xff] }
 0x211   : > { %v3213_v27 = vadd.f32 %v3181_v42, %v3149_v54  ;;  %v5850_v2 = vpop.f32.mrb[140].mxu1  ;;  %v3619_v18 = vpop.f32.mrb[141].mxu0 }
 0x212   : > { %3243 = vst.msk [vmem:[#allocation3 + $0x50] sm:$0xff] %vm1837_vm5, %v3211_v50  ;;  %v3212_v59 = vadd.f32 %v3180_v37, %v3148_v4  ;;  %v2866_v41 = vpop.f32.mrb[141].mxu1  ;;  %v5901_v8 = vpop.f32.mrb[142].mxu0  ;;  %v3061_v63 = vrot.slane %v5850_v2, 2 }
 0x213   : > { %3245 = vst.msk [vmem:[#allocation3 + $0x60] sm:$0xff] %vm1837_vm5, %v3213_v27  ;;  %v3058_v30 = vrot.slane %v2866_v41, 2  ;;  %v5851_v15 = vpop.f32.mrb[142].mxu1  ;;  %v7309_v6 = vpop.f32.mrb[143].mxu0 }
 0x214   : > { %3244 = vst.msk [vmem:[#allocation3 + $0x58] sm:$0xff] %vm1837_vm5, %v3212_v59  ;;  %v3063_v57 = vrot.slane %v5851_v15, 2  ;;  %v2869_v7 = vpop.f32.mrb[143].mxu1 }
 0x215   : > { %v3059_v48 = vsel %vm1692_vm3, %v3056_v14, %v3058_v30  ;;  %v3060_v40 = vrot.slane %v2869_v7, 2 }
 0x216   : > { %v3150_v9 = vadd.f32 %v3059_v48, %v7157_v53  ;;  %v3064_v45 = vsel %vm1692_vm3, %v3061_v63, %v3063_v57  ;;  %v3186_v57 = vld [vmem:[#allocation3 + $0x88] sm:$0xff] }
 0x217   : > { %v3152_v43 = vadd.f32 %v3064_v45, %v7162_v38  ;;  %v3062_v49 = vsel %vm1692_vm3, %v3060_v40, %v3061_v63  ;;  %v3185_v63 = vld [vmem:[#allocation3 + $0x80] sm:$0xff] }
 0x218   : > { %v3214_v62 = vadd.f32 %v3182_v19, %v3150_v9  ;;  %v3151_v1 = vadd.f32 %v3062_v49, %v7169_v12  ;;  %v5904_v55 = vpop.f32.mrb[144].mxu0 }
 0x219   : > { %v3216_v54 = vadd.f32 %v3184_v28, %v3152_v43  ;;  %v5854_v50 = vpop.f32.mrb[144].mxu1  ;;  %v7318_v42 = vpop.f32.mrb[145].mxu0 }
 0x21a   : > { %3246 = vst.msk [vmem:[#allocation3 + $0x68] sm:$0xff] %vm1837_vm5, %v3214_v62  ;;  %v3215_v53 = vadd.f32 %v3183_v33, %v3151_v1  ;;  %v2882_v14 = vpop.f32.mrb[145].mxu1  ;;  %v7321_v4 = vpop.f32.mrb[146].mxu0  ;;  %v3068_v37 = vrot.slane %v5854_v50, 2 }
 0x21b   : > { %3248 = vst.msk [vmem:[#allocation3 + $0x78] sm:$0xff] %vm1837_vm5, %v3216_v54  ;;  %v5855_v38 = vpop.f32.mrb[146].mxu1  ;;  %v7324_v27 = vpop.f32.mrb[147].mxu0  ;;  %v3065_v2 = vrot.slane %v2882_v14, 2 }
 0x21c   : > { %3247 = vst.msk [vmem:[#allocation3 + $0x70] sm:$0xff] %vm1837_vm5, %v3215_v53  ;;  %v2885_v12 = vpop.f32.mrb[147].mxu1  ;;  %v3070_v43 = vrot.slane %v5855_v38, 2  ;;  %v3187_v53 = vld [vmem:[#allocation3 + $0x90] sm:$0xff] }
 0x21d   : > { %v3066_v18 = vrot.slane %v2885_v12, 2 }
 0x21f   : > { %v3067_v59 = vsel %vm1692_vm3, %v3065_v2, %v3066_v18  ;;  %v3069_v41 = vsel %vm1692_vm3, %v3066_v18, %v3068_v37  ;;  %v3189_v37 = vld [vmem:[#allocation3 + $0xa0] sm:$0xff] }
 0x220   : > { %v3153_v8 = vadd.f32 %v3067_v59, %v7181_v51  ;;  %v3154_v30 = vadd.f32 %v3069_v41, %v7183_v26  ;;  %v7331_v15 = vpop.f32.mrb[148].mxu0  ;;  %v3188_v41 = vld [vmem:[#allocation3 + $0x98] sm:$0xff] }
 0x221   : > { %v5858_v7 = vpop.f32.mrb[148].mxu1  ;;  %v7333_v48 = vpop.f32.mrb[149].mxu0 }
 0x222   : > { %v3217_v40 = vadd.f32 %v3185_v63, %v3153_v8  ;;  %v3218_v9 = vadd.f32 %v3186_v57, %v3154_v30  ;;  %v2898_v45 = vpop.f32.mrb[149].mxu1  ;;  %v7335_v19 = vpop.f32.mrb[150].mxu0  ;;  %v3075_v51 = vrot.slane %v5858_v7, 2 }
 0x223   : > { %v3071_v49 = vrot.slane %v2898_v45, 2  ;;  %v5859_v62 = vpop.f32.mrb[150].mxu1  ;;  %v3651_v28 = vpop.f32.mrb[151].mxu0 }
 0x224   : > { %3249 = vst.msk [vmem:[#allocation3 + $0x80] sm:$0xff] %vm1837_vm5, %v3217_v40  ;;  %3250 = vst.msk [vmem:[#allocation3 + $0x88] sm:$0xff] %vm1837_vm5, %v3218_v9  ;;  %v3076_v26 = vrot.slane %v5859_v62, 2  ;;  %v2901_v1 = vpop.f32.mrb[151].mxu1 }
 0x225   : > { %v3072_v55 = vsel %vm1692_vm3, %v3070_v43, %v3071_v49  ;;  %v3073_v54 = vrot.slane %v2901_v1, 2 }
 0x226   : > { %v3155_v33 = vadd.f32 %v3072_v55, %v7188_v5  ;;  %v3077_v50 = vsel %vm1692_vm3, %v3075_v51, %v3076_v26  ;;  %v3190_v51 = vld [vmem:[#allocation3 + $0xa8] sm:$0xff] }
 0x227   : > { %v3157_v14 = vadd.f32 %v3077_v50, %v7193_v24  ;;  %v3074_v38 = vsel %vm1692_vm3, %v3071_v49, %v3073_v54 }
 0x228   : > { %v3219_v12 = vadd.f32 %v3187_v53, %v3155_v33  ;;  %v3156_v2 = vadd.f32 %v3074_v38, %v7200_v13  ;;  %v7345_v18 = vpop.f32.mrb[152].mxu0  ;;  %v3192_v33 = vld [vmem:[#allocation3 + $0xb8] sm:$0xff]  ;;  %v3191_v38 = vld [vmem:[#allocation3 + $0xb0] sm:$0xff] }
 0x229   : > { %v3221_v59 = vadd.f32 %v3189_v37, %v3157_v14  ;;  %v5862_v8 = vpop.f32.mrb[152].mxu1  ;;  %v3663_v30 = vpop.f32.mrb[153].mxu0 }
 0x22a   : > { %3251 = vst.msk [vmem:[#allocation3 + $0x90] sm:$0xff] %vm1837_vm5, %v3219_v12  ;;  %v3220_v5 = vadd.f32 %v3188_v41, %v3156_v2  ;;  %v2914_v63 = vpop.f32.mrb[153].mxu1  ;;  %v5913_v57 = vpop.f32.mrb[154].mxu0  ;;  %v3081_v13 = vrot.slane %v5862_v8, 2 }
 0x22b   : > { %3253 = vst.msk [vmem:[#allocation3 + $0xa0] sm:$0xff] %vm1837_vm5, %v3221_v59  ;;  %v3078_v24 = vrot.slane %v2914_v63, 2  ;;  %v5863_v7 = vpop.f32.mrb[154].mxu1  ;;  %v7349_v40 = vpop.f32.mrb[155].mxu0 }
 0x22c   : > { %3252 = vst.msk [vmem:[#allocation3 + $0x98] sm:$0xff] %vm1837_vm5, %v3220_v5  ;;  %v3083_v9 = vrot.slane %v5863_v7, 2  ;;  %v2917_v45 = vpop.f32.mrb[155].mxu1 }
 0x22d   : > { %v3079_v43 = vsel %vm1692_vm3, %v3076_v26, %v3078_v24  ;;  %v3080_v49 = vrot.slane %v2917_v45, 2 }
 0x22e   : > { %v3158_v62 = vadd.f32 %v3079_v43, %v7205_v44  ;;  %v3084_v28 = vsel %vm1692_vm3, %v3081_v13, %v3083_v9  ;;  %v3194_v9 = vld [vmem:[#allocation3 + $0xc8] sm:$0xff] }
 0x22f   : > { %v3160_v1 = vadd.f32 %v3084_v28, %v7210_v17  ;;  %v3082_v55 = vsel %vm1692_vm3, %v3080_v49, %v3081_v13  ;;  %v3193_v13 = vld [vmem:[#allocation3 + $0xc0] sm:$0xff] }
 0x230   : > { %v3222_v54 = vadd.f32 %v3190_v51, %v3158_v62  ;;  %v3159_v50 = vadd.f32 %v3082_v55, %v7215_v47  ;;  %v5916_v53 = vpop.f32.mrb[156].mxu0 }
 0x231   : > { %v3224_v14 = vadd.f32 %v3192_v33, %v3160_v1  ;;  %v5866_v12 = vpop.f32.mrb[156].mxu1  ;;  %v7358_v37 = vpop.f32.mrb[157].mxu0 }
 0x232   : > { %3254 = vst.msk [vmem:[#allocation3 + $0xa8] sm:$0xff] %vm1837_vm5, %v3222_v54  ;;  %v3223_v44 = vadd.f32 %v3191_v38, %v3159_v50  ;;  %v2930_v26 = vpop.f32.mrb[157].mxu1  ;;  %v7361_v2 = vpop.f32.mrb[158].mxu0  ;;  %v3088_v41 = vrot.slane %v5866_v12, 2 }
 0x233   : > { %3256 = vst.msk [vmem:[#allocation3 + $0xb8] sm:$0xff] %vm1837_vm5, %v3224_v14  ;;  %v5867_v17 = vpop.f32.mrb[158].mxu1  ;;  %v7364_v59 = vpop.f32.mrb[159].mxu0  ;;  %v3085_v8 = vrot.slane %v2930_v26, 2 }
 0x234   : > { %3255 = vst.msk [vmem:[#allocation3 + $0xb0] sm:$0xff] %vm1837_vm5, %v3223_v44  ;;  %v2933_v47 = vpop.f32.mrb[159].mxu1  ;;  %v3090_v1 = vrot.slane %v5867_v17, 2  ;;  %v3195_v44 = vld [vmem:[#allocation3 + $0xd0] sm:$0xff] }
 0x235   : > { %v3086_v30 = vrot.slane %v2933_v47, 2 }
 0x237   : > { %v3087_v5 = vsel %vm1692_vm3, %v3085_v8, %v3086_v30  ;;  %v3089_v63 = vsel %vm1692_vm3, %v3086_v30, %v3088_v41  ;;  %v3197_v41 = vld [vmem:[#allocation3 + $0xe0] sm:$0xff] }
 0x238   : > { %v3161_v57 = vadd.f32 %v3087_v5, %v7219_v35  ;;  %v3162_v24 = vadd.f32 %v3089_v63, %v7221_v36  ;;  %v7371_v7 = vpop.f32.mrb[160].mxu0  ;;  %v3196_v63 = vld [vmem:[#allocation3 + $0xd8] sm:$0xff] }
 0x239   : > { %v5870_v45 = vpop.f32.mrb[160].mxu1  ;;  %v7373_v43 = vpop.f32.mrb[161].mxu0 }
 0x23a   : > { %v3225_v49 = vadd.f32 %v3193_v13, %v3161_v57  ;;  %v3226_v62 = vadd.f32 %v3194_v9, %v3162_v24  ;;  %v2946_v28 = vpop.f32.mrb[161].mxu1  ;;  %v7375_v51 = vpop.f32.mrb[162].mxu0  ;;  %v3095_v35 = vrot.slane %v5870_v45, 2 }
 0x23b   : > { %v3091_v55 = vrot.slane %v2946_v28, 2  ;;  %v5871_v54 = vpop.f32.mrb[162].mxu1  ;;  %v3695_v33 = vpop.f32.mrb[163].mxu0 }
 0x23c   : > { %3257 = vst.msk [vmem:[#allocation3 + $0xc0] sm:$0xff] %vm1837_vm5, %v3225_v49  ;;  %3258 = vst.msk [vmem:[#allocation3 + $0xc8] sm:$0xff] %vm1837_vm5, %v3226_v62  ;;  %v3096_v36 = vrot.slane %v5871_v54, 2  ;;  %v2949_v50 = vpop.f32.mrb[163].mxu1 }
 0x23d   : > { %v3092_v53 = vsel %vm1692_vm3, %v3090_v1, %v3091_v55  ;;  %v3093_v14 = vrot.slane %v2949_v50, 2 }
 0x23e   : > { %v3163_v38 = vadd.f32 %v3092_v53, %v7224_v34  ;;  %v3097_v12 = vsel %vm1692_vm3, %v3095_v35, %v3096_v36  ;;  %v3198_v35 = vld [vmem:[#allocation3 + $0xe8] sm:$0xff] }
 0x23f   : > { %v3165_v26 = vadd.f32 %v3097_v12, %v7227_v29  ;;  %v3094_v17 = vsel %vm1692_vm3, %v3091_v55, %v3093_v14 }
 0x240   : > { %v3227_v47 = vadd.f32 %v3195_v44, %v3163_v38  ;;  %v3164_v8 = vadd.f32 %v3094_v17, %v7230_v39  ;;  %v7385_v30 = vpop.f32.mrb[164].mxu0  ;;  %v3200_v38 = vld [vmem:[#allocation3 + $0xf8] sm:$0xff]  ;;  %v3199_v17 = vld [vmem:[#allocation3 + $0xf0] sm:$0xff] }
 0x241   : > { %v3229_v5 = vadd.f32 %v3197_v41, %v3165_v26  ;;  %v5874_v57 = vpop.f32.mrb[164].mxu1  ;;  %v3707_v24 = vpop.f32.mrb[165].mxu0 }
 0x242   : > { %3259 = vst.msk [vmem:[#allocation3 + $0xd0] sm:$0xff] %vm1837_vm5, %v3227_v47  ;;  %v3228_v34 = vadd.f32 %v3196_v63, %v3164_v8  ;;  %v2962_v13 = vpop.f32.mrb[165].mxu1  ;;  %v5925_v9 = vpop.f32.mrb[166].mxu0  ;;  %v3101_v39 = vrot.slane %v5874_v57, 2 }
 0x243   : > { %3261 = vst.msk [vmem:[#allocation3 + $0xe0] sm:$0xff] %vm1837_vm5, %v3229_v5  ;;  %v3098_v29 = vrot.slane %v2962_v13, 2  ;;  %v5875_v45 = vpop.f32.mrb[166].mxu1  ;;  %v7389_v49 = vpop.f32.mrb[167].mxu0 }
 0x244   : > { %3260 = vst.msk [vmem:[#allocation3 + $0xd8] sm:$0xff] %vm1837_vm5, %v3228_v34  ;;  %v3103_v62 = vrot.slane %v5875_v45, 2  ;;  %v2965_v28 = vpop.f32.mrb[167].mxu1 }
 0x245   : > { %v3099_v1 = vsel %vm1692_vm3, %v3096_v36, %v3098_v29  ;;  %v3100_v55 = vrot.slane %v2965_v28, 2 }
 0x246   : > { %v3166_v54 = vadd.f32 %v3099_v1, %v7233_v10  ;;  %v3104_v33 = vsel %vm1692_vm3, %v3101_v39, %v3103_v62 }
 0x247   : > { %v3168_v50 = vadd.f32 %v3104_v33, %v7236_v56  ;;  %v3102_v53 = vsel %vm1692_vm3, %v3100_v55, %v3101_v39 }
 0x248   : > { %v3230_v14 = vadd.f32 %v3198_v35, %v3166_v54  ;;  %v3167_v12 = vadd.f32 %v3102_v53, %v7239_v0  ;;  %v5980_v44 = vpop.f32.mrb[168].mxu0 }
 0x249   : > { %v3232_v26 = vadd.f32 %v3200_v38, %v3168_v50  ;;  %v5930_v47 = vpop.f32.mrb[168].mxu1  ;;  %v4181_v41 = vpop.f32.mrb[169].mxu0  ;;  %v4423_v10 = vrot.slane %v5980_v44, 2  ;;  %v4564_v38 = vld [vmem:[#allocation3] sm:$0xff] }
 0x24a   : > { %3262 = vst.msk [vmem:[#allocation3 + $0xe8] sm:$0xff] %vm1837_vm5, %v3230_v14  ;;  %v3231_v36 = vadd.f32 %v3199_v17, %v3167_v12  ;;  %v3759_v8 = vpop.f32.mrb[169].mxu1  ;;  %v4420_v5 = vrot.slane %v4181_v41, 2  ;;  %v5981_v63 = vpop.f32.mrb[170].mxu0  ;;  %v4001_v34 = vrot.slane %v5930_v47, 1  ;;  %v4565_v12 = vld [vmem:[#allocation3 + $0x8] sm:$0xff] }
 0x24b   : > { %3264 = vst.msk [vmem:[#allocation3 + $0xf8] sm:$0xff] %vm1837_vm5, %v3232_v26  ;;  %v5931_v56 = vpop.f32.mrb[170].mxu1  ;;  %v4184_v57 = vpop.f32.mrb[171].mxu0  ;;  %v3998_v13 = vrot.slane %v3759_v8, 1  ;;  %v4425_v50 = vrot.slane %v5981_v63, 2 }
 0x24c   : > { %3263 = vst.msk [vmem:[#allocation3 + $0xf0] sm:$0xff] %vm1837_vm5, %v3231_v36  ;;  %v3762_v24 = vpop.f32.mrb[171].mxu1  ;;  %v4421_v0 = vrot.slane %v4184_v57, 2  ;;  %v4003_v47 = vrot.slane %v5931_v56, 1 }
 0x24d   : > { %v3999_v9 = vrot.slane %v3762_v24, 1 }
 0x24e   : > { %v4422_v29 = vsel %vm1692_vm3, %v4420_v5, %v4421_v0  ;;  %v4424_v45 = vsel %vm1692_vm3, %v4421_v0, %v4423_v10 }
 0x24f   : > { %v4000_v39 = vsel %vm1269_vm4, %v3998_v13, %v3999_v9  ;;  %v4002_v62 = vsel %vm1269_vm4, %v3999_v9, %v4001_v34 }
 0x250   : > { %v4110_v28 = vadd.f32 %v4000_v39, %v7241_v46  ;;  %v4111_v1 = vadd.f32 %v4002_v62, %v7245_v60  ;;  %v5984_v55 = vpop.f32.mrb[172].mxu0 }
 0x251   : > { %v5934_v54 = vpop.f32.mrb[172].mxu1  ;;  %v4430_v33 = vrot.slane %v5984_v55, 2  ;;  %v4197_v35 = vpop.f32.mrb[173].mxu0 }
 0x252   : > { %v4532_v53 = vadd.f32 %v4422_v29, %v4110_v28  ;;  %v4533_v14 = vadd.f32 %v4424_v45, %v4111_v1  ;;  %v3775_v44 = vpop.f32.mrb[173].mxu1  ;;  %v4426_v26 = vrot.slane %v4197_v35, 2  ;;  %v5985_v17 = vpop.f32.mrb[174].mxu0  ;;  %v4008_v41 = vrot.slane %v5934_v54, 1  ;;  %v4566_v54 = vld [vmem:[#allocation3 + $0x10] sm:$0xff] }
 0x253   : > { %v4004_v36 = vrot.slane %v3775_v44, 1  ;;  %v5935_v10 = vpop.f32.mrb[174].mxu1  ;;  %v4431_v8 = vrot.slane %v5985_v17, 2  ;;  %v4200_v46 = vpop.f32.mrb[175].mxu0 }
 0x254   : > { %v4596_v5 = vadd.f32 %v4564_v38, %v4532_v53  ;;  %v4597_v60 = vadd.f32 %v4565_v12, %v4533_v14  ;;  %v4427_v57 = vsel %vm1692_vm3, %v4425_v50, %v4426_v26  ;;  %v4009_v24 = vrot.slane %v5935_v10, 1  ;;  %v3778_v0 = vpop.f32.mrb[175].mxu1 }
 0x255   : > { %v4005_v63 = vsel %vm1269_vm4, %v4003_v47, %v4004_v36  ;;  %v4432_v34 = vsel %vm1692_vm3, %v4430_v33, %v4431_v8  ;;  %v4006_v13 = vrot.slane %v3778_v0, 1  ;;  %v4428_v9 = vrot.slane %v4200_v46, 2  ;;  %v4567_v47 = vld [vmem:[#allocation3 + $0x18] sm:$0xff] }
 0x256   : > { %4628 = vst.msk [vmem:[#allocation3] sm:$0xff] %vm1837_vm5, %v4596_v5  ;;  %4629 = vst.msk [vmem:[#allocation3 + $0x8] sm:$0xff] %vm1837_vm5, %v4597_v60  ;;  %v4112_v56 = vadd.f32 %v7243_v25, %v4005_v63  ;;  %v4010_v29 = vsel %vm1269_vm4, %v4008_v41, %v4009_v24  ;;  %v7421_v25 = vld [vmem:[%s7831_s4] ss:$0 sm:$0xff] }
 0x257   : > { %v4114_v45 = vadd.f32 %v7251_v32, %v4010_v29  ;;  %v4007_v39 = vsel %vm1269_vm4, %v4004_v36, %v4006_v13  ;;  %v4429_v62 = vsel %vm1692_vm3, %v4426_v26, %v4428_v9  ;;  %v4568_v32 = vld [vmem:[#allocation3 + $0x20] sm:$0xff]  ;;  %v7428_v9 = vld [vmem:[%s7832_s5] ss:$0 sm:$0xff] }
 0x258   : > { %v4534_v28 = vadd.f32 %v4427_v57, %v4112_v56  ;;  %v4113_v1 = vadd.f32 %v4007_v39, %v7253_v58  ;;  %v5988_v55 = vpop.f32.mrb[176].mxu0 }
 0x259   : > { %v4536_v33 = vadd.f32 %v4432_v34, %v4114_v45  ;;  %v5938_v35 = vpop.f32.mrb[176].mxu1  ;;  %v4436_v50 = vrot.slane %v5988_v55, 2  ;;  %v4213_v53 = vpop.f32.mrb[177].mxu0 }
 0x25a   : > { %v4598_v14 = vadd.f32 %v4566_v54, %v4534_v28  ;;  %v4535_v38 = vadd.f32 %v4429_v62, %v4113_v1  ;;  %v3791_v12 = vpop.f32.mrb[177].mxu1  ;;  %v4433_v44 = vrot.slane %v4213_v53, 2  ;;  %v5989_v26 = vpop.f32.mrb[178].mxu0  ;;  %v4014_v58 = vrot.slane %v5938_v35, 1 }
 0x25b   : > { %v4600_v17 = vadd.f32 %v4568_v32, %v4536_v33  ;;  %v4011_v41 = vrot.slane %v3791_v12, 1  ;;  %v5939_v36 = vpop.f32.mrb[178].mxu1  ;;  %v4438_v10 = vrot.slane %v5989_v26, 2  ;;  %v4216_v46 = vpop.f32.mrb[179].mxu0  ;;  %v4569_v32 = vld [vmem:[#allocation3 + $0x28] sm:$0xff] }
 0x25c   : > { %4630 = vst.msk [vmem:[#allocation3 + $0x10] sm:$0xff] %vm1837_vm5, %v4598_v14  ;;  %v4599_v5 = vadd.f32 %v4567_v47, %v4535_v38  ;;  %v4434_v60 = vsel %vm1692_vm3, %v4431_v8, %v4433_v44  ;;  %v4016_v57 = vrot.slane %v5939_v36, 1  ;;  %v3794_v0 = vpop.f32.mrb[179].mxu1  ;;  %v4435_v63 = vrot.slane %v4216_v46, 2  ;;  %v4571_v38 = vld [vmem:[#allocation3 + $0x38] sm:$0xff] }
 0x25d   : > { %v4660_v34 = vld [vmem:[#allocation3] sm:$0xff]  ;;  %v4661_v13 = vld [vmem:[#allocation3 + $0x8] sm:$0xff]  ;;  %4632 = vst.msk [vmem:[#allocation3 + $0x20] sm:$0xff] %vm1837_vm5, %v4600_v17  ;;  %v4012_v56 = vsel %vm1269_vm4, %v4009_v24, %v4011_v41  ;;  %v4439_v29 = vsel %vm1692_vm3, %v4436_v50, %v4438_v10  ;;  %v4013_v45 = vrot.slane %v3794_v0, 1 }
 0x25e   : > { %v4699_v8 = vmul.f32 %v7421_v25, %v4660_v34  ;;  %v4700_v39 = vmul.f32 %v7421_v25, %v4661_v13  ;;  %4631 = vst.msk [vmem:[#allocation3 + $0x18] sm:$0xff] %vm1837_vm5, %v4599_v5  ;;  %v4115_v62 = vadd.f32 %v7255_v20, %v4012_v56  ;;  %v4017_v28 = vsel %vm1269_vm4, %v4014_v58, %v4016_v57 }
 0x25f   : > { %v4117_v1 = vadd.f32 %v7265_v52, %v4017_v28  ;;  %v4015_v55 = vsel %vm1269_vm4, %v4013_v45, %v4014_v58  ;;  %v4437_v24 = vsel %vm1692_vm3, %v4435_v63, %v4436_v50 }
 0x260   : > { %v4738_v54 = vadd.f32 %v7428_v9, %v4699_v8  ;;  %v4739_v33 = vadd.f32 %v7428_v9, %v4700_v39  ;;  %v4537_v35 = vadd.f32 %v4434_v60, %v4115_v62  ;;  %v4116_v53 = vadd.f32 %v4015_v55, %v7269_v3  ;;  %v7445_v14 = vpop.f32.mrb[180].mxu0  ;;  %v4570_v60 = vld [vmem:[#allocation3 + $0x30] sm:$0xff] }
 0x261   : > { %v4539_v20 = vadd.f32 %v4439_v29, %v4117_v1  ;;  %v5942_v12 = vpop.f32.mrb[180].mxu1  ;;  %v4229_v44 = vpop.f32.mrb[181].mxu0  ;;  %v4443_v57 = vrot.slane %v7445_v14, 2 }
 0x262   : > { %vm4770_vm6 = vcmp.ge.f32.partialorder %v4738_v54, 0.0  ;;  %vm4771_vm7 = vcmp.ge.f32.partialorder %v4739_v33, 0.0  ;;  %v4802_v52 = vmul.f32 0.2, %v4738_v54  ;;  %v4803_v50 = vmul.f32 0.2, %v4739_v33 }
 0x263   : > { %v4662_v26 = vld [vmem:[#allocation3 + $0x10] sm:$0xff]  ;;  %v4601_v3 = vadd.f32 %v4569_v32, %v4537_v35  ;;  %v4603_v17 = vadd.f32 %v4571_v38, %v4539_v20  ;;  %v4538_v47 = vadd.f32 %v4437_v24, %v4116_v53  ;;  %v3807_v58 = vpop.f32.mrb[181].mxu1  ;;  %v7452_v41 = vpop.f32.mrb[182].mxu0  ;;  %v4021_v29 = vrot.slane %v5942_v12, 1 }
 0x264   : > { %v4834_v36 = vsel %vm4770_vm6, %v4738_v54, %v4802_v52  ;;  %v4835_v10 = vsel %vm4771_vm7, %v4739_v33, %v4803_v50  ;;  %v4701_v46 = vmul.f32 %v7421_v25, %v4662_v26  ;;  %v4664_v5 = vld [vmem:[#allocation3 + $0x20] sm:$0xff]  ;;  %v7456_v0 = vpop.f32.mrb[182].mxu1  ;;  %v4232_v63 = vpop.f32.mrb[183].mxu0  ;;  %v4018_v45 = vrot.slane %v3807_v58, 1 }
 0x265   : > { %4866 = vst.msk [vmem:[%s7450_s17] sm:$0xff] %vm1837_vm5, %v4834_v36  ;;  %4867 = vst.msk [vmem:[%s7450_s17 + $0x8] sm:$0xff] %vm1837_vm5, %v4835_v10  ;;  %v4703_v34 = vmul.f32 %v7421_v25, %v4664_v5  ;;  %v4663_v13 = vld [vmem:[#allocation3 + $0x18] sm:$0xff]  ;;  %v4602_v56 = vadd.f32 %v4570_v60, %v4538_v47  ;;  %v3810_v8 = vpop.f32.mrb[183].mxu1  ;;  %v4440_v28 = vrot.slane %v4229_v44, 2  ;;  %v4023_v24 = vrot.slane %v7456_v0, 1 }
 0x266   : > { %4633 = vst.msk [vmem:[#allocation3 + $0x28] sm:$0xff] %vm1837_vm5, %v4601_v3  ;;  %4635 = vst.msk [vmem:[#allocation3 + $0x38] sm:$0xff] %vm1837_vm5, %v4603_v17  ;;  %v4740_v39 = vadd.f32 %v7428_v9, %v4701_v46  ;;  %v4702_v62 = vmul.f32 %v7421_v25, %v4663_v13  ;;  %v4019_v1 = vrot.slane %v3810_v8, 1  ;;  %v4445_v54 = vrot.slane %v7452_v41, 2 }
 0x267   : > { %v4742_v55 = vadd.f32 %v7428_v9, %v4703_v34  ;;  %4634 = vst.msk [vmem:[#allocation3 + $0x30] sm:$0xff] %vm1837_vm5, %v4602_v56  ;;  %v4441_v33 = vrot.slane %v4232_v63, 2 }
 0x268   : > { %vm4772_vm8 = vcmp.ge.f32.partialorder %v4740_v39, 0.0  ;;  %v4804_v35 = vmul.f32 0.2, %v4740_v39  ;;  %v4741_v53 = vadd.f32 %v7428_v9, %v4702_v62  ;;  %v4020_v14 = vsel %vm1269_vm4, %v4018_v45, %v4019_v1  ;;  %v5996_v32 = vpop.f32.mrb[184].mxu0  ;;  %v4573_v45 = vld [vmem:[#allocation3 + $0x48] sm:$0xff] }
 0x269   : > { %vm4774_vm9 = vcmp.ge.f32.partialorder %v4742_v55, 0.0  ;;  %v4806_v20 = vmul.f32 0.2, %v4742_v55  ;;  %v4022_v38 = vsel %vm1269_vm4, %v4019_v1, %v4021_v29  ;;  %v4118_v12 = vadd.f32 %v4020_v14, %v7278_v21  ;;  %v5946_v44 = vpop.f32.mrb[184].mxu1  ;;  %v7475_v52 = vpop.f32.mrb[185].mxu0 }
 0x26a   : > { %v4836_v50 = vsel %vm4772_vm8, %v4740_v39, %v4804_v35  ;;  %vm4773_vm10 = vcmp.ge.f32.partialorder %v4741_v53, 0.0  ;;  %v4805_v26 = vmul.f32 0.2, %v4741_v53  ;;  %v4119_v3 = vadd.f32 %v4022_v38, %v7284_v31  ;;  %v7478_v17 = vpop.f32.mrb[185].mxu1  ;;  %v7480_v47 = vpop.f32.mrb[186].mxu0 }
 0x26b   : > { %4868 = vst.msk [vmem:[%s7450_s17 + $0x10] sm:$0xff] %vm1837_vm5, %v4836_v50  ;;  %v4838_v58 = vsel %vm4774_vm9, %v4742_v55, %v4806_v20  ;;  %v4442_v41 = vsel %vm1692_vm3, %v4440_v28, %v4441_v33  ;;  %v4444_v21 = vsel %vm1692_vm3, %v4441_v33, %v4443_v57  ;;  %v4028_v36 = vrot.slane %v5946_v44, 1  ;;  %v7486_v10 = vpop.f32.mrb[186].mxu1  ;;  %v4248_v46 = vpop.f32.mrb[187].mxu0  ;;  %v4572_v57 = vld [vmem:[#allocation3 + $0x40] sm:$0xff] }
 0x26c   : > { %4870 = vst.msk [vmem:[%s7450_s17 + $0x20] sm:$0xff] %vm1837_vm5, %v4838_v58  ;;  %v4837_v5 = vsel %vm4773_vm10, %v4741_v53, %v4805_v26  ;;  %v4540_v0 = vadd.f32 %v4442_v41, %v4118_v12  ;;  %v4541_v63 = vadd.f32 %v4444_v21, %v4119_v3  ;;  %v4450_v34 = vrot.slane %v5996_v32, 2  ;;  %v3826_v13 = vpop.f32.mrb[187].mxu1 }
 0x26d   : > { %v4665_v31 = vld [vmem:[#allocation3 + $0x28] sm:$0xff]  ;;  %v4667_v60 = vld [vmem:[#allocation3 + $0x38] sm:$0xff]  ;;  %4869 = vst.msk [vmem:[%s7450_s17 + $0x18] sm:$0xff] %vm1837_vm5, %v4837_v5  ;;  %v4024_v8 = vrot.slane %v7478_v17, 1  ;;  %v4446_v39 = vrot.slane %v7475_v52, 2  ;;  %v4029_v55 = vrot.slane %v7486_v10, 1 }
 0x26e   : > { %v4704_v56 = vmul.f32 %v7421_v25, %v4665_v31  ;;  %v4706_v29 = vmul.f32 %v7421_v25, %v4667_v60  ;;  %v4666_v62 = vld [vmem:[#allocation3 + $0x30] sm:$0xff]  ;;  %v4604_v28 = vadd.f32 %v4572_v57, %v4540_v0  ;;  %v4605_v1 = vadd.f32 %v4573_v45, %v4541_v63 }
 0x26f   : > { %v4451_v33 = vrot.slane %v7480_v47, 2  ;;  %v4705_v14 = vmul.f32 %v7421_v25, %v4666_v62  ;;  %v4025_v32 = vsel %vm1269_vm4, %v4023_v24, %v4024_v8  ;;  %v4447_v38 = vsel %vm1692_vm3, %v4445_v54, %v4446_v39  ;;  %v4577_v47 = vld [vmem:[#allocation3 + $0x68] sm:$0xff] }
 0x270   : > { %v4743_v35 = vadd.f32 %v7428_v9, %v4704_v56  ;;  %v4745_v53 = vadd.f32 %v7428_v9, %v4706_v29  ;;  %4636 = vst.msk [vmem:[#allocation3 + $0x40] sm:$0xff] %vm1837_vm5, %v4604_v28  ;;  %4637 = vst.msk [vmem:[#allocation3 + $0x48] sm:$0xff] %vm1837_vm5, %v4605_v1  ;;  %v4120_v20 = vadd.f32 %v7281_v22, %v4025_v32  ;;  %v7510_v52 = vpop.f32.mrb[188].mxu0  ;;  %v4026_v54 = vrot.slane %v3826_v13, 1  ;;  %v4576_v56 = vld [vmem:[#allocation3 + $0x60] sm:$0xff] }
 0x271   : > { %v4030_v12 = vsel %vm1269_vm4, %v4028_v36, %v4029_v55  ;;  %v4452_v44 = vsel %vm1692_vm3, %v4450_v34, %v4451_v33  ;;  %v4744_v26 = vadd.f32 %v7428_v9, %v4705_v14  ;;  %v5950_v17 = vpop.f32.mrb[188].mxu1  ;;  %v4261_v58 = vpop.f32.mrb[189].mxu0  ;;  %v4574_v36 = vld [vmem:[#allocation3 + $0x50] sm:$0xff]  ;;  %v4448_v10 = vrot.slane %v4248_v46, 2 }
 0x272   : > { %vm4775_vm11 = vcmp.ge.f32.partialorder %v4743_v35, 0.0  ;;  %v4807_v50 = vmul.f32 0.2, %v4743_v35  ;;  %vm4777_vm12 = vcmp.ge.f32.partialorder %v4745_v53, 0.0  ;;  %v4809_v24 = vmul.f32 0.2, %v4745_v53 }
 0x273   : > { %v4542_v3 = vadd.f32 %v4447_v38, %v4120_v20  ;;  %v4122_v22 = vadd.f32 %v7291_v61, %v4030_v12  ;;  %v4034_v5 = vrot.slane %v5950_v17, 1  ;;  %v3839_v31 = vpop.f32.mrb[189].mxu1  ;;  %v6001_v60 = vpop.f32.mrb[190].mxu0  ;;  %vm4776_vm13 = vcmp.ge.f32.partialorder %v4744_v26, 0.0 }
 0x274   : > { %v4839_v41 = vsel %vm4775_vm11, %v4743_v35, %v4807_v50  ;;  %v4841_v21 = vsel %vm4777_vm12, %v4745_v53, %v4809_v24  ;;  %v4808_v0 = vmul.f32 0.2, %v4744_v26  ;;  %v5951_v61 = vpop.f32.mrb[190].mxu1  ;;  %v4264_v13 = vpop.f32.mrb[191].mxu0  ;;  %v4027_v29 = vsel %vm1269_vm4, %v4024_v8, %v4026_v54  ;;  %v4575_v24 = vld [vmem:[#allocation3 + $0x58] sm:$0xff] }
 0x275   : > { %4871 = vst.msk [vmem:[%s7450_s17 + $0x28] sm:$0xff] %vm1837_vm5, %v4839_v41  ;;  %4873 = vst.msk [vmem:[%s7450_s17 + $0x38] sm:$0xff] %vm1837_vm5, %v4841_v21  ;;  %v4606_v63 = vadd.f32 %v4574_v36, %v4542_v3  ;;  %v4544_v34 = vadd.f32 %v4452_v44, %v4122_v22  ;;  %v4449_v57 = vsel %vm1692_vm3, %v4446_v39, %v4448_v10  ;;  %v4456_v46 = vrot.slane %v7510_v52, 2  ;;  %v3842_v62 = vpop.f32.mrb[191].mxu1 }
 0x276   : > { %v4031_v45 = vrot.slane %v3839_v31, 1  ;;  %v4840_v28 = vsel %vm4776_vm13, %v4744_v26, %v4808_v0  ;;  %v4121_v35 = vadd.f32 %v4027_v29, %v7293_v16  ;;  %v4453_v53 = vrot.slane %v4261_v58, 2 }
 0x277   : > { %4638 = vst.msk [vmem:[#allocation3 + $0x50] sm:$0xff] %vm1837_vm5, %v4606_v63  ;;  %v4608_v1 = vadd.f32 %v4576_v56, %v4544_v34  ;;  %4872 = vst.msk [vmem:[%s7450_s17 + $0x30] sm:$0xff] %vm1837_vm5, %v4840_v28  ;;  %v4668_v14 = vld [vmem:[#allocation3 + $0x40] sm:$0xff]  ;;  %v4669_v32 = vld [vmem:[#allocation3 + $0x48] sm:$0xff]  ;;  %v4036_v8 = vrot.slane %v5951_v61, 1  ;;  %v4458_v38 = vrot.slane %v6001_v60, 2 }
 0x278   : > { %v4032_v20 = vsel %vm1269_vm4, %v4029_v55, %v4031_v45  ;;  %v4033_v39 = vrot.slane %v3842_v62, 1  ;;  %v4707_v12 = vmul.f32 %v7421_v25, %v4668_v14  ;;  %v4708_v44 = vmul.f32 %v7421_v25, %v4669_v32  ;;  %v7530_v16 = vpop.f32.mrb[192].mxu0  ;;  %v4579_v28 = vld [vmem:[#allocation3 + $0x78] sm:$0xff]  ;;  %v4578_v14 = vld [vmem:[#allocation3 + $0x70] sm:$0xff] }
 0x279   : > { %4640 = vst.msk [vmem:[#allocation3 + $0x60] sm:$0xff] %vm1837_vm5, %v4608_v1  ;;  %v4543_v52 = vadd.f32 %v4449_v57, %v4121_v35  ;;  %v4123_v50 = vadd.f32 %v7295_v11, %v4032_v20  ;;  %v4454_v26 = vsel %vm1692_vm3, %v4451_v33, %v4453_v53  ;;  %v4037_v55 = vsel %vm1269_vm4, %v4034_v5, %v4036_v8  ;;  %v5954_v54 = vpop.f32.mrb[192].mxu1  ;;  %v4277_v17 = vpop.f32.mrb[193].mxu0 }
 0x27a   : > { %v4459_v3 = vsel %vm1692_vm3, %v4456_v46, %v4458_v38  ;;  %v4035_v22 = vsel %vm1269_vm4, %v4033_v39, %v4034_v5  ;;  %v4746_v58 = vadd.f32 %v7428_v9, %v4707_v12  ;;  %v4747_v41 = vadd.f32 %v7428_v9, %v4708_v44  ;;  %v3855_v36 = vpop.f32.mrb[193].mxu1  ;;  %v7540_v10 = vpop.f32.mrb[194].mxu0 }
 0x27b   : > { %v4607_v11 = vadd.f32 %v4575_v24, %v4543_v52  ;;  %v4545_v21 = vadd.f32 %v4454_v26, %v4123_v50  ;;  %v4125_v33 = vadd.f32 %v7305_v23, %v4037_v55  ;;  %v4124_v31 = vadd.f32 %v4035_v22, %v7309_v6  ;;  %v7544_v0 = vpop.f32.mrb[194].mxu1  ;;  %v4280_v5 = vpop.f32.mrb[195].mxu0 }
 0x27c   : > { %v4455_v60 = vrot.slane %v4264_v13, 2  ;;  %vm4778_vm14 = vcmp.ge.f32.partialorder %v4746_v58, 0.0  ;;  %vm4779_vm15 = vcmp.ge.f32.partialorder %v4747_v41, 0.0  ;;  %v4810_v63 = vmul.f32 0.2, %v4746_v58  ;;  %v3858_v45 = vpop.f32.mrb[195].mxu1 }
 0x27d   : > { %v4811_v34 = vmul.f32 0.2, %v4747_v41  ;;  %4639 = vst.msk [vmem:[#allocation3 + $0x58] sm:$0xff] %vm1837_vm5, %v4607_v11  ;;  %v4609_v56 = vadd.f32 %v4577_v47, %v4545_v21  ;;  %v4547_v29 = vadd.f32 %v4459_v3, %v4125_v33  ;;  %v4041_v23 = vrot.slane %v5954_v54, 1 }
 0x27e   : > { %v4670_v61 = vld [vmem:[#allocation3 + $0x50] sm:$0xff]  ;;  %v4457_v57 = vsel %vm1692_vm3, %v4455_v60, %v4456_v46  ;;  %v4842_v6 = vsel %vm4778_vm14, %v4746_v58, %v4810_v63  ;;  %v4463_v32 = vrot.slane %v7530_v16, 2  ;;  %v4038_v46 = vrot.slane %v3855_v36, 1 }
 0x27f   : > { %v4843_v13 = vsel %vm4779_vm15, %v4747_v41, %v4811_v34  ;;  %v4709_v62 = vmul.f32 %v7421_v25, %v4670_v61  ;;  %v4546_v1 = vadd.f32 %v4457_v57, %v4124_v31  ;;  %4874 = vst.msk [vmem:[%s7450_s17 + $0x40] sm:$0xff] %vm1837_vm5, %v4842_v6  ;;  %4641 = vst.msk [vmem:[#allocation3 + $0x68] sm:$0xff] %vm1837_vm5, %v4609_v56  ;;  %v4460_v20 = vrot.slane %v4277_v17, 2 }
 0x280   : > { %4875 = vst.msk [vmem:[%s7450_s17 + $0x48] sm:$0xff] %vm1837_vm5, %v4843_v13  ;;  %v4672_v35 = vld [vmem:[#allocation3 + $0x60] sm:$0xff]  ;;  %v4611_v53 = vadd.f32 %v4579_v28, %v4547_v29  ;;  %v4043_v12 = vrot.slane %v7544_v0, 1  ;;  %v7558_v44 = vpop.f32.mrb[196].mxu0  ;;  %v4465_v52 = vrot.slane %v7540_v10, 2  ;;  %v4039_v50 = vrot.slane %v3858_v45, 1 }
 0x281   : > { %v4748_v8 = vadd.f32 %v7428_v9, %v4709_v62  ;;  %v4711_v38 = vmul.f32 %v7421_v25, %v4672_v35  ;;  %v4610_v39 = vadd.f32 %v4578_v14, %v4546_v1  ;;  %v4461_v24 = vrot.slane %v4280_v5, 2  ;;  %v5958_v26 = vpop.f32.mrb[196].mxu1  ;;  %v7563_v55 = vpop.f32.mrb[197].mxu0  ;;  %v4580_v28 = vld [vmem:[#allocation3 + $0x80] sm:$0xff] }
 0x282   : > { %4643 = vst.msk [vmem:[#allocation3 + $0x78] sm:$0xff] %vm1837_vm5, %v4611_v53  ;;  %v4470_v16 = vrot.slane %v7558_v44, 2  ;;  %v4048_v54 = vrot.slane %v5958_v26, 1  ;;  %v7567_v17 = vpop.f32.mrb[197].mxu1  ;;  %v7569_v58 = vpop.f32.mrb[198].mxu0  ;;  %v4040_v11 = vsel %vm1269_vm4, %v4038_v46, %v4039_v50  ;;  %v4042_v21 = vsel %vm1269_vm4, %v4039_v50, %v4041_v23  ;;  %v4581_v53 = vld [vmem:[#allocation3 + $0x88] sm:$0xff] }
 0x283   : > { %vm4780_vm0 = vcmp.ge.f32.partialorder %v4748_v8, 0.0  ;;  %v4812_v3 = vmul.f32 0.2, %v4748_v8  ;;  %v4750_v22 = vadd.f32 %v7428_v9, %v4711_v38  ;;  %4642 = vst.msk [vmem:[#allocation3 + $0x70] sm:$0xff] %vm1837_vm5, %v4610_v39  ;;  %v4462_v36 = vsel %vm1692_vm3, %v4460_v20, %v4461_v24  ;;  %v7575_v47 = vpop.f32.mrb[198].mxu1  ;;  %v7577_v33 = vpop.f32.mrb[199].mxu0 }
 0x284   : > { %v4671_v41 = vld [vmem:[#allocation3 + $0x58] sm:$0xff]  ;;  %v4464_v10 = vsel %vm1692_vm3, %v4461_v24, %v4463_v32  ;;  %v7580_v5 = vpop.f32.mrb[199].mxu1  ;;  %v4126_v63 = vadd.f32 %v4040_v11, %v7318_v42  ;;  %v4127_v34 = vadd.f32 %v4042_v21, %v7324_v27  ;;  %v4044_v61 = vrot.slane %v7567_v17, 1  ;;  %v4582_v21 = vld [vmem:[#allocation3 + $0x90] sm:$0xff] }
 0x285   : > { %v4844_v31 = vsel %vm4780_vm0, %v4748_v8, %v4812_v3  ;;  %vm4782_vm1 = vcmp.ge.f32.partialorder %v4750_v22, 0.0  ;;  %v4814_v60 = vmul.f32 0.2, %v4750_v22  ;;  %v4710_v0 = vmul.f32 %v7421_v25, %v4671_v41 }
 0x286   : > { %4876 = vst.msk [vmem:[%s7450_s17 + $0x50] sm:$0xff] %vm1837_vm5, %v4844_v31  ;;  %v4466_v56 = vrot.slane %v7563_v55, 2  ;;  %v4673_v23 = vld [vmem:[#allocation3 + $0x68] sm:$0xff]  ;;  %v4049_v45 = vrot.slane %v7575_v47, 1  ;;  %v4471_v6 = vrot.slane %v7569_v58, 2  ;;  %v4548_v62 = vadd.f32 %v4462_v36, %v4126_v63 }
 0x287   : > { %v4846_v29 = vsel %vm4782_vm1, %v4750_v22, %v4814_v60  ;;  %v4749_v57 = vadd.f32 %v7428_v9, %v4710_v0  ;;  %v4712_v13 = vmul.f32 %v7421_v25, %v4673_v23  ;;  %v4549_v42 = vadd.f32 %v4464_v10, %v4127_v34 }
 0x288   : > { %4878 = vst.msk [vmem:[%s7450_s17 + $0x60] sm:$0xff] %vm1837_vm5, %v4846_v29  ;;  %v4045_v27 = vsel %vm1269_vm4, %v4043_v12, %v4044_v61  ;;  %v4467_v32 = vsel %vm1692_vm3, %v4465_v52, %v4466_v56  ;;  %v7599_v46 = vpop.f32.mrb[200].mxu0  ;;  %v4612_v39 = vadd.f32 %v4580_v28, %v4548_v62  ;;  %v4050_v52 = vsel %vm1269_vm4, %v4048_v54, %v4049_v45 }
 0x289   : > { %vm4781_vm2 = vcmp.ge.f32.partialorder %v4749_v57, 0.0  ;;  %v4813_v1 = vmul.f32 0.2, %v4749_v57  ;;  %v4675_v35 = vld [vmem:[#allocation3 + $0x78] sm:$0xff]  ;;  %v4128_v14 = vadd.f32 %v7321_v4, %v4045_v27  ;;  %v4751_v20 = vadd.f32 %v7428_v9, %v4712_v13  ;;  %v7603_v50 = vpop.f32.mrb[200].mxu1  ;;  %v7605_v24 = vpop.f32.mrb[201].mxu0 }
 0x28a   : > { %v4714_v8 = vmul.f32 %v7421_v25, %v4675_v35  ;;  %v4674_v38 = vld [vmem:[#allocation3 + $0x70] sm:$0xff]  ;;  %v4613_v12 = vadd.f32 %v4581_v53, %v4549_v42  ;;  %v3887_v22 = vpop.f32.mrb[201].mxu1  ;;  %v7611_v17 = vpop.f32.mrb[202].mxu0  ;;  %4644 = vst.msk [vmem:[#allocation3 + $0x80] sm:$0xff] %vm1837_vm5, %v4612_v39  ;;  %v4130_v36 = vadd.f32 %v7331_v15, %v4050_v52  ;;  %v4472_v0 = vsel %vm1692_vm3, %v4470_v16, %v4471_v6  ;;  %v4584_v13 = vld [vmem:[#allocation3 + $0xa0] sm:$0xff] }
 0x28b   : > { %v4845_v26 = vsel %vm4781_vm2, %v4749_v57, %v4813_v1  ;;  %v4713_v4 = vmul.f32 %v7421_v25, %v4674_v38  ;;  %v4550_v3 = vadd.f32 %v4467_v32, %v4128_v14  ;;  %vm4783_vm6 = vcmp.ge.f32.partialorder %v4751_v20, 0.0  ;;  %v5963_v10 = vpop.f32.mrb[202].mxu1  ;;  %v7619_v31 = vpop.f32.mrb[203].mxu0 }
 0x28c   : > { %4877 = vst.msk [vmem:[%s7450_s17 + $0x58] sm:$0xff] %vm1837_vm5, %v4845_v26  ;;  %v4815_v41 = vmul.f32 0.2, %v4751_v20  ;;  %v4753_v11 = vadd.f32 %v7428_v9, %v4714_v8  ;;  %4645 = vst.msk [vmem:[#allocation3 + $0x88] sm:$0xff] %vm1837_vm5, %v4613_v12  ;;  %v4046_v63 = vrot.slane %v7580_v5, 1  ;;  %v3890_v34 = vpop.f32.mrb[203].mxu1  ;;  %v4552_v15 = vadd.f32 %v4472_v0, %v4130_v36 }
 0x28d   : > { %v4752_v54 = vadd.f32 %v7428_v9, %v4713_v4  ;;  %v4614_v60 = vadd.f32 %v4582_v21, %v4550_v3  ;;  %v4468_v16 = vrot.slane %v7577_v33, 2  ;;  %v4054_v28 = vrot.slane %v7603_v50, 1 }
 0x28e   : > { %v4847_v29 = vsel %vm4783_vm6, %v4751_v20, %v4815_v41  ;;  %vm4785_vm7 = vcmp.ge.f32.partialorder %v4753_v11, 0.0  ;;  %v4817_v57 = vmul.f32 0.2, %v4753_v11  ;;  %v4047_v44 = vsel %vm1269_vm4, %v4044_v61, %v4046_v63 }
 0x28f   : > { %4879 = vst.msk [vmem:[%s7450_s17 + $0x68] sm:$0xff] %vm1837_vm5, %v4847_v29  ;;  %vm4784_vm8 = vcmp.ge.f32.partialorder %v4752_v54, 0.0  ;;  %v4816_v23 = vmul.f32 0.2, %v4752_v54  ;;  %4646 = vst.msk [vmem:[#allocation3 + $0x90] sm:$0xff] %vm1837_vm5, %v4614_v60  ;;  %v4616_v5 = vadd.f32 %v4584_v13, %v4552_v15  ;;  %v4129_v42 = vadd.f32 %v4047_v44, %v7333_v48  ;;  %v4583_v48 = vld [vmem:[#allocation3 + $0x98] sm:$0xff] }
 0x290   : > { %v4849_v62 = vsel %vm4785_vm7, %v4753_v11, %v4817_v57  ;;  %v4469_v1 = vsel %vm1692_vm3, %v4466_v56, %v4468_v16  ;;  %v4476_v35 = vrot.slane %v7599_v46, 2  ;;  %v4051_v53 = vrot.slane %v3887_v22, 1  ;;  %v7641_v14 = vpop.f32.mrb[204].mxu0  ;;  %v4585_v60 = vld [vmem:[#allocation3 + $0xa8] sm:$0xff] }
 0x291   : > { %4881 = vst.msk [vmem:[%s7450_s17 + $0x78] sm:$0xff] %vm1837_vm5, %v4849_v62  ;;  %v4848_v27 = vsel %vm4784_vm8, %v4752_v54, %v4816_v23  ;;  %4648 = vst.msk [vmem:[#allocation3 + $0xa0] sm:$0xff] %vm1837_vm5, %v4616_v5  ;;  %v4551_v33 = vadd.f32 %v4469_v1, %v4129_v42  ;;  %v4473_v61 = vrot.slane %v7605_v24, 2  ;;  %v4056_v32 = vrot.slane %v5963_v10, 1  ;;  %v7648_v8 = vpop.f32.mrb[204].mxu1  ;;  %v7650_v55 = vpop.f32.mrb[205].mxu0 }
 0x292   : > { %4880 = vst.msk [vmem:[%s7450_s17 + $0x70] sm:$0xff] %vm1837_vm5, %v4848_v27  ;;  %v4478_v20 = vrot.slane %v7611_v17, 2  ;;  %v4676_v56 = vld [vmem:[#allocation3 + $0x80] sm:$0xff]  ;;  %v4052_v38 = vsel %vm1269_vm4, %v4049_v45, %v4051_v53  ;;  %v4053_v39 = vrot.slane %v3890_v34, 1  ;;  %v4475_v12 = vrot.slane %v7619_v31, 2  ;;  %v7657_v26 = vpop.f32.mrb[205].mxu1 }
 0x293   : > { %v4677_v46 = vld [vmem:[#allocation3 + $0x88] sm:$0xff]  ;;  %v4061_v50 = vrot.slane %v7648_v8, 1  ;;  %v4715_v24 = vmul.f32 %v7421_v25, %v4676_v56  ;;  %v4615_v3 = vadd.f32 %v4583_v48, %v4551_v33  ;;  %v4131_v52 = vadd.f32 %v7335_v19, %v4052_v38  ;;  %v7662_v22 = vpop.f32.mrb[206].mxu1  ;;  %v7664_v17 = vpop.f32.mrb[206].mxu0  ;;  %v4587_v42 = vld [vmem:[#allocation3 + $0xb8] sm:$0xff] }
 0x294   : > { %v4716_v4 = vmul.f32 %v7421_v25, %v4677_v46  ;;  %v4474_v47 = vsel %vm1692_vm3, %v4471_v6, %v4473_v61  ;;  %v4057_v45 = vsel %vm1269_vm4, %v4054_v28, %v4056_v32  ;;  %v4479_v41 = vsel %vm1692_vm3, %v4476_v35, %v4478_v20  ;;  %v3906_v21 = vpop.f32.mrb[207].mxu1  ;;  %v7672_v36 = vpop.f32.mrb[207].mxu0 }
 0x295   : > { %v4055_v11 = vsel %vm1269_vm4, %v4053_v39, %v4054_v28  ;;  %v4754_v10 = vadd.f32 %v7428_v9, %v4715_v24  ;;  %4647 = vst.msk [vmem:[#allocation3 + $0x98] sm:$0xff] %vm1837_vm5, %v4615_v3  ;;  %v4553_v54 = vadd.f32 %v4474_v47, %v4131_v52  ;;  %v4133_v58 = vadd.f32 %v7345_v18, %v4057_v45  ;;  %v4586_v28 = vld [vmem:[#allocation3 + $0xb0] sm:$0xff] }
 0x296   : > { %v4755_v19 = vadd.f32 %v7428_v9, %v4716_v4  ;;  %v4678_v31 = vld [vmem:[#allocation3 + $0x90] sm:$0xff]  ;;  %v4132_v0 = vadd.f32 %v4055_v11, %v7349_v40  ;;  %v4477_v63 = vsel %vm1692_vm3, %v4475_v12, %v4476_v35  ;;  %v4483_v34 = vrot.slane %v7641_v14, 2 }
 0x297   : > { %v4717_v6 = vmul.f32 %v7421_v25, %v4678_v31  ;;  %vm4786_vm9 = vcmp.ge.f32.partialorder %v4754_v10, 0.0  ;;  %v4818_v29 = vmul.f32 0.2, %v4754_v10  ;;  %v4617_v13 = vadd.f32 %v4585_v60, %v4553_v54 }
 0x298   : > { %vm4787_vm10 = vcmp.ge.f32.partialorder %v4755_v19, 0.0  ;;  %v4819_v57 = vmul.f32 0.2, %v4755_v19  ;;  %v4680_v23 = vld [vmem:[#allocation3 + $0xa0] sm:$0xff]  ;;  %v4555_v18 = vadd.f32 %v4479_v41, %v4133_v58  ;;  %v4554_v44 = vadd.f32 %v4477_v63, %v4132_v0  ;;  %v7683_v16 = vpop.f32.mrb[208].mxu0 }
 0x299   : > { %v4756_v15 = vadd.f32 %v7428_v9, %v4717_v6  ;;  %v4850_v62 = vsel %vm4786_vm9, %v4754_v10, %v4818_v29  ;;  %v4719_v5 = vmul.f32 %v7421_v25, %v4680_v23  ;;  %v4058_v27 = vrot.slane %v7657_v26, 1  ;;  %v5970_v1 = vpop.f32.mrb[208].mxu1  ;;  %v7687_v35 = vpop.f32.mrb[209].mxu0  ;;  %4649 = vst.msk [vmem:[#allocation3 + $0xa8] sm:$0xff] %vm1837_vm5, %v4617_v13  ;;  %v4588_v29 = vld [vmem:[#allocation3 + $0xc0] sm:$0xff] }
 0x29a   : > { %v4851_v40 = vsel %vm4787_vm10, %v4755_v19, %v4819_v57  ;;  %4882 = vst.msk [vmem:[%s7450_s17 + $0x80] sm:$0xff] %vm1837_vm5, %v4850_v62  ;;  %v4619_v14 = vadd.f32 %v4587_v42, %v4555_v18  ;;  %v4618_v33 = vadd.f32 %v4586_v28, %v4554_v44  ;;  %v7694_v48 = vpop.f32.mrb[209].mxu1  ;;  %v7696_v61 = vpop.f32.mrb[210].mxu0  ;;  %v4480_v20 = vrot.slane %v7650_v55, 2  ;;  %v4589_v57 = vld [vmem:[#allocation3 + $0xc8] sm:$0xff] }
 0x29b   : > { %4883 = vst.msk [vmem:[%s7450_s17 + $0x88] sm:$0xff] %vm1837_vm5, %v4851_v40  ;;  %vm4788_vm11 = vcmp.ge.f32.partialorder %v4756_v15, 0.0  ;;  %v4820_v53 = vmul.f32 0.2, %v4756_v15  ;;  %v4758_v32 = vadd.f32 %v7428_v9, %v4719_v5  ;;  %v4063_v56 = vrot.slane %v7662_v22, 1  ;;  %v7702_v38 = vpop.f32.mrb[210].mxu1 }
 0x29c   : > { %v4485_v46 = vrot.slane %v7664_v17, 2  ;;  %v7704_v39 = vpop.f32.mrb[211].mxu0  ;;  %v4679_v26 = vld [vmem:[#allocation3 + $0x98] sm:$0xff]  ;;  %4651 = vst.msk [vmem:[#allocation3 + $0xb8] sm:$0xff] %vm1837_vm5, %v4619_v14  ;;  %4650 = vst.msk [vmem:[#allocation3 + $0xb0] sm:$0xff] %vm1837_vm5, %v4618_v33  ;;  %v4059_v24 = vrot.slane %v3906_v21, 1 }
 0x29d   : > { %v4852_v12 = vsel %vm4788_vm11, %v4756_v15, %v4820_v53  ;;  %v4481_v4 = vrot.slane %v7672_v36, 2  ;;  %v4068_v3 = vrot.slane %v5970_v1, 1  ;;  %v7709_v55 = vpop.f32.mrb[211].mxu1  ;;  %vm4790_vm12 = vcmp.ge.f32.partialorder %v4758_v32, 0.0 }
 0x29e   : > { %4884 = vst.msk [vmem:[%s7450_s17 + $0x90] sm:$0xff] %vm1837_vm5, %v4852_v12  ;;  %v4822_v52 = vmul.f32 0.2, %v4758_v32  ;;  %v4718_v22 = vmul.f32 %v7421_v25, %v4679_v26  ;;  %v4490_v17 = vrot.slane %v7683_v16, 2  ;;  %v4060_v47 = vsel %vm1269_vm4, %v4058_v27, %v4059_v24  ;;  %v4590_v26 = vld [vmem:[#allocation3 + $0xd0] sm:$0xff] }
 0x29f   : > { %v4062_v45 = vsel %vm1269_vm4, %v4059_v24, %v4061_v50  ;;  %v4482_v41 = vsel %vm1692_vm3, %v4480_v20, %v4481_v4  ;;  %v4484_v11 = vsel %vm1692_vm3, %v4481_v4, %v4483_v34  ;;  %v4134_v10 = vadd.f32 %v4060_v47, %v7358_v37 }
 0x2a0   : > { %v4854_v21 = vsel %vm4790_vm12, %v4758_v32, %v4822_v52  ;;  %v4757_v36 = vadd.f32 %v7428_v9, %v4718_v22  ;;  %v4135_v19 = vadd.f32 %v4062_v45, %v7364_v59  ;;  %v4064_v31 = vrot.slane %v7694_v48, 1  ;;  %v7730_v58 = vpop.f32.mrb[212].mxu0  ;;  %v4681_v60 = vld [vmem:[#allocation3 + $0xa8] sm:$0xff] }
 0x2a1   : > { %4886 = vst.msk [vmem:[%s7450_s17 + $0xa0] sm:$0xff] %vm1837_vm5, %v4854_v21  ;;  %v4486_v54 = vrot.slane %v7687_v35, 2  ;;  %v4069_v8 = vrot.slane %v7702_v38, 1  ;;  %v4491_v50 = vrot.slane %v7696_v61, 2  ;;  %v4556_v0 = vadd.f32 %v4482_v41, %v4134_v10  ;;  %v7732_v37 = vpop.f32.mrb[212].mxu1  ;;  %v7734_v59 = vpop.f32.mrb[213].mxu0 }
 0x2a2   : > { %vm4789_vm13 = vcmp.ge.f32.partialorder %v4757_v36, 0.0  ;;  %v4821_v6 = vmul.f32 0.2, %v4757_v36  ;;  %v4557_v63 = vadd.f32 %v4484_v11, %v4135_v19  ;;  %v4720_v34 = vmul.f32 %v7421_v25, %v4681_v60  ;;  %v3935_v18 = vpop.f32.mrb[213].mxu1  ;;  %v7742_v44 = vpop.f32.mrb[214].mxu0 }
 0x2a3   : > { %v4065_v15 = vsel %vm1269_vm4, %v4063_v56, %v4064_v31  ;;  %v4487_v23 = vsel %vm1692_vm3, %v4485_v46, %v4486_v54  ;;  %v4070_v13 = vsel %vm1269_vm4, %v4068_v3, %v4069_v8  ;;  %v4683_v62 = vld [vmem:[#allocation3 + $0xb8] sm:$0xff]  ;;  %v4682_v40 = vld [vmem:[#allocation3 + $0xb0] sm:$0xff]  ;;  %v4620_v5 = vadd.f32 %v4588_v29, %v4556_v0  ;;  %v5975_v27 = vpop.f32.mrb[214].mxu1  ;;  %v4360_v1 = vpop.f32.mrb[215].mxu0 }
 0x2a4   : > { %v4853_v16 = vsel %vm4789_vm13, %v4757_v36, %v4821_v6  ;;  %v4621_v42 = vadd.f32 %v4589_v57, %v4557_v63  ;;  %v4136_v28 = vadd.f32 %v7361_v2, %v4065_v15  ;;  %v4759_v35 = vadd.f32 %v7428_v9, %v4720_v34  ;;  %v3938_v48 = vpop.f32.mrb[215].mxu1  ;;  %v4591_v0 = vld [vmem:[#allocation3 + $0xd8] sm:$0xff] }
 0x2a5   : > { %4885 = vst.msk [vmem:[%s7450_s17 + $0x98] sm:$0xff] %vm1837_vm5, %v4853_v16  ;;  %v4722_v53 = vmul.f32 %v7421_v25, %v4683_v62  ;;  %v4721_v14 = vmul.f32 %v7421_v25, %v4682_v40  ;;  %v4138_v33 = vadd.f32 %v7371_v7, %v4070_v13  ;;  %4652 = vst.msk [vmem:[#allocation3 + $0xc0] sm:$0xff] %vm1837_vm5, %v4620_v5  ;;  %v4066_v20 = vrot.slane %v7709_v55, 1  ;;  %v4593_v16 = vld [vmem:[#allocation3 + $0xe8] sm:$0xff]  ;;  %v6137_v5 = vld [vmem:[%s7831_s4] ss:$0 sm:$0xff] }
 0x2a6   : > { %4653 = vst.msk [vmem:[#allocation3 + $0xc8] sm:$0xff] %vm1837_vm5, %v4621_v42  ;;  %v4558_v32 = vadd.f32 %v4487_v23, %v4136_v28  ;;  %v4492_v2 = vsel %vm1692_vm3, %v4490_v17, %v4491_v50  ;;  %v4488_v56 = vrot.slane %v7704_v39, 2  ;;  %vm4791_vm14 = vcmp.ge.f32.partialorder %v4759_v35, 0.0  ;;  %v4592_v17 = vld [vmem:[#allocation3 + $0xe0] sm:$0xff] }
 0x2a7   : > { %v4823_v46 = vmul.f32 0.2, %v4759_v35  ;;  %v4761_v12 = vadd.f32 %v7428_v9, %v4722_v53  ;;  %v4760_v7 = vadd.f32 %v7428_v9, %v4721_v14  ;;  %v4560_v4 = vadd.f32 %v4492_v2, %v4138_v33  ;;  %v4595_v14 = vld [vmem:[#allocation3 + $0xf8] sm:$0xff] }
 0x2a8   : > { %v4622_v24 = vadd.f32 %v4590_v26, %v4558_v32  ;;  %v4067_v3 = vsel %vm1269_vm4, %v4064_v31, %v4066_v20  ;;  %v4489_v52 = vsel %vm1692_vm3, %v4486_v54, %v4488_v56  ;;  %v4074_v41 = vrot.slane %v7732_v37, 1  ;;  %v6138_v33 = vld [vmem:[%s7832_s5] ss:$0 sm:$0xff] }
 0x2a9   : > { %v4855_v22 = vsel %vm4791_vm14, %v4759_v35, %v4823_v46  ;;  %vm4793_vm15 = vcmp.ge.f32.partialorder %v4761_v12, 0.0  ;;  %v4825_v55 = vmul.f32 0.2, %v4761_v12  ;;  %vm4792_vm0 = vcmp.ge.f32.partialorder %v4760_v7, 0.0 }
 0x2aa   : > { %4887 = vst.msk [vmem:[%s7450_s17 + $0xa8] sm:$0xff] %vm1837_vm5, %v4855_v22  ;;  %v4824_v39 = vmul.f32 0.2, %v4760_v7  ;;  %4654 = vst.msk [vmem:[#allocation3 + $0xd0] sm:$0xff] %vm1837_vm5, %v4622_v24  ;;  %v4624_v47 = vadd.f32 %v4592_v17, %v4560_v4  ;;  %v4137_v45 = vadd.f32 %v4067_v3, %v7373_v43  ;;  %v4496_v21 = vrot.slane %v7730_v58, 2 }
 0x2ab   : > { %v4857_v11 = vsel %vm4793_vm15, %v4761_v12, %v4825_v55  ;;  %v4071_v36 = vrot.slane %v3935_v18, 1  ;;  %v4493_v10 = vrot.slane %v7734_v59, 2  ;;  %v4076_v54 = vrot.slane %v5975_v27, 1 }
 0x2ac   : > { %4889 = vst.msk [vmem:[%s7450_s17 + $0xb8] sm:$0xff] %vm1837_vm5, %v4857_v11  ;;  %v4856_v19 = vsel %vm4792_vm0, %v4760_v7, %v4824_v39  ;;  %4656 = vst.msk [vmem:[#allocation3 + $0xe0] sm:$0xff] %vm1837_vm5, %v4624_v47  ;;  %v4559_v31 = vadd.f32 %v4489_v52, %v4137_v45  ;;  %v4498_v6 = vrot.slane %v7742_v44, 2  ;;  %v4684_v43 = vld [vmem:[#allocation3 + $0xc0] sm:$0xff]  ;;  %v4073_v37 = vrot.slane %v3938_v48, 1 }
 0x2ad   : > { %4888 = vst.msk [vmem:[%s7450_s17 + $0xb0] sm:$0xff] %vm1837_vm5, %v4856_v19  ;;  %v4685_v60 = vld [vmem:[#allocation3 + $0xc8] sm:$0xff]  ;;  %v4072_v58 = vsel %vm1269_vm4, %v4069_v8, %v4071_v36  ;;  %v4494_v63 = vsel %vm1692_vm3, %v4491_v50, %v4493_v10  ;;  %v4495_v59 = vrot.slane %v4360_v1, 2  ;;  %v4723_v34 = vmul.f32 %v7421_v25, %v4684_v43 }
 0x2ae   : > { %v4724_v29 = vmul.f32 %v7421_v25, %v4685_v60  ;;  %v4623_v57 = vadd.f32 %v4591_v0, %v4559_v31  ;;  %v4139_v15 = vadd.f32 %v7375_v51, %v4072_v58  ;;  %v4077_v23 = vsel %vm1269_vm4, %v4074_v41, %v4076_v54 }
 0x2af   : > { %v4499_v13 = vsel %vm1692_vm3, %v4496_v21, %v4498_v6  ;;  %v4075_v38 = vsel %vm1269_vm4, %v4073_v37, %v4074_v41  ;;  %v4497_v8 = vsel %vm1692_vm3, %v4495_v59, %v4496_v21  ;;  %v4762_v61 = vadd.f32 %v7428_v9, %v4723_v34 }
 0x2b0   : > { %v4763_v50 = vadd.f32 %v7428_v9, %v4724_v29  ;;  %4655 = vst.msk [vmem:[#allocation3 + $0xd8] sm:$0xff] %vm1837_vm5, %v4623_v57  ;;  %v4561_v18 = vadd.f32 %v4494_v63, %v4139_v15  ;;  %v4141_v25 = vadd.f32 %v7385_v30, %v4077_v23  ;;  %v4140_v51 = vadd.f32 %v4075_v38, %v7389_v49  ;;  %v4594_v49 = vld [vmem:[#allocation3 + $0xf0] sm:$0xff] }
 0x2b1   : > { %v4686_v44 = vld [vmem:[#allocation3 + $0xd0] sm:$0xff]  ;;  %vm4794_vm1 = vcmp.ge.f32.partialorder %v4762_v61, 0.0  ;;  %v4826_v62 = vmul.f32 0.2, %v4762_v61 }
 0x2b2   : > { %vm4795_vm2 = vcmp.ge.f32.partialorder %v4763_v50, 0.0  ;;  %v4827_v40 = vmul.f32 0.2, %v4763_v50  ;;  %v4725_v9 = vmul.f32 %v6137_v5, %v4686_v44  ;;  %v4625_v28 = vadd.f32 %v4593_v16, %v4561_v18 }
 0x2b3   : > { %v4688_v42 = vld [vmem:[#allocation3 + $0xe0] sm:$0xff]  ;;  %v4563_v27 = vadd.f32 %v4499_v13, %v4141_v25  ;;  %v4562_v1 = vadd.f32 %v4497_v8, %v4140_v51  ;;  %v4858_v30 = vsel %vm4794_vm1, %v4762_v61, %v4826_v62 }
 0x2b4   : > { %v4859_v35 = vsel %vm4795_vm2, %v4763_v50, %v4827_v40  ;;  %v4727_v53 = vmul.f32 %v6137_v5, %v4688_v42  ;;  %4890 = vst.msk [vmem:[%s7450_s17 + $0xc0] sm:$0xff] %vm1837_vm5, %v4858_v30  ;;  %v4764_v48 = vadd.f32 %v6138_v33, %v4725_v9  ;;  %4657 = vst.msk [vmem:[#allocation3 + $0xe8] sm:$0xff] %vm1837_vm5, %v4625_v28 }
 0x2b5   : > { %4891 = vst.msk [vmem:[%s7450_s17 + $0xc8] sm:$0xff] %vm1837_vm5, %v4859_v35  ;;  %v4627_v32 = vadd.f32 %v4595_v14, %v4563_v27  ;;  %v4626_v2 = vadd.f32 %v4594_v49, %v4562_v1 }
 0x2b6   : > { %v4766_v20 = vadd.f32 %v6138_v33, %v4727_v53  ;;  %vm4796_vm3 = vcmp.ge.f32.partialorder %v4764_v48, 0.0  ;;  %v4828_v56 = vmul.f32 0.2, %v4764_v48 }
 0x2b7   : > { %v4687_v46 = vld [vmem:[#allocation3 + $0xd8] sm:$0xff]  ;;  %4659 = vst.msk [vmem:[#allocation3 + $0xf8] sm:$0xff] %vm1837_vm5, %v4627_v32  ;;  %4658 = vst.msk [vmem:[#allocation3 + $0xf0] sm:$0xff] %vm1837_vm5, %v4626_v2 }
 0x2b8   : > { %vm4798_vm4 = vcmp.ge.f32.partialorder %v4766_v20, 0.0  ;;  %v4830_v12 = vmul.f32 0.2, %v4766_v20  ;;  %v4726_v7 = vmul.f32 %v6137_v5, %v4687_v46  ;;  %v4860_v26 = vsel %vm4796_vm3, %v4764_v48, %v4828_v56 }
 0x2b9   : > { %4892 = vst.msk [vmem:[%s7450_s17 + $0xd0] sm:$0xff] %vm1837_vm5, %v4860_v26 }
 0x2ba   : > { %v4862_v24 = vsel %vm4798_vm4, %v4766_v20, %v4830_v12  ;;  %v4765_v4 = vadd.f32 %v6138_v33, %v4726_v7 }
 0x2bb   : > { %4894 = vst.msk [vmem:[%s7450_s17 + $0xe0] sm:$0xff] %vm1837_vm5, %v4862_v24  ;;  %v4689_v52 = vld [vmem:[#allocation3 + $0xe8] sm:$0xff] }
 0x2bc   : > { %vm4797_vm6 = vcmp.ge.f32.partialorder %v4765_v4, 0.0  ;;  %v4829_v3 = vmul.f32 0.2, %v4765_v4  ;;  %v4728_v22 = vmul.f32 %v6137_v5, %v4689_v52 }
 0x2be   : > { %v4861_v55 = vsel %vm4797_vm6, %v4765_v4, %v4829_v3  ;;  %v4691_v17 = vld [vmem:[#allocation3 + $0xf8] sm:$0xff]  ;;  %v4690_v39 = vld [vmem:[#allocation3 + $0xf0] sm:$0xff]  ;;  %v4767_v47 = vadd.f32 %v6138_v33, %v4728_v22 }
 0x2bf   : > { %4893 = vst.msk [vmem:[%s7450_s17 + $0xd8] sm:$0xff] %vm1837_vm5, %v4861_v55  ;;  %v4730_v45 = vmul.f32 %v6137_v5, %v4691_v17  ;;  %v4729_v41 = vmul.f32 %v6137_v5, %v4690_v39 }
 0x2c0   : > { %vm4799_vm7 = vcmp.ge.f32.partialorder %v4767_v47, 0.0  ;;  %v4831_v11 = vmul.f32 0.2, %v4767_v47 }
 0x2c1   : > { %v4769_v21 = vadd.f32 %v6138_v33, %v4730_v45  ;;  %v4768_v36 = vadd.f32 %v6138_v33, %v4729_v41 }
 0x2c2   : > { %v4863_v10 = vsel %vm4799_vm7, %v4767_v47, %v4831_v11 }
 0x2c3   : > { %vm4801_vm8 = vcmp.ge.f32.partialorder %v4769_v21, 0.0  ;;  %v4833_v19 = vmul.f32 0.2, %v4769_v21  ;;  %vm4800_vm9 = vcmp.ge.f32.partialorder %v4768_v36, 0.0  ;;  %4895 = vst.msk [vmem:[%s7450_s17 + $0xe8] sm:$0xff] %vm1837_vm5, %v4863_v10 }
 0x2c4   : > { %v4832_v31 = vmul.f32 0.2, %v4768_v36 }
 0x2c5   : > { %v4865_v54 = vsel %vm4801_vm8, %v4769_v21, %v4833_v19 }
 0x2c6   : > { %4897 = vst.msk [vmem:[%s7450_s17 + $0xf8] sm:$0xff] %vm1837_vm5, %v4865_v54  ;;  %v4864_v6 = vsel %vm4800_vm9, %v4768_v36, %v4832_v31 }
 0x2c7   : > { %4896 = vst.msk [vmem:[%s7450_s17 + $0xf0] sm:$0xff] %vm1837_vm5, %v4864_v6 }
 0x2c8 PF: > { %s16_s23 = sadd.s32 1, %s6161_s23   ;;  %s7874_s21 = smov %s6157_s22 }
 0x2c9   : > { %p13_p5 = scmp.ge.s32.totalorder %s16_s23, 4   ;;  %s7875_s22 = smov %s7877_s24 }
 0x2cb   :  { %15 = sbr.rel (!%p13_p5) target bundleno = 2 (0x2), region = 92 }

</bundles_post_ra>
